<compile_context>
chip_gen: v6e
topology: v6e:2x2x1
jax: 0.10.0
libtpu: 0.0.40
codegen_flags: <defaults>
</compile_context>

<pallas_src>
import functools

import jax
import jax.numpy as jnp
from jax import lax
from jax.experimental import pallas as pl
from jax.experimental.pallas import tpu as pltpu

_BN_EPS = 1e-5
_LANE_PAD = 128   # packed-output lane width (must be >= 3*num_classes - 1)


# ----------------------------- small math helpers -----------------------------

def _sigmoid(x):
    # sigmoid(x) = 0.5*(1 + tanh(x/2)): one EUP tanh, no exp overflow, no divide.
    return 0.5 * (jnp.tanh(0.5 * x) + 1.0)


def _gelu(x):
    # tanh-approximation GELU (== torch nn.GELU(approximate='tanh')); <~1.5e-3 abs delta
    # vs the exact-erf GELU of the reference module.
    c = 0.7978845608028654  # sqrt(2/pi)
    return 0.5 * x * (1.0 + jnp.tanh(c * (x + 0.044715 * x * x * x)))


def _linear(a, w_ref, b_ref):
    """Linear; bf16 weights use a bf16 activation cast, MXU accumulates in f32."""
    w = w_ref[...]
    if w.dtype == jnp.bfloat16:
        a = a.astype(jnp.bfloat16)
    return jnp.dot(a, w, preferred_element_type=jnp.float32) + b_ref[...]


# ------------------------------- kernel helpers -------------------------------

def _attention_pool_one(x, aw1, aw2, cmt, inv_hw):
    """LesionAttentionModule + weighted global mean pool for ONE batch element.

    x: (HW, C) lane-dense features.  aw1: (C, Cr), aw2: (Cr, C), cmt: (HW, 2*HW).
    Returns the pooled feature row h of shape (1, C)."""
    hw, c = x.shape

    # --- channel attention: shared MLP on the row-stacked [avg; max] (2, C) matrix ---
    avg_c = jnp.mean(x, axis=0, keepdims=True)                       # (1, C)
    max_c = jnp.max(x, axis=0, keepdims=True)                        # (1, C)
    row = lax.broadcasted_iota(jnp.int32, (2, c), 0)
    stacked = jnp.where(row == 0, avg_c, max_c)                      # (2, C)
    mid = jnp.maximum(
        jnp.dot(stacked, aw1, preferred_element_type=jnp.float32), 0.0)   # (2, Cr)
    both = jnp.dot(mid, aw2, preferred_element_type=jnp.float32)     # (2, C)
    ch_att = _sigmoid(both[0:1, :] + both[1:2, :])                   # (1, C) lane vector
    x_ch = x * ch_att                                                # (HW, C)

    # --- spatial attention: per-pixel channel mean/max, 7x7 conv as ONE matvec ---
    mean_map = jnp.mean(x_ch, axis=1, keepdims=True)                 # (HW, 1)
    max_map = jnp.max(x_ch, axis=1, keepdims=True)                   # (HW, 1)
    sp_in = jnp.concatenate([mean_map, max_map], axis=0)             # (2*HW, 1) aligned
    sp_att = _sigmoid(
        jnp.dot(cmt, sp_in, preferred_element_type=jnp.float32))     # (HW, 1)

    # --- weighted global average pool -> lane-dense (1, C) ---
    return jnp.sum(x_ch * sp_att, axis=0, keepdims=True) * inv_hw


def fused_kernel(*refs, inv_hw, with_aux):
    if with_aux:
        (x_ref, aw1_ref, aw2_ref, cmt_ref,
         cw1, cb1, cw2, cb2,
         gw1, gb1, gw2, gb2,
         ow1, ob1,
         fwc_ref, fwg_ref, fwo_ref, fb_ref,
         out_ref) = refs
    else:
        (x_ref, aw1_ref, aw2_ref, cmt_ref,
         cw1, cb1, cw2, cb2,
         fwc_ref, fb_ref,
         out_ref) = refs

    b_sz, _, c = x_ref.shape
    aw1 = aw1_ref[...]      # load attention weights once, reuse across the batch unroll
    aw2 = aw2_ref[...]
    cmt = cmt_ref[...]

    # --- attention + pooling: short static unroll over the batch ---
    rows = [_attention_pool_one(x_ref[b], aw1, aw2, cmt, inv_hw) for b in range(b_sz)]
    if b_sz == 1:
        h = rows[0]
    else:
        ridx = lax.broadcasted_iota(jnp.int32, (b_sz, c), 0)
        h = jnp.where(ridx == 0, rows[0], 0.0)
        for b in range(1, b_sz):
            h = jnp.where(ridx == b, rows[b], h)                     # (B, C)

    # --- classifier head: each matmul runs once with M = B rows (BN folded at prep) ---
    z = _gelu(_linear(h, cw1, cb1))
    z = _gelu(_linear(z, cw2, cb2))
    out = jnp.dot(z, fwc_ref[...], preferred_element_type=jnp.float32) + fb_ref[...]

    if with_aux:
        # GradeConsistencyHead (computed-then-discarded by the torch forward; optional).
        g = _gelu(_linear(h, gw1, gb1))
        g = _gelu(_linear(g, gw2, gb2))
        out = out + jnp.dot(g, fwg_ref[...], preferred_element_type=jnp.float32)
        o = _gelu(_linear(h, ow1, ob1))
        out = out + jnp.dot(o, fwo_ref[...], preferred_element_type=jnp.float32)

    out_ref[...] = out      # single unmasked, full-lane-width store


# ---------------------------- parameter preparation ----------------------------

def _spatial_conv_matrix(conv_w, H, W):
    """conv_w: (2, K, K) weights of Conv2d(2, 1, K, padding=(K-1)//2, bias=False).

    Returns M of shape (2, HW, HW) with out_flat[q] = sum_c sum_p in_flat[c, p] * M[c, p, q]
    (cross-correlation with zero padding, matching torch Conv2d, stride 1)."""
    cin, K, _ = conv_w.shape
    pad = (K - 1) // 2
    py = jnp.repeat(jnp.arange(H), W)              # row index of flattened pixel
    px = jnp.tile(jnp.arange(W), H)                # col index of flattened pixel
    dy = py[:, None] - py[None, :] + pad           # (HW_in, HW_out)
    dx = px[:, None] - px[None, :] + pad
    valid = (dy >= 0) & (dy < K) & (dx >= 0) & (dx < K)
    tap = jnp.clip(dy, 0, K - 1) * K + jnp.clip(dx, 0, K - 1)
    w_flat = conv_w.reshape(cin, K * K).astype(jnp.float32)
    return jnp.where(valid[None], w_flat[:, tap], 0.0)        # (2, HW, HW)


def _fold_bn(w, b, bn, eps=_BN_EPS):
    """Fold eval-mode BatchNorm1d into the preceding Linear (w: (in,out), b: (1,out))."""
    gamma, beta, mean, var = bn[0], bn[1], bn[2], bn[3]
    scale = gamma * lax.rsqrt(var + eps)
    w_f = w * scale[None, :]
    b_f = (b - mean[None, :]) * scale[None, :] + beta[None, :]
    return w_f, b_f.astype(jnp.float32)


def prepare_params(raw, H, W, lane_pad=_LANE_PAD):
    """Raw (torch-layout-equivalent) params -> kernel-ready params: BN folded, conv
    pre-expanded + concatenated, attention MLP pre-transposed, final Linears packed into
    a single lane-padded slab, big weights in bf16."""
    HW = H * W
    nc = int(raw["cw3"].shape[1])
    assert 3 * nc - 1 <= lane_pad, "increase lane_pad for this many classes"

    cm = _spatial_conv_matrix(raw["att_conv"], H, W)                 # (2, HW, HW)
    cm_t = jnp.concatenate([cm[0].T, cm[1].T], axis=1)               # (HW, 2*HW)

    cw1, cb1 = _fold_bn(raw["cw1"], raw["cb1"], raw["cbn1"])
    cw2, cb2 = _fold_bn(raw["cw2"], raw["cb2"], raw["cbn2"])
    gw1, gb1 = _fold_bn(raw["gw1"], raw["gb1"], raw["gbn1"])
    gw2, gb2 = _fold_bn(raw["gw2"], raw["gb2"], raw["gbn2"])

    # Final Linears zero-padded into one 128-lane output slab:
    #   lanes [0:nc]      -> classifier logits
    #   lanes [nc:2nc]    -> grade logits
    #   lanes [2nc:3nc-1] -> ordinal thresholds
    fw_c = jnp.zeros((raw["cw3"].shape[0], lane_pad), jnp.float32).at[:, :nc].set(raw["cw3"])
    fw_g = jnp.zeros((raw["gw3"].shape[0], lane_pad), jnp.float32).at[:, nc:2 * nc].set(raw["gw3"])
    fw_o = jnp.zeros((raw["ow2"].shape[0], lane_pad), jnp.float32).at[:, 2 * nc:3 * nc - 1].set(raw["ow2"])
    fb = (jnp.zeros((1, lane_pad), jnp.float32)
          .at[:, :nc].set(raw["cb3"])
          .at[:, nc:2 * nc].set(raw["gb3"])
          .at[:, 2 * nc:3 * nc - 1].set(raw["ob2"]))

    return dict(
        num_classes=nc,
        att_w1t=raw["att_w1"].T.astype(jnp.float32),                 # (C, Cr)
        att_w2t=raw["att_w2"].T.astype(jnp.float32),                 # (Cr, C)
        cm_t=cm_t.astype(jnp.float32),                               # (HW, 2*HW)
        cw1=cw1.astype(jnp.bfloat16), cb1=cb1,
        cw2=cw2.astype(jnp.bfloat16), cb2=cb2,
        gw1=gw1.astype(jnp.bfloat16), gb1=gb1,
        gw2=gw2.astype(jnp.bfloat16), gb2=gb2,
        ow1=raw["ow1"].astype(jnp.bfloat16), ob1=raw["ob1"].astype(jnp.float32),
        fw_c=fw_c, fw_g=fw_g, fw_o=fw_o, fb=fb,
    )


# --------------------------------- wrapper ---------------------------------

def enhanced_dr_classifier_forward(features, params, alpha=0.0, with_aux=False):
    """features: (B, C, H, W) backbone feature map (NCHW, float32).

    Returns classifier logits (B, num_classes), matching EnhancedDRClassifier.forward.
    with_aux=True also returns the GradeConsistencyHead outputs.  GradientReversal
    (alpha > 0) is identity in the forward pass (backward-only op)."""
    B, C, H, W = features.shape
    HW = H * W
    nc = params["num_classes"]
    pad = params["fb"].shape[-1]

    # Lane-dense layout: (B, HW, C) so channels sit on the 128-wide lane axis.
    x = jnp.transpose(features.reshape(B, C, HW), (0, 2, 1)).astype(jnp.float32)

    names = ["att_w1t", "att_w2t", "cm_t", "cw1", "cb1", "cw2", "cb2"]
    if with_aux:
        names += ["gw1", "gb1", "gw2", "gb2", "ow1", "ob1"]
    names += ["fw_c"] + (["fw_g", "fw_o"] if with_aux else []) + ["fb"]
    weights = [params[n] for n in names]

    # Constant index maps: every weight block is DMA'd once and stays VMEM-resident.
    in_specs = [pl.BlockSpec((B, HW, C), lambda i: (0, 0, 0))]
    in_specs += [pl.BlockSpec(w.shape, (lambda i, n=w.ndim: (0,) * n)) for w in weights]
    out_spec = pl.BlockSpec((B, pad), lambda i: (0, 0))

    mm_flops = 2 * B * sum(int(w.shape[0]) * int(w.shape[1])
                           for w in weights if w.ndim == 2 and w.shape[0] > 1)
    bytes_acc = (int(x.size) * 4
                 + sum(int(w.size) * w.dtype.itemsize for w in weights)
                 + B * pad * 4)
    cost = pl.CostEstimate(flops=int(mm_flops + 4 * B * HW * C),
                           transcendentals=int(B * (C + HW + 8192)),
                           bytes_accessed=int(bytes_acc))

    kern = functools.partial(fused_kernel, inv_hw=1.0 / HW, with_aux=with_aux)
    out = pl.pallas_call(
        kern,
        out_shape=jax.ShapeDtypeStruct((B, pad), jnp.float32),
        grid=(1,),          # whole batch in one step -> heads run once with M = B
        in_specs=in_specs,
        out_specs=out_spec,
        compiler_params=pltpu.CompilerParams(
            # "arbitrary": do not shard a tiny batch across v7x's two TensorCores
            # (that would duplicate the full constant-weight DMA per core).
            dimension_semantics=("arbitrary",)),
        cost_estimate=cost,
    )(x, *weights)

    logits = out[:, :nc]
    if with_aux:
        return logits, out[:, nc:2 * nc], out[:, 2 * nc:3 * nc - 1]
    return logits


# ------------------------- pure-JAX reference (torch math) -------------------------

def _reference_forward(features, raw, eps=_BN_EPS):
    """f32 reference matching the torch module (eval mode): exact-erf GELU, unfolded BN."""
    B, C, H, W = features.shape
    x = features.astype(jnp.float32)

    def att_mlp(v):                                    # v: (B, C)
        mid = jnp.maximum(v @ raw["att_w1"].T, 0.0)
        return mid @ raw["att_w2"].T

    avg = jnp.mean(x, axis=(2, 3))
    mx = jnp.max(x, axis=(2, 3))
    ch_att = _sigmoid(att_mlp(avg) + att_mlp(mx))                    # (B, C)
    x_ch = x * ch_att[:, :, None, None]
    sp_in = jnp.stack([jnp.mean(x_ch, axis=1), jnp.max(x_ch, axis=1)], axis=1)  # (B,2,H,W)
    K = raw["att_conv"].shape[-1]
    p = (K - 1) // 2
    conv = lax.conv_general_dilated(sp_in, raw["att_conv"][None], (1, 1),
                                    [(p, p), (p, p)],
                                    dimension_numbers=("NCHW", "OIHW", "NCHW"))
    sp_att = _sigmoid(conv)                                          # (B, 1, H, W)
    h = jnp.mean(x_ch * sp_att, axis=(2, 3))                         # (B, C)

    def bn(z, par):
        g, b, m, v = par[0], par[1], par[2], par[3]
        return (z - m) * (g * lax.rsqrt(v + eps)) + b

    def gelu_exact(z):
        return 0.5 * z * (1.0 + lax.erf(z * 0.7071067811865476))

    z = gelu_exact(bn(h @ raw["cw1"] + raw["cb1"], raw["cbn1"]))
    z = gelu_exact(bn(z @ raw["cw2"] + raw["cb2"], raw["cbn2"]))
    logits = z @ raw["cw3"] + raw["cb3"]

    g_ = gelu_exact(bn(h @ raw["gw1"] + raw["gb1"], raw["gbn1"]))
    g_ = gelu_exact(bn(g_ @ raw["gw2"] + raw["gb2"], raw["gbn2"]))
    grade = g_ @ raw["gw3"] + raw["gb3"]

    o = gelu_exact(h @ raw["ow1"] + raw["ob1"])
    thr = o @ raw["ow2"] + raw["ob2"]
    return logits, grade, thr


# ------------------------------ parameter init ------------------------------

def init_raw_params(key, feature_dim, num_classes, reduction=8,
                    cls_hidden=(1024, 512), grade_hidden=(512, 256), ord_hidden=256,
                    spatial_kernel=7):
    ks = iter(jax.random.split(key, 64))

    def w(shape, scale=0.02):
        return scale * jax.random.normal(next(ks), shape, jnp.float32)

    def bn(n):
        return jnp.stack([
            1.0 + 0.1 * jax.random.normal(next(ks), (n,), jnp.float32),           # gamma
            0.1 * jax.random.normal(next(ks), (n,), jnp.float32),                 # beta
            0.1 * jax.random.normal(next(ks), (n,), jnp.float32),                 # running_mean
            1.0 + 0.1 * jnp.abs(jax.random.normal(next(ks), (n,), jnp.float32)),  # running_var
        ], axis=0)

    C, Cr = feature_dim, feature_dim // reduction
    h1, h2 = cls_hidden
    g1, g2 = grade_hidden
    return dict(
        att_w1=w((Cr, C)),                       # Conv2d(C, C//r, 1, bias=False) as matrix
        att_w2=w((C, Cr)),                       # Conv2d(C//r, C, 1, bias=False) as matrix
        att_conv=w((2, spatial_kernel, spatial_kernel)),   # Conv2d(2, 1, 7, bias=False).weight[0]
        cw1=w((C, h1)), cb1=w((1, h1)), cbn1=bn(h1),
        cw2=w((h1, h2)), cb2=w((1, h2)), cbn2=bn(h2),
        cw3=w((h2, num_classes)), cb3=w((1, num_classes)),
        gw1=w((C, g1)), gb1=w((1, g1)), gbn1=bn(g1),
        gw2=w((g1, g2)), gb2=w((1, g2)), gbn2=bn(g2),
        gw3=w((g2, num_classes)), gb3=w((1, num_classes)),
        ow1=w((C, ord_hidden)), ob1=w((1, ord_hidden)),
        ow2=w((ord_hidden, num_classes - 1)), ob2=w((1, num_classes - 1)),
    )


if __name__ == "__main__":
    B, C, H, W = 2, 128, 8, 8
    NUM_CLASSES = 5

    key = jax.random.PRNGKey(0)
    k_feat, k_param = jax.random.split(key)
    features = jax.random.normal(k_feat, (B, C, H, W), jnp.float32)
    raw = init_raw_params(k_param, C, NUM_CLASSES)
    params = prepare_params(raw, H, W)     # fold BN, expand conv, transpose, bf16, pack

    # Fast path: exactly what EnhancedDRClassifier.forward returns.
    logits = enhanced_dr_classifier_forward(features, params, alpha=0.0)
    logits = jax.block_until_ready(logits)
    assert logits.shape == (B, NUM_CLASSES)

    # Optional path: also produce the GradeConsistencyHead outputs.
    logits2, grade, thr = enhanced_dr_classifier_forward(features, params, with_aux=True)
    jax.block_until_ready((logits2, grade, thr))
    assert grade.shape == (B, NUM_CLASSES) and thr.shape == (B, NUM_CLASSES - 1)

    # Pure-JAX f32 reference (exact-erf GELU, unfolded BN); tolerance covers the bf16
    # head weights + tanh-GELU approximations used inside the kernel.
    ref_logits, ref_grade, ref_thr = _reference_forward(features, raw)
    assert bool(jnp.allclose(logits, ref_logits, atol=5e-3, rtol=5e-2)), "logits mismatch"
    assert bool(jnp.allclose(grade, ref_grade, atol=5e-3, rtol=5e-2)), "grade mismatch"
    assert bool(jnp.allclose(thr, ref_thr, atol=5e-3, rtol=5e-2)), "threshold mismatch"
    assert bool(jnp.allclose(logits, logits2, atol=1e-5)), "aux/non-aux logits differ"

    print("KERNEL_OK")
</pallas_src>

<mosaic_0001>
module attributes {stable_mosaic.version = 11 : i64} {
  func.func @fused_kernel(%arg0: i32, %arg1: memref<2x64x128xf32, #tpu.memory_space<vmem>>, %arg2: memref<128x16xf32, #tpu.memory_space<vmem>>, %arg3: memref<16x128xf32, #tpu.memory_space<vmem>>, %arg4: memref<64x128xf32, #tpu.memory_space<vmem>>, %arg5: memref<128x1024xbf16, #tpu.memory_space<vmem>>, %arg6: memref<1x1024xf32, #tpu.memory_space<vmem>>, %arg7: memref<1024x512xbf16, #tpu.memory_space<vmem>>, %arg8: memref<1x512xf32, #tpu.memory_space<vmem>>, %arg9: memref<512x128xf32, #tpu.memory_space<vmem>>, %arg10: memref<1x128xf32, #tpu.memory_space<vmem>>, %arg11: memref<2x128xf32, #tpu.memory_space<vmem>>) attributes {dimension_semantics = [#tpu.dimension_semantics<arbitrary>], iteration_bounds = array<i64: 1>, scalar_prefetch = 0 : i64, scratch_operands = 0 : i64, tpu.core_type = #tpu.core_type<tc>, window_params = [{pipeline_mode = #tpu.pipeline_mode<synchronous>, transform_indices = @transform_0, window_bounds = array<i64: 2, 64, 128>}, {pipeline_mode = #tpu.pipeline_mode<synchronous>, transform_indices = @transform_1, window_bounds = array<i64: 128, 16>}, {pipeline_mode = #tpu.pipeline_mode<synchronous>, transform_indices = @transform_2, window_bounds = array<i64: 16, 128>}, {pipeline_mode = #tpu.pipeline_mode<synchronous>, transform_indices = @transform_3, window_bounds = array<i64: 64, 128>}, {pipeline_mode = #tpu.pipeline_mode<synchronous>, transform_indices = @transform_4, window_bounds = array<i64: 128, 1024>}, {pipeline_mode = #tpu.pipeline_mode<synchronous>, transform_indices = @transform_5, window_bounds = array<i64: 1, 1024>}, {pipeline_mode = #tpu.pipeline_mode<synchronous>, transform_indices = @transform_6, window_bounds = array<i64: 1024, 512>}, {pipeline_mode = #tpu.pipeline_mode<synchronous>, transform_indices = @transform_7, window_bounds = array<i64: 1, 512>}, {pipeline_mode = #tpu.pipeline_mode<synchronous>, transform_indices = @transform_8, window_bounds = array<i64: 512, 128>}, {pipeline_mode = #tpu.pipeline_mode<synchronous>, transform_indices = @transform_9, window_bounds = array<i64: 1, 128>}, {pipeline_mode = #tpu.pipeline_mode<synchronous>, transform_indices = @transform_10, window_bounds = array<i64: 2, 128>}]} {
    %c0 = arith.constant 0 : index
    %c0_0 = arith.constant 0 : index
    %0 = vector.load %arg2[%c0, %c0_0] : memref<128x16xf32, #tpu.memory_space<vmem>>, vector<128x16xf32>
    %c0_1 = arith.constant 0 : index
    %c0_2 = arith.constant 0 : index
    %1 = vector.load %arg3[%c0_1, %c0_2] : memref<16x128xf32, #tpu.memory_space<vmem>>, vector<16x128xf32>
    %c0_3 = arith.constant 0 : index
    %c0_4 = arith.constant 0 : index
    %2 = vector.load %arg4[%c0_3, %c0_4] : memref<64x128xf32, #tpu.memory_space<vmem>>, vector<64x128xf32>
    %c0_5 = arith.constant 0 : index
    %c0_6 = arith.constant 0 : index
    %c0_7 = arith.constant 0 : index
    %3 = vector.load %arg1[%c0_5, %c0_6, %c0_7] : memref<2x64x128xf32, #tpu.memory_space<vmem>>, vector<1x64x128xf32>
    %4 = vector.shape_cast %3 : vector<1x64x128xf32> to vector<64x128xf32>
    %cst = arith.constant dense<0.000000e+00> : vector<128xf32>
    %5 = vector.multi_reduction <add>, %4, %cst [0] : vector<64x128xf32> to vector<128xf32>
    %6 = vector.shape_cast %5 : vector<128xf32> to vector<1x128xf32>
    %cst_8 = arith.constant 6.400000e+01 : f32
    %7 = vector.broadcast %cst_8 : f32 to vector<1x128xf32>
    %8 = arith.divf %6, %7 : vector<1x128xf32>
    %cst_9 = arith.constant dense<0xFF800000> : vector<128xf32>
    %9 = vector.multi_reduction <maximumf>, %4, %cst_9 [0] : vector<64x128xf32> to vector<128xf32>
    %10 = vector.shape_cast %9 : vector<128xf32> to vector<1x128xf32>
    %11 = tpu.iota {dimensions = array<i32: 0>} : vector<2x128xi32>
    %c0_i32 = arith.constant 0 : i32
    %12 = vector.broadcast %c0_i32 : i32 to vector<2x128xi32>
    %13 = arith.cmpi eq, %11, %12 : vector<2x128xi32>
    %14 = vector.shape_cast %8 : vector<1x128xf32> to vector<1x128xf32>
    %15 = vector.broadcast %14 : vector<1x128xf32> to vector<2x128xf32>
    %16 = vector.shape_cast %10 : vector<1x128xf32> to vector<1x128xf32>
    %17 = vector.broadcast %16 : vector<1x128xf32> to vector<2x128xf32>
    %18 = arith.select %13, %15, %17 : vector<2x128xi1>, vector<2x128xf32>
    %cst_10 = arith.constant dense<0.000000e+00> : vector<2x16xf32>
    %19 = tpu.matmul %18, %0, %cst_10 {dimension_numbers = #tpu.dot_dimension_numbers<[1], [0], [0], [1], [0, 0, 1, 1], [], []>} : vector<2x128xf32>, vector<128x16xf32>, vector<2x16xf32> -> vector<2x16xf32>
    %cst_11 = arith.constant 0.000000e+00 : f32
    %20 = vector.broadcast %cst_11 : f32 to vector<2x16xf32>
    %21 = arith.maximumf %19, %20 : vector<2x16xf32>
    %cst_12 = arith.constant dense<0.000000e+00> : vector<2x128xf32>
    %22 = tpu.matmul %21, %1, %cst_12 {dimension_numbers = #tpu.dot_dimension_numbers<[1], [0], [0], [1], [0, 0, 1, 1], [], []>} : vector<2x16xf32>, vector<16x128xf32>, vector<2x128xf32> -> vector<2x128xf32>
    %23 = vector.extract_strided_slice %22 {offsets = [0, 0], sizes = [1, 128], strides = [1, 1]} : vector<2x128xf32> to vector<1x128xf32>
    %24 = vector.extract_strided_slice %22 {offsets = [1, 0], sizes = [1, 128], strides = [1, 1]} : vector<2x128xf32> to vector<1x128xf32>
    %25 = arith.addf %23, %24 : vector<1x128xf32>
    %cst_13 = arith.constant 5.000000e-01 : f32
    %26 = vector.broadcast %cst_13 : f32 to vector<1x128xf32>
    %27 = arith.mulf %26, %25 : vector<1x128xf32>
    %28 = math.tanh %27 : vector<1x128xf32>
    %cst_14 = arith.constant 1.000000e+00 : f32
    %29 = vector.broadcast %cst_14 : f32 to vector<1x128xf32>
    %30 = arith.addf %28, %29 : vector<1x128xf32>
    %cst_15 = arith.constant 5.000000e-01 : f32
    %31 = vector.broadcast %cst_15 : f32 to vector<1x128xf32>
    %32 = arith.mulf %31, %30 : vector<1x128xf32>
    %33 = vector.broadcast %32 : vector<1x128xf32> to vector<64x128xf32>
    %34 = arith.mulf %4, %33 : vector<64x128xf32>
    %cst_16 = arith.constant dense<0.000000e+00> : vector<64xf32>
    %35 = vector.multi_reduction <add>, %34, %cst_16 [1] : vector<64x128xf32> to vector<64xf32>
    %36 = vector.shape_cast %35 : vector<64xf32> to vector<64x1xf32>
    %cst_17 = arith.constant 1.280000e+02 : f32
    %37 = vector.broadcast %cst_17 : f32 to vector<64x1xf32>
    %38 = arith.divf %36, %37 : vector<64x1xf32>
    %cst_18 = arith.constant dense<0xFF800000> : vector<64xf32>
    %39 = vector.multi_reduction <maximumf>, %34, %cst_18 [1] : vector<64x128xf32> to vector<64xf32>
    %40 = vector.shape_cast %39 : vector<64xf32> to vector<64x1xf32>
    %41 = tpu.concatenate %38, %40 in 0 : vector<64x1xf32>, vector<64x1xf32> -> vector<128x1xf32>
    %cst_19 = arith.constant dense<0.000000e+00> : vector<64x1xf32>
    %42 = tpu.matmul %2, %41, %cst_19 {dimension_numbers = #tpu.dot_dimension_numbers<[1], [0], [0], [1], [0, 0, 1, 1], [], []>} : vector<64x128xf32>, vector<128x1xf32>, vector<64x1xf32> -> vector<64x1xf32>
    %cst_20 = arith.constant 5.000000e-01 : f32
    %43 = vector.broadcast %cst_20 : f32 to vector<64x1xf32>
    %44 = arith.mulf %43, %42 : vector<64x1xf32>
    %45 = math.tanh %44 : vector<64x1xf32>
    %cst_21 = arith.constant 1.000000e+00 : f32
    %46 = vector.broadcast %cst_21 : f32 to vector<64x1xf32>
    %47 = arith.addf %45, %46 : vector<64x1xf32>
    %cst_22 = arith.constant 5.000000e-01 : f32
    %48 = vector.broadcast %cst_22 : f32 to vector<64x1xf32>
    %49 = arith.mulf %48, %47 : vector<64x1xf32>
    %50 = vector.broadcast %49 : vector<64x1xf32> to vector<64x128xf32>
    %51 = arith.mulf %34, %50 : vector<64x128xf32>
    %cst_23 = arith.constant dense<0.000000e+00> : vector<128xf32>
    %52 = vector.multi_reduction <add>, %51, %cst_23 [0] : vector<64x128xf32> to vector<128xf32>
    %53 = vector.shape_cast %52 : vector<128xf32> to vector<1x128xf32>
    %cst_24 = arith.constant 1.562500e-02 : f32
    %54 = vector.broadcast %cst_24 : f32 to vector<1x128xf32>
    %55 = arith.mulf %53, %54 : vector<1x128xf32>
    %c1 = arith.constant 1 : index
    %c0_25 = arith.constant 0 : index
    %c0_26 = arith.constant 0 : index
    %56 = vector.load %arg1[%c1, %c0_25, %c0_26] : memref<2x64x128xf32, #tpu.memory_space<vmem>>, vector<1x64x128xf32>
    %57 = vector.shape_cast %56 : vector<1x64x128xf32> to vector<64x128xf32>
    %cst_27 = arith.constant dense<0.000000e+00> : vector<128xf32>
    %58 = vector.multi_reduction <add>, %57, %cst_27 [0] : vector<64x128xf32> to vector<128xf32>
    %59 = vector.shape_cast %58 : vector<128xf32> to vector<1x128xf32>
    %cst_28 = arith.constant 6.400000e+01 : f32
    %60 = vector.broadcast %cst_28 : f32 to vector<1x128xf32>
    %61 = arith.divf %59, %60 : vector<1x128xf32>
    %cst_29 = arith.constant dense<0xFF800000> : vector<128xf32>
    %62 = vector.multi_reduction <maximumf>, %57, %cst_29 [0] : vector<64x128xf32> to vector<128xf32>
    %63 = vector.shape_cast %62 : vector<128xf32> to vector<1x128xf32>
    %64 = tpu.iota {dimensions = array<i32: 0>} : vector<2x128xi32>
    %c0_i32_30 = arith.constant 0 : i32
    %65 = vector.broadcast %c0_i32_30 : i32 to vector<2x128xi32>
    %66 = arith.cmpi eq, %64, %65 : vector<2x128xi32>
    %67 = vector.shape_cast %61 : vector<1x128xf32> to vector<1x128xf32>
    %68 = vector.broadcast %67 : vector<1x128xf32> to vector<2x128xf32>
    %69 = vector.shape_cast %63 : vector<1x128xf32> to vector<1x128xf32>
    %70 = vector.broadcast %69 : vector<1x128xf32> to vector<2x128xf32>
    %71 = arith.select %66, %68, %70 : vector<2x128xi1>, vector<2x128xf32>
    %cst_31 = arith.constant dense<0.000000e+00> : vector<2x16xf32>
    %72 = tpu.matmul %71, %0, %cst_31 {dimension_numbers = #tpu.dot_dimension_numbers<[1], [0], [0], [1], [0, 0, 1, 1], [], []>} : vector<2x128xf32>, vector<128x16xf32>, vector<2x16xf32> -> vector<2x16xf32>
    %cst_32 = arith.constant 0.000000e+00 : f32
    %73 = vector.broadcast %cst_32 : f32 to vector<2x16xf32>
    %74 = arith.maximumf %72, %73 : vector<2x16xf32>
    %cst_33 = arith.constant dense<0.000000e+00> : vector<2x128xf32>
    %75 = tpu.matmul %74, %1, %cst_33 {dimension_numbers = #tpu.dot_dimension_numbers<[1], [0], [0], [1], [0, 0, 1, 1], [], []>} : vector<2x16xf32>, vector<16x128xf32>, vector<2x128xf32> -> vector<2x128xf32>
    %76 = vector.extract_strided_slice %75 {offsets = [0, 0], sizes = [1, 128], strides = [1, 1]} : vector<2x128xf32> to vector<1x128xf32>
    %77 = vector.extract_strided_slice %75 {offsets = [1, 0], sizes = [1, 128], strides = [1, 1]} : vector<2x128xf32> to vector<1x128xf32>
    %78 = arith.addf %76, %77 : vector<1x128xf32>
    %cst_34 = arith.constant 5.000000e-01 : f32
    %79 = vector.broadcast %cst_34 : f32 to vector<1x128xf32>
    %80 = arith.mulf %79, %78 : vector<1x128xf32>
    %81 = math.tanh %80 : vector<1x128xf32>
    %cst_35 = arith.constant 1.000000e+00 : f32
    %82 = vector.broadcast %cst_35 : f32 to vector<1x128xf32>
    %83 = arith.addf %81, %82 : vector<1x128xf32>
    %cst_36 = arith.constant 5.000000e-01 : f32
    %84 = vector.broadcast %cst_36 : f32 to vector<1x128xf32>
    %85 = arith.mulf %84, %83 : vector<1x128xf32>
    %86 = vector.broadcast %85 : vector<1x128xf32> to vector<64x128xf32>
    %87 = arith.mulf %57, %86 : vector<64x128xf32>
    %cst_37 = arith.constant dense<0.000000e+00> : vector<64xf32>
    %88 = vector.multi_reduction <add>, %87, %cst_37 [1] : vector<64x128xf32> to vector<64xf32>
    %89 = vector.shape_cast %88 : vector<64xf32> to vector<64x1xf32>
    %cst_38 = arith.constant 1.280000e+02 : f32
    %90 = vector.broadcast %cst_38 : f32 to vector<64x1xf32>
    %91 = arith.divf %89, %90 : vector<64x1xf32>
    %cst_39 = arith.constant dense<0xFF800000> : vector<64xf32>
    %92 = vector.multi_reduction <maximumf>, %87, %cst_39 [1] : vector<64x128xf32> to vector<64xf32>
    %93 = vector.shape_cast %92 : vector<64xf32> to vector<64x1xf32>
    %94 = tpu.concatenate %91, %93 in 0 : vector<64x1xf32>, vector<64x1xf32> -> vector<128x1xf32>
    %cst_40 = arith.constant dense<0.000000e+00> : vector<64x1xf32>
    %95 = tpu.matmul %2, %94, %cst_40 {dimension_numbers = #tpu.dot_dimension_numbers<[1], [0], [0], [1], [0, 0, 1, 1], [], []>} : vector<64x128xf32>, vector<128x1xf32>, vector<64x1xf32> -> vector<64x1xf32>
    %cst_41 = arith.constant 5.000000e-01 : f32
    %96 = vector.broadcast %cst_41 : f32 to vector<64x1xf32>
    %97 = arith.mulf %96, %95 : vector<64x1xf32>
    %98 = math.tanh %97 : vector<64x1xf32>
    %cst_42 = arith.constant 1.000000e+00 : f32
    %99 = vector.broadcast %cst_42 : f32 to vector<64x1xf32>
    %100 = arith.addf %98, %99 : vector<64x1xf32>
    %cst_43 = arith.constant 5.000000e-01 : f32
    %101 = vector.broadcast %cst_43 : f32 to vector<64x1xf32>
    %102 = arith.mulf %101, %100 : vector<64x1xf32>
    %103 = vector.broadcast %102 : vector<64x1xf32> to vector<64x128xf32>
    %104 = arith.mulf %87, %103 : vector<64x128xf32>
    %cst_44 = arith.constant dense<0.000000e+00> : vector<128xf32>
    %105 = vector.multi_reduction <add>, %104, %cst_44 [0] : vector<64x128xf32> to vector<128xf32>
    %106 = vector.shape_cast %105 : vector<128xf32> to vector<1x128xf32>
    %cst_45 = arith.constant 1.562500e-02 : f32
    %107 = vector.broadcast %cst_45 : f32 to vector<1x128xf32>
    %108 = arith.mulf %106, %107 : vector<1x128xf32>
    %109 = tpu.iota {dimensions = array<i32: 0>} : vector<2x128xi32>
    %c0_i32_46 = arith.constant 0 : i32
    %110 = vector.broadcast %c0_i32_46 : i32 to vector<2x128xi32>
    %111 = arith.cmpi eq, %109, %110 : vector<2x128xi32>
    %cst_47 = arith.constant 0.000000e+00 : f32
    %112 = vector.shape_cast %55 : vector<1x128xf32> to vector<1x128xf32>
    %113 = vector.broadcast %112 : vector<1x128xf32> to vector<2x128xf32>
    %114 = vector.broadcast %cst_47 : f32 to vector<2x128xf32>
    %115 = arith.select %111, %113, %114 : vector<2x128xi1>, vector<2x128xf32>
    %c1_i32 = arith.constant 1 : i32
    %116 = vector.broadcast %c1_i32 : i32 to vector<2x128xi32>
    %117 = arith.cmpi eq, %109, %116 : vector<2x128xi32>
    %118 = vector.shape_cast %108 : vector<1x128xf32> to vector<1x128xf32>
    %119 = vector.broadcast %118 : vector<1x128xf32> to vector<2x128xf32>
    %120 = arith.select %117, %119, %115 : vector<2x128xi1>, vector<2x128xf32>
    %c0_48 = arith.constant 0 : index
    %c0_49 = arith.constant 0 : index
    %121 = vector.load %arg5[%c0_48, %c0_49] : memref<128x1024xbf16, #tpu.memory_space<vmem>>, vector<128x1024xbf16>
    %122 = arith.truncf %120 : vector<2x128xf32> to vector<2x128xbf16>
    %cst_50 = arith.constant dense<0.000000e+00> : vector<2x1024xf32>
    %123 = tpu.matmul %122, %121, %cst_50 {dimension_numbers = #tpu.dot_dimension_numbers<[1], [0], [0], [1], [0, 0, 1, 1], [], []>} : vector<2x128xbf16>, vector<128x1024xbf16>, vector<2x1024xf32> -> vector<2x1024xf32>
    %c0_51 = arith.constant 0 : index
    %c0_52 = arith.constant 0 : index
    %124 = vector.load %arg6[%c0_51, %c0_52] : memref<1x1024xf32, #tpu.memory_space<vmem>>, vector<1x1024xf32>
    %125 = vector.broadcast %124 : vector<1x1024xf32> to vector<2x1024xf32>
    %126 = arith.addf %123, %125 : vector<2x1024xf32>
    %cst_53 = arith.constant 5.000000e-01 : f32
    %127 = vector.broadcast %cst_53 : f32 to vector<2x1024xf32>
    %128 = arith.mulf %127, %126 : vector<2x1024xf32>
    %cst_54 = arith.constant 4.471500e-02 : f32
    %129 = vector.broadcast %cst_54 : f32 to vector<2x1024xf32>
    %130 = arith.mulf %129, %126 : vector<2x1024xf32>
    %131 = arith.mulf %130, %126 : vector<2x1024xf32>
    %132 = arith.mulf %131, %126 : vector<2x1024xf32>
    %133 = arith.addf %126, %132 : vector<2x1024xf32>
    %cst_55 = arith.constant 0.797884583 : f32
    %134 = vector.broadcast %cst_55 : f32 to vector<2x1024xf32>
    %135 = arith.mulf %134, %133 : vector<2x1024xf32>
    %136 = math.tanh %135 : vector<2x1024xf32>
    %cst_56 = arith.constant 1.000000e+00 : f32
    %137 = vector.broadcast %cst_56 : f32 to vector<2x1024xf32>
    %138 = arith.addf %137, %136 : vector<2x1024xf32>
    %139 = arith.mulf %128, %138 : vector<2x1024xf32>
    %c0_57 = arith.constant 0 : index
    %c0_58 = arith.constant 0 : index
    %140 = vector.load %arg7[%c0_57, %c0_58] : memref<1024x512xbf16, #tpu.memory_space<vmem>>, vector<1024x512xbf16>
    %141 = arith.truncf %139 : vector<2x1024xf32> to vector<2x1024xbf16>
    %cst_59 = arith.constant dense<0.000000e+00> : vector<2x512xf32>
    %142 = tpu.matmul %141, %140, %cst_59 {dimension_numbers = #tpu.dot_dimension_numbers<[1], [0], [0], [1], [0, 0, 1, 1], [], []>} : vector<2x1024xbf16>, vector<1024x512xbf16>, vector<2x512xf32> -> vector<2x512xf32>
    %c0_60 = arith.constant 0 : index
    %c0_61 = arith.constant 0 : index
    %143 = vector.load %arg8[%c0_60, %c0_61] : memref<1x512xf32, #tpu.memory_space<vmem>>, vector<1x512xf32>
    %144 = vector.broadcast %143 : vector<1x512xf32> to vector<2x512xf32>
    %145 = arith.addf %142, %144 : vector<2x512xf32>
    %cst_62 = arith.constant 5.000000e-01 : f32
    %146 = vector.broadcast %cst_62 : f32 to vector<2x512xf32>
    %147 = arith.mulf %146, %145 : vector<2x512xf32>
    %cst_63 = arith.constant 4.471500e-02 : f32
    %148 = vector.broadcast %cst_63 : f32 to vector<2x512xf32>
    %149 = arith.mulf %148, %145 : vector<2x512xf32>
    %150 = arith.mulf %149, %145 : vector<2x512xf32>
    %151 = arith.mulf %150, %145 : vector<2x512xf32>
    %152 = arith.addf %145, %151 : vector<2x512xf32>
    %cst_64 = arith.constant 0.797884583 : f32
    %153 = vector.broadcast %cst_64 : f32 to vector<2x512xf32>
    %154 = arith.mulf %153, %152 : vector<2x512xf32>
    %155 = math.tanh %154 : vector<2x512xf32>
    %cst_65 = arith.constant 1.000000e+00 : f32
    %156 = vector.broadcast %cst_65 : f32 to vector<2x512xf32>
    %157 = arith.addf %156, %155 : vector<2x512xf32>
    %158 = arith.mulf %147, %157 : vector<2x512xf32>
    %c0_66 = arith.constant 0 : index
    %c0_67 = arith.constant 0 : index
    %159 = vector.load %arg9[%c0_66, %c0_67] : memref<512x128xf32, #tpu.memory_space<vmem>>, vector<512x128xf32>
    %cst_68 = arith.constant dense<0.000000e+00> : vector<2x128xf32>
    %160 = tpu.matmul %158, %159, %cst_68 {dimension_numbers = #tpu.dot_dimension_numbers<[1], [0], [0], [1], [0, 0, 1, 1], [], []>} : vector<2x512xf32>, vector<512x128xf32>, vector<2x128xf32> -> vector<2x128xf32>
    %c0_69 = arith.constant 0 : index
    %c0_70 = arith.constant 0 : index
    %161 = vector.load %arg10[%c0_69, %c0_70] : memref<1x128xf32, #tpu.memory_space<vmem>>, vector<1x128xf32>
    %162 = vector.broadcast %161 : vector<1x128xf32> to vector<2x128xf32>
    %163 = arith.addf %160, %162 : vector<2x128xf32>
    %c0_71 = arith.constant 0 : index
    %c0_72 = arith.constant 0 : index
    %164 = vector.load %arg11[%c0_71, %c0_72] : memref<2x128xf32, #tpu.memory_space<vmem>>, vector<2x128xf32>
    tpu.vector_store %arg11[%c0_71, %c0_72], %163 {strides = array<i32>} : memref<2x128xf32, #tpu.memory_space<vmem>>, vector<2x128xf32>,
    return
  }
  func.func @transform_0(%arg0: i32) -> (i32, i32, i32) {
    %c0_i32 = arith.constant 0 : i32
    %c0_i32_0 = arith.constant 0 : i32
    %c0_i32_1 = arith.constant 0 : i32
    %c0_i32_2 = arith.constant 0 : i32
    return %c0_i32, %c0_i32_0, %c0_i32_1 : i32, i32, i32
  }
  func.func @transform_1(%arg0: i32) -> (i32, i32) {
    %c0_i32 = arith.constant 0 : i32
    %c0_i32_0 = arith.constant 0 : i32
    %c0_i32_1 = arith.constant 0 : i32
    return %c0_i32, %c0_i32_0 : i32, i32
  }
  func.func @transform_2(%arg0: i32) -> (i32, i32) {
    %c0_i32 = arith.constant 0 : i32
    %c0_i32_0 = arith.constant 0 : i32
    %c0_i32_1 = arith.constant 0 : i32
    return %c0_i32, %c0_i32_0 : i32, i32
  }
  func.func @transform_3(%arg0: i32) -> (i32, i32) {
    %c0_i32 = arith.constant 0 : i32
    %c0_i32_0 = arith.constant 0 : i32
    %c0_i32_1 = arith.constant 0 : i32
    return %c0_i32, %c0_i32_0 : i32, i32
  }
  func.func @transform_4(%arg0: i32) -> (i32, i32) {
    %c0_i32 = arith.constant 0 : i32
    %c0_i32_0 = arith.constant 0 : i32
    %c0_i32_1 = arith.constant 0 : i32
    return %c0_i32, %c0_i32_0 : i32, i32
  }
  func.func @transform_5(%arg0: i32) -> (i32, i32) {
    %c0_i32 = arith.constant 0 : i32
    %c0_i32_0 = arith.constant 0 : i32
    %c0_i32_1 = arith.constant 0 : i32
    return %c0_i32, %c0_i32_0 : i32, i32
  }
  func.func @transform_6(%arg0: i32) -> (i32, i32) {
    %c0_i32 = arith.constant 0 : i32
    %c0_i32_0 = arith.constant 0 : i32
    %c0_i32_1 = arith.constant 0 : i32
    return %c0_i32, %c0_i32_0 : i32, i32
  }
  func.func @transform_7(%arg0: i32) -> (i32, i32) {
    %c0_i32 = arith.constant 0 : i32
    %c0_i32_0 = arith.constant 0 : i32
    %c0_i32_1 = arith.constant 0 : i32
    return %c0_i32, %c0_i32_0 : i32, i32
  }
  func.func @transform_8(%arg0: i32) -> (i32, i32) {
    %c0_i32 = arith.constant 0 : i32
    %c0_i32_0 = arith.constant 0 : i32
    %c0_i32_1 = arith.constant 0 : i32
    return %c0_i32, %c0_i32_0 : i32, i32
  }
  func.func @transform_9(%arg0: i32) -> (i32, i32) {
    %c0_i32 = arith.constant 0 : i32
    %c0_i32_0 = arith.constant 0 : i32
    %c0_i32_1 = arith.constant 0 : i32
    return %c0_i32, %c0_i32_0 : i32, i32
  }
  func.func @transform_10(%arg0: i32) -> (i32, i32) {
    %c0_i32 = arith.constant 0 : i32
    %c0_i32_0 = arith.constant 0 : i32
    %c0_i32_1 = arith.constant 0 : i32
    return %c0_i32, %c0_i32_0 : i32, i32
  }
}

</mosaic_0001>

<bundles_post_ra>
// kernel: tpu_custom_call.1
= control target key start
LH: loop header
LB: loop body
LE: loop exit
PB: predicated region body
PF: predicated region fallthrough
CT: control target
= control target key end

     0   :  { %15 = vsyncpa [#allocation3], 0  ;;  %s5710_s0 = inlined_call_operand.vmem [shape: f32[2,64,128], index: 0, kind: input, shape index: {}]   ;;  %s5711_s1 = inlined_call_operand.vmem [shape: f32[128,16], index: 1, kind: input, shape index: {}]   ;;  %s5712_s2 = inlined_call_operand.vmem [shape: f32[16,128], index: 2, kind: input, shape index: {}]   ;;  %s5713_s3 = inlined_call_operand.hbm [shape: f32[64,128], index: 3, kind: input, shape index: {}]   ;;  %s5714_s4 = inlined_call_operand.hbm [shape: bf16[128,1024], index: 4, kind: input, shape index: {}]   ;;  %s5715_s5 = inlined_call_operand.vmem [shape: f32[1,1024], index: 5, kind: input, shape index: {}]   ;;  %s5716_s6 = inlined_call_operand.hbm [shape: bf16[1024,512], index: 6, kind: input, shape index: {}]   ;;  %s5717_s7 = inlined_call_operand.vmem [shape: f32[1,512], index: 7, kind: input, shape index: {}]   ;;  %s5718_s8 = inlined_call_operand.hbm [shape: f32[512,128], index: 8, kind: input, shape index: {}]   ;;  %s5719_s9 = inlined_call_operand.vmem [shape: f32[1,128], index: 9, kind: input, shape index: {}]   ;;  %s5720_s10 = inlined_call_operand.hbm [shape: f32[2,128], index: 10, kind: output, shape index: {}]  }
   0x1   :  { %16 = vsyncpa [#allocation6], 0 }
   0x2   :  { %17 = vsyncpa [#allocation9], 0 }
   0x3   :  { %18 = vsyncpa [#allocation4], 0  ;;  %s5057_s13 = smov [#allocation5]  }
   0x4   :  { %s42_s14 = sshll.u32 %s5057_s13, 4  ;;  %s43_s14 = int_to_ptr.vmem [resolvable:$true] %s42_s14 }
   0x5   :  { %s4957_s15 = scalar_lea.vmem %s43_s14, 8192  ;;  %p4962_p1 = scmp.lt.s32.totalorder %s43_s14, %s43_s14 }
   0x6   :  { %p4958_p0 = scmp.ne.s32.totalorder %s43_s14, %s4957_s15  ;;  %p4963_p2 = scmp.lt.s32.totalorder %s4957_s15, %s4957_s15 }
   0x8   :  { %p4964_p3 = por %p4963_p2, %p4962_p1 }
   0xa   :  { %p4965_p4 = pnand %p4964_p3, %p4958_p0 }
   0xc   :  { %4968 = shalt.err (!%p4965_p4)
}
   0xd   :  { %s5058_s16 = smov 512   ;;  %s5059_s17 = smov 32  }
   0xe   :  { %48 = dma.hbm_to_vmem [thread:$0]  %s5714_s4, 8192, %s43_s14, [#allocation6], %s5058_s16, %s5058_s16, %s5059_s17  }
   0xf   :  { %s5060_s20 = smov [#allocation2]  }
  0x10   :  { %s30_s21 = sshll.u32 %s5060_s20, 4  ;;  %s31_s21 = int_to_ptr.vmem [resolvable:$true] %s30_s21 }
  0x11   :  { %s4977_s22 = scalar_lea.vmem %s31_s21, 1024  ;;  %p4982_p6 = scmp.lt.s32.totalorder %s31_s21, %s31_s21 }
  0x12   :  { %p4978_p5 = scmp.ne.s32.totalorder %s31_s21, %s4977_s22  ;;  %p4983_p7 = scmp.lt.s32.totalorder %s4977_s22, %s4977_s22 }
  0x14   :  { %p4984_p8 = por %p4983_p7, %p4982_p6 }
  0x16   :  { %p4985_p9 = pnand %p4984_p8, %p4978_p5 }
  0x18   :  { %4988 = shalt.err (!%p4985_p9)
}
  0x19   :  { %s5061_s23 = smov 128   ;;  %s5062_s24 = smov 8  }
  0x1a   :  { %36 = dma.hbm_to_vmem [thread:$0]  %s5713_s3, 1024, %s31_s21, [#allocation3], %s5061_s23, %s5061_s23, %s5062_s24  }
  0x1b   :  { %s5063_s27 = smov [#allocation7]  }
  0x1c   :  { %s56_s28 = sshll.u32 %s5063_s27, 4  ;;  %s57_s28 = int_to_ptr.vmem [resolvable:$true] %s56_s28 }
  0x1d   :  { %s4997_s4 = scalar_lea.vmem %s57_s28, 32768  ;;  %p5002_p11 = scmp.lt.s32.totalorder %s57_s28, %s57_s28 }
  0x1e   :  { %p4998_p10 = scmp.ne.s32.totalorder %s57_s28, %s4997_s4  ;;  %p5003_p12 = scmp.lt.s32.totalorder %s4997_s4, %s4997_s4 }
  0x20   :  { %p5004_p13 = por %p5003_p12, %p5002_p11 }
  0x22   :  { %p5005_p0 = pnand %p5004_p13, %p4998_p10 }
  0x24   :  { %5008 = shalt.err (!%p5005_p0)
}
  0x25   :  { %s5064_s29 = smov 256   ;;  %s5065_s30 = smov 16  }
  0x26   :  { %62 = dma.hbm_to_vmem [thread:$0]  %s5716_s6, 32768, %s57_s28, [#allocation6], %s5064_s29, %s5064_s29, %s5065_s30  }
  0x27   :  { %s5066_s13 = smov [#allocation8]  }
  0x28   :  { %s70_s14 = sshll.u32 %s5066_s13, 4  ;;  %s71_s14 = int_to_ptr.vmem [resolvable:$true] %s70_s14 }
  0x29   :  { %s5017_s3 = scalar_lea.vmem %s71_s14, 8192  ;;  %p5022_p2 = scmp.lt.s32.totalorder %s71_s14, %s71_s14 }
  0x2a   :  { %p5018_p1 = scmp.ne.s32.totalorder %s71_s14, %s5017_s3  ;;  %p5023_p3 = scmp.lt.s32.totalorder %s5017_s3, %s5017_s3 }
  0x2c   :  { %p5024_p4 = por %p5023_p3, %p5022_p2 }
  0x2e   :  { %p5025_p5 = pnand %p5024_p4, %p5018_p1 }
  0x30   :  { %5028 = shalt.err (!%p5025_p5)
}
  0x31   :  { %76 = dma.hbm_to_vmem [thread:$0]  %s5718_s8, 8192, %s71_s14, [#allocation9], %s5061_s23, %s5061_s23, %s5062_s24  }
  0x32   :  { %5049 = dma.done.wait [#allocation3], 1024  }
  0x33   :  { %5050 = vsyncadd [#allocation3], 4294966272 }
  0x34   :  { %5051 = dma.done.wait [#allocation6], 40960  }
  0x35   :  { %5052 = vsyncadd [#allocation6], 4294926336 }
  0x36   :  { %5053 = dma.done.wait [#allocation9], 8192  }
  0x37   :  { %5054 = vsyncadd [#allocation9], 4294959104  ;;  %v5067_v0 = vmov 0.0   ;;  %vm5068_vm0 = vmmov 0   ;;  %v5147_v1 = vld [vmem:[%s5711_s1 + $0x78] sm:$0xff]  ;;  %v5152_v2 = vld [vmem:[%s5711_s1 + $0x70] sm:$0xff]  ;;  %v154_v53 = vlaneseq }
  0x38   :  { %4317 = vmatprep.subr.mxu0 %v5067_v0  ;;  %4349 = vmatprep.mubr.msk.f32.mxu0 %vm5068_vm0, %v5067_v0  ;;  %v5159_v3 = vld [vmem:[%s5711_s1 + $0x68] sm:$0xff]  ;;  %v5166_v4 = vld [vmem:[%s5711_s1 + $0x60] sm:$0xff]  ;;  %v5172_v5 = vld [vmem:[%s5711_s1 + $0x58] sm:$0xff]  ;;  %vm229_vm2 = vcmask 130048   ;;  %s5070_s3 = smov [#allocation10]  }
  0x39   :  { %4352 = vmatprep.subr.mxu1 %v5067_v0  ;;  %4356 = vmatprep.mubr.msk.f32.mxu1 %vm5068_vm0, %v5067_v0  ;;  %v5177_v6 = vld [vmem:[%s5710_s0] sm:$0xff]  ;;  %v5182_v7 = vld [vmem:[%s5710_s0 + $0x8] sm:$0xff]  ;;  %v5188_v8 = vld [vmem:[%s5710_s0 + $0x10] sm:$0xff]  ;;  %v5353_v62 = vshrl.u32 %v154_v53, 7  ;;  %s3817_s15 = sshll.u32 %s5070_s3, 4  ;;  %s3818_s15 = int_to_ptr.vmem [resolvable:$true] %s3817_s15 }
  0x3a   :  { %4318 = vmatpush3.msra.mxu0 %v5147_v1  ;;  %v5193_v9 = vld [vmem:[%s5710_s0 + $0x18] sm:$0xff]  ;;  %v5198_v10 = vld [vmem:[%s5710_s0 + $0x20] sm:$0xff]  ;;  %v126_v11 = vadd.f32 %v5182_v7, %v5177_v6  ;;  %v5206_v12 = vld [vmem:[%s5710_s0 + $0x28] sm:$0xff]  ;;  %s5029_s16 = scalar_lea.vmem %s3818_s15, 32  ;;  %p5034_p7 = scmp.lt.s32.totalorder %s3818_s15, %s3818_s15 }
  0x3b   :  { %4319 = vmatprep.subr.mxu0 %v5067_v0  ;;  %v5211_v13 = vld [vmem:[%s5710_s0 + $0x30] sm:$0xff]  ;;  %v5216_v14 = vld [vmem:[%s5710_s0 + $0x38] sm:$0xff]  ;;  %v141_v15 = vmax.f32 %v5177_v6, %v5198_v10  ;;  %v142_v18 = vmax.f32 %v5182_v7, %v5206_v12  ;;  %v5236_v21 = vld [vmem:[%s5710_s0 + $0x40] sm:$0xff]  ;;  %vm156_vm1 = vcmp.eq.s32.totalorder %v5353_v62, 0  ;;  %vm1004_vm3 = vcmp.eq.s32.totalorder %v5353_v62, 1  ;;  %p5030_p6 = scmp.ne.s32.totalorder %s3818_s15, %s5029_s16  ;;  %p5035_p8 = scmp.lt.s32.totalorder %s5029_s16, %s5029_s16 }
  0x3c   :  { %4320 = vmatpush3.msra.mxu0 %v5152_v2  ;;  %v5224_v16 = vld [vmem:[%s5711_s1 + $0x50] sm:$0xff]  ;;  %v127_v17 = vadd.f32 %v126_v11, %v5188_v8  ;;  %v143_v19 = vmax.f32 %v5188_v8, %v5211_v13  ;;  %v144_v20 = vmax.f32 %v5193_v9, %v5216_v14  ;;  %v5241_v22 = vld [vmem:[%s5710_s0 + $0x48] sm:$0xff]  ;;  %v5260_v26 = vld [vmem:[%s5711_s1 + $0x40] sm:$0xff] }
  0x3d   :  { %4321 = vmatprep.subr.mxu0 %v5067_v0  ;;  %v5247_v23 = vld [vmem:[%s5710_s0 + $0x50] sm:$0xff]  ;;  %v572_v24 = vadd.f32 %v5241_v22, %v5236_v21  ;;  %v5255_v25 = vld [vmem:[%s5711_s1 + $0x48] sm:$0xff]  ;;  %v145_v28 = vmax.f32 %v141_v15, %v142_v18  ;;  %v5267_v30 = vld [vmem:[%s5710_s0 + $0x58] sm:$0xff]  ;;  %p5036_p9 = por %p5035_p8, %p5034_p7 }
  0x3e   :  { %4322 = vmatpush3.msra.mxu0 %v5159_v3  ;;  %v128_v27 = vadd.f32 %v127_v17, %v5193_v9  ;;  %v146_v29 = vmax.f32 %v143_v19, %v144_v20  ;;  %v5273_v31 = vld [vmem:[%s5711_s1 + $0x38] sm:$0xff]  ;;  %v5282_v35 = vld [vmem:[%s5711_s1 + $0x30] sm:$0xff]  ;;  %v5289_v38 = vld [vmem:[%s5710_s0 + $0x60] sm:$0xff] }
  0x3f   :  { %4323 = vmatprep.subr.mxu0 %v5067_v0  ;;  %v573_v34 = vadd.f32 %v5247_v23, %v572_v24  ;;  %v5295_v39 = vld [vmem:[%s5711_s1 + $0x28] sm:$0xff]  ;;  %v5304_v43 = vld [vmem:[%s5711_s1 + $0x20] sm:$0xff]  ;;  %v5317_v47 = vld [vmem:[%s5711_s1 + $0x18] sm:$0xff]  ;;  %v586_v63 = vmax.f32 %v5236_v21, %v5289_v38  ;;  %p5037_p10 = pnand %p5036_p9, %p5030_p6 }
  0x40   :  { %4324 = vmatpush3.msra.mxu0 %v5166_v4  ;;  %v129_v32 = vadd.f32 %v128_v27, %v5198_v10  ;;  %v147_v33 = vmax.f32 %v145_v28, %v146_v29  ;;  %v5311_v46 = vld [vmem:[%s5710_s0 + $0x68] sm:$0xff]  ;;  %v5325_v50 = vld [vmem:[%s5711_s1 + $0x10] sm:$0xff]  ;;  %v5336_v55 = vld [vmem:[%s5710_s0 + $0x78] sm:$0xff] }
  0x41   :  { %4325 = vmatprep.subr.mxu0 %v5067_v0  ;;  %v574_v42 = vadd.f32 %v5267_v30, %v573_v34  ;;  %v5331_v54 = vld [vmem:[%s5710_s0 + $0x70] sm:$0xff]  ;;  %v5342_v56 = vld [vmem:[%s5711_s1 + $0x8] sm:$0xff]  ;;  %v5350_v59 = vld [vmem:[%s5711_s1] sm:$0xff]  ;;  %v587_v11 = vmax.f32 %v5241_v22, %v5311_v46  ;;  %v589_v19 = vmax.f32 %v5267_v30, %v5336_v55 }
  0x42   :  { %4326 = vmatpush3.msra.mxu0 %v5172_v5  ;;  %v130_v36 = vadd.f32 %v129_v32, %v5206_v12  ;;  %v148_v37 = vrot.slane %v147_v33, 4  ;;  %v588_v18 = vmax.f32 %v5247_v23, %v5331_v54 }
  0x43   :  { %4327 = vmatprep.subr.mxu0 %v5067_v0  ;;  %v575_v49 = vadd.f32 %v5289_v38, %v574_v42  ;;  %v590_v29 = vmax.f32 %v586_v63, %v587_v11  ;;  %v108_v42 = vld [vmem:[%s5712_s2] sm:$0xff] }
  0x44   :  { %4328 = vmatpush3.msra.mxu0 %v5224_v16  ;;  %v131_v40 = vadd.f32 %v130_v36, %v5211_v13  ;;  %v149_v41 = vmax.f32 %v147_v33, %v148_v37  ;;  %v591_v32 = vmax.f32 %v588_v18, %v589_v19 }
  0x45   :  { %4329 = vmatprep.subr.mxu0 %v5067_v0  ;;  %v576_v58 = vadd.f32 %v5311_v46, %v575_v49 }
  0x46   :  { %4330 = vmatpush3.msra.mxu0 %v5255_v25  ;;  %v132_v44 = vadd.f32 %v131_v40, %v5216_v14  ;;  %v150_v45 = vrot.slane %v149_v41, 2  ;;  %v592_v36 = vmax.f32 %v590_v29, %v591_v32 }
  0x47   :  { %4331 = vmatprep.subr.mxu0 %v5067_v0  ;;  %v577_v17 = vadd.f32 %v5331_v54, %v576_v58 }
  0x48   :  { %4332 = vmatpush3.msra.mxu0 %v5260_v26  ;;  %v133_v48 = vrot.slane %v132_v44, 4  ;;  %v151_v52 = vmax.f32 %v149_v41, %v150_v45  ;;  %v593_v40 = vrot.slane %v592_v36, 4 }
  0x49   :  { %4333 = vmatprep.subr.mxu0 %v5067_v0  ;;  %v578_v28 = vadd.f32 %v5336_v55, %v577_v17 }
  0x4a   :  { %4334 = vmatpush3.msra.mxu0 %v5273_v31  ;;  %v134_v51 = vadd.f32 %v133_v48, %v132_v44  ;;  %v152_v61 = vrot.slane %v151_v52, 1  ;;  %v594_v41 = vmax.f32 %v592_v36, %v593_v40 }
  0x4b   :  { %4335 = vmatprep.subr.mxu0 %v5067_v0  ;;  %v579_v34 = vrot.slane %v578_v28, 4 }
  0x4c   :  { %4336 = vmatpush3.msra.mxu0 %v5282_v35  ;;  %v135_v57 = vrot.slane %v134_v51, 2  ;;  %v153_v24 = vmax.f32 %v151_v52, %v152_v61 }
  0x4d   :  { %4337 = vmatprep.subr.mxu0 %v5067_v0  ;;  %v580_v37 = vadd.f32 %v579_v34, %v578_v28 }
  0x4e   :  { %4338 = vmatpush3.msra.mxu0 %v5295_v39  ;;  %v136_v60 = vadd.f32 %v135_v57, %v134_v51 }
  0x4f   :  { %4339 = vmatprep.subr.mxu0 %v5067_v0 }
  0x50   :  { %4340 = vmatpush3.msra.mxu0 %v5304_v43  ;;  %v137_v15 = vrot.slane %v136_v60, 1 }
  0x51   :  { %4341 = vmatprep.subr.mxu0 %v5067_v0 }
  0x52   :  { %4342 = vmatpush3.msra.mxu0 %v5317_v47  ;;  %v138_v20 = vadd.f32 %v137_v15, %v136_v60 }
  0x53   :  { %4343 = vmatprep.subr.mxu0 %v5067_v0 }
  0x54   :  { %4344 = vmatpush3.msra.mxu0 %v5325_v50  ;;  %v140_v27 = vmul.f32 0.015625, %v138_v20 }
  0x55   :  { %4345 = vmatprep.subr.mxu0 %v5067_v0 }
  0x56   :  { %4346 = vmatpush3.msra.mxu0 %v5342_v56  ;;  %v157_v33 = vsel %vm156_vm1, %v140_v27, %v153_v24 }
  0x57   :  { %4347 = vmatprep.subr.mxu0 %v5067_v0 }
  0x58   :  { %4348 = vmatpush3.msra.mxu0 %v5350_v59 }
  0x59   :  { %4403 = vmatprep.subr.mxu0 %v5067_v0  ;;  %4350 = vmatmul.mubr.f32.vlgmr.msra.gmra.mxu0 %v157_v33  ;;  %v5491_v33 = vld [vmem:[#allocation2] sm:$0xff] }
  0x5a   :  { %4404 = vmatpush3.msra.mxu0 %v5147_v1  ;;  %4435 = vmatprep.mubr.msk.f32.mxu0 %vm5068_vm0, %v5067_v0  ;;  %v581_v1 = vrot.slane %v580_v37, 2 }
  0x5b   :  { %4405 = vmatprep.subr.mxu0 %v5067_v0 }
  0x5c   :  { %4406 = vmatpush3.msra.mxu0 %v5152_v2  ;;  %v582_v2 = vadd.f32 %v581_v1, %v580_v37 }
  0x5d   :  { %4407 = vmatprep.subr.mxu0 %v5067_v0 }
  0x5e   :  { %4408 = vmatpush3.msra.mxu0 %v5159_v3  ;;  %v595_v3 = vrot.slane %v594_v41, 2 }
  0x5f   :  { %4409 = vmatprep.subr.mxu0 %v5067_v0 }
  0x60   :  { %4410 = vmatpush3.msra.mxu0 %v5166_v4  ;;  %v583_v4 = vrot.slane %v582_v2, 1 }
  0x61   :  { %4411 = vmatprep.subr.mxu0 %v5067_v0 }
  0x62   :  { %4412 = vmatpush3.msra.mxu0 %v5172_v5  ;;  %v596_v5 = vmax.f32 %v594_v41, %v595_v3 }
  0x63   :  { %4413 = vmatprep.subr.mxu0 %v5067_v0 }
  0x64   :  { %4414 = vmatpush3.msra.mxu0 %v5224_v16  ;;  %v584_v16 = vadd.f32 %v583_v4, %v582_v2 }
  0x65   :  { %4415 = vmatprep.subr.mxu0 %v5067_v0 }
  0x66   :  { %4416 = vmatpush3.msra.mxu0 %v5255_v25  ;;  %v597_v25 = vrot.slane %v596_v5, 1 }
  0x67   :  { %4417 = vmatprep.subr.mxu0 %v5067_v0 }
  0x68   :  { %4418 = vmatpush3.msra.mxu0 %v5260_v26  ;;  %v585_v26 = vmul.f32 0.015625, %v584_v16 }
  0x69   :  { %4419 = vmatprep.subr.mxu0 %v5067_v0 }
  0x6a   :  { %4420 = vmatpush3.msra.mxu0 %v5273_v31  ;;  %v598_v31 = vmax.f32 %v596_v5, %v597_v25 }
  0x6b   :  { %4421 = vmatprep.subr.mxu0 %v5067_v0 }
  0x6c   :  { %4422 = vmatpush3.msra.mxu0 %v5282_v35  ;;  %v599_v35 = vsel %vm156_vm1, %v585_v26, %v598_v31 }
  0x6d   :  { %4423 = vmatprep.subr.mxu0 %v5067_v0 }
  0x6e   :  { %4424 = vmatpush3.msra.mxu0 %v5295_v39  ;;  %v109_v39 = vld [vmem:[%s5712_s2 + $0x8] sm:$0xff] }
  0x6f   :  { %4425 = vmatprep.subr.mxu0 %v5067_v0  ;;  %4353 = vmatpush3.msra.mxu1 %v109_v39 }
  0x70   :  { %4426 = vmatpush3.msra.mxu0 %v5304_v43  ;;  %4354 = vmatprep.subr.mxu1 %v5067_v0 }
  0x71   :  { %4427 = vmatprep.subr.mxu0 %v5067_v0  ;;  %4355 = vmatpush3.msra.mxu1 %v108_v42 }
  0x72   :  { %4428 = vmatpush3.msra.mxu0 %v5317_v47 }
  0x73   :  { %4429 = vmatprep.subr.mxu0 %v5067_v0 }
  0x74   :  { %4430 = vmatpush3.msra.mxu0 %v5325_v50 }
  0x75   :  { %4431 = vmatprep.subr.mxu0 %v5067_v0 }
  0x76   :  { %4432 = vmatpush3.msra.mxu0 %v5342_v56 }
  0x77   :  { %4433 = vmatprep.subr.mxu0 %v5067_v0 }
  0x78   :  { %4434 = vmatpush3.msra.mxu0 %v5350_v59 }
  0x79   :  { %4436 = vmatmul.mubr.f32.vlgmr.msra.gmra.mxu0 %v599_v35  ;;  %4438 = vmatprep.subr.mxu0 %v5067_v0 }
  0x7a   :  { %4442 = vmatprep.mubr.msk.f32.mxu0 %vm5068_vm0, %v5067_v0  ;;  %4439 = vmatpush3.msra.mxu0 %v109_v39 }
  0x7b   :  { %4440 = vmatprep.subr.mxu0 %v5067_v0  ;;  %v5420_v0 = vsub.s32 0, %v5353_v62 }
  0x7c   :  { %4441 = vmatpush3.msra.mxu0 %v108_v42 }
 0x119   :  { %v224_v43 = vpop.f32.mrf.mxu0 }
 0x11a   :  { %v228_v44 = vmax.f32 %v224_v43, 0.0 }
 0x11b   :  { %v4351_v45 = vpop.f32.mrf.mxu0 }
 0x11c   :  { %4357 = vmatmul.mubr.msk.f32.vlgmr.msra.gmra.mxu1 %vm229_vm2, %v228_v44 }
 0x11d   :  { %4391 = vmatprep.mubr.f32.mxu1 %v5491_v33 }
 0x139   :  { %v666_v47 = vpop.f32.mrf.mxu0 }
 0x13a   :  { %v670_v48 = vmax.f32 %v666_v47, 0.0 }
 0x13b   :  { %v4437_v49 = vpop.f32.mrf.mxu0 }
 0x13c   :  { %4443 = vmatmul.mubr.msk.f32.vlgmr.msra.gmra.mxu0 %vm229_vm2, %v670_v48  ;;  %v5507_v49 = vld [vmem:[#allocation2 + $0x8] sm:$0xff] }
 0x1dc   :  { %v299_v50 = vpop.f32.mrf.mxu1 }
 0x1dd   :  { %v304_v51 = vrot.slane %v299_v50, 1 }
 0x1de   :  { %v4358_v52 = vpop.f32.mrf.mxu1 }
 0x1df   :  { %v306_v53 = vadd.f32 %v304_v51, %v299_v50  ;;  %v5509_v50 = vld [vmem:[#allocation2 + $0x10] sm:$0xff] }
 0x1e1   :  { %v307_v56 = vmul.f32 0.5, %v306_v53  ;;  %v113_v53 = vld [vmem:[#allocation2 + $0x18] sm:$0xff] }
 0x1e3   :  { %4889 = vtanh.f32 %v307_v56  ;;  %v114_v56 = vld [vmem:[#allocation2 + $0x20] sm:$0xff] }
 0x1f0   :  { %v4890_v57 = vpop.eup %4889 }
 0x1f1   :  { %v309_v58 = vadd.f32 1.0, %v4890_v57 }
 0x1f3   :  { %v310_v59 = vmul.f32 0.5, %v309_v58 }
 0x1f5   :  { %v314_v60 = vrot.slane %v310_v59, %v5420_v0  ;;  %v115_v59 = vld [vmem:[#allocation2 + $0x28] sm:$0xff] }
 0x1f7   :  { %v5424_v61 = vmul.f32 %v314_v60, %v5216_v14  ;;  %v5427_v63 = vmul.f32 %v314_v60, %v5206_v12  ;;  %v5432_v11 = vmul.f32 %v314_v60, %v5211_v13  ;;  %v5435_v15 = vmul.f32 %v314_v60, %v5198_v10 }
 0x1f8   :  { %v5440_v12 = vmul.f32 %v314_v60, %v5193_v9  ;;  %v5443_v20 = vmul.f32 %v314_v60, %v5188_v8  ;;  %v5448_v10 = vmul.f32 %v314_v60, %v5182_v7  ;;  %v5453_v13 = vmul.f32 %v314_v60, %v5177_v6  ;;  %v116_v60 = vld [vmem:[#allocation2 + $0x30] sm:$0xff] }
 0x1f9   :  { %362 = vmax.xlane.f32.xlu0 %v5424_v61  ;;  %358 = vmax.xlane.f32.xlu1 %v5427_v63 }
 0x1fc   :  { %v740_v17 = vpop.f32.mrf.mxu0 }
 0x1fd   :  { %v745_v18 = vrot.slane %v740_v17, 1  ;;  %360 = vmax.xlane.f32.xlu0 %v5432_v11  ;;  %356 = vmax.xlane.f32.xlu1 %v5435_v15 }
 0x1fe   :  { %v4444_v14 = vpop.f32.mrf.mxu0 }
 0x1ff   :  { %v747_v19 = vadd.f32 %v745_v18, %v740_v17  ;;  %v117_v14 = vld [vmem:[#allocation2 + $0x38] sm:$0xff] }
 0x201   :  { %v748_v24 = vmul.f32 0.5, %v747_v19  ;;  %354 = vmax.xlane.f32.xlu0 %v5440_v12  ;;  %352 = vmax.xlane.f32.xlu1 %v5443_v20 }
 0x203   :  { %4891 = vtanh.f32 %v748_v24 }
 0x205   :  { %337 = vadd.xlane.f32.xlu1 %v5424_v61  ;;  %350 = vmax.xlane.f32.xlu0 %v5448_v10 }
 0x209   :  { %335 = vadd.xlane.f32.xlu1 %v5432_v11  ;;  %348 = vmax.xlane.f32.xlu0 %v5453_v13 }
 0x20d   :  { %331 = vadd.xlane.f32.xlu1 %v5435_v15  ;;  %333 = vadd.xlane.f32.xlu0 %v5427_v63 }
 0x210   :  { %v4892_v8 = vpop.eup %4891 }
 0x211   :  { %v750_v9 = vadd.f32 1.0, %v4892_v8  ;;  %327 = vadd.xlane.f32.xlu1 %v5443_v20  ;;  %329 = vadd.xlane.f32.xlu0 %v5440_v12 }
 0x213   :  { %v751_v7 = vmul.f32 0.5, %v750_v9 }
 0x215   :  { %v755_v27 = vrot.slane %v751_v7, %v5420_v0  ;;  %323 = vadd.xlane.f32.xlu1 %v5453_v13  ;;  %325 = vadd.xlane.f32.xlu0 %v5448_v10 }
 0x217   :  { %v5465_v6 = vmul.f32 %v5336_v55, %v755_v27  ;;  %v5468_v28 = vmul.f32 %v5331_v54, %v755_v27  ;;  %v5473_v29 = vmul.f32 %v5311_v46, %v755_v27  ;;  %v5476_v32 = vmul.f32 %v5289_v38, %v755_v27 }
 0x218   :  { %v5481_v55 = vmul.f32 %v5267_v30, %v755_v27  ;;  %v5484_v54 = vmul.f32 %v5247_v23, %v755_v27  ;;  %v5489_v46 = vmul.f32 %v5241_v22, %v755_v27  ;;  %v5497_v30 = vmul.f32 %v5236_v21, %v755_v27 }
 0x219   :  { %802 = vmax.xlane.f32.xlu0 %v5465_v6  ;;  %800 = vmax.xlane.f32.xlu1 %v5468_v28 }
 0x21d   :  { %798 = vmax.xlane.f32.xlu0 %v5473_v29  ;;  %796 = vmax.xlane.f32.xlu1 %v5476_v32 }
 0x221   :  { %794 = vmax.xlane.f32.xlu0 %v5481_v55  ;;  %792 = vmax.xlane.f32.xlu1 %v5484_v54 }
 0x225   :  { %778 = vadd.xlane.f32.xlu1 %v5465_v6  ;;  %790 = vmax.xlane.f32.xlu0 %v5489_v46 }
 0x229   :  { %776 = vadd.xlane.f32.xlu1 %v5468_v28  ;;  %788 = vmax.xlane.f32.xlu0 %v5497_v30 }
 0x22d   :  { %772 = vadd.xlane.f32.xlu1 %v5476_v32  ;;  %774 = vadd.xlane.f32.xlu0 %v5473_v29 }
 0x231   :  { %768 = vadd.xlane.f32.xlu1 %v5484_v54  ;;  %770 = vadd.xlane.f32.xlu0 %v5481_v55 }
 0x235   :  { %764 = vadd.xlane.f32.xlu1 %v5497_v30  ;;  %766 = vadd.xlane.f32.xlu0 %v5489_v46 }
 0x282   :  { %v363_v22 = vpop.xlane.xlu0 %362  ;;  %v359_v23 = vpop.xlane.xlu1 %358 }
 0x283   :  { %4359 = vmatprep.subr.mxu1 %v363_v22 }
 0x284   :  { %4360 = vmatpush3.msra.mxu1 %v363_v22 }
 0x286   :  { %v361_v21 = vpop.xlane.xlu0 %360  ;;  %v357_v38 = vpop.xlane.xlu1 %356 }
 0x287   :  { %4361 = vmatprep.subr.mxu1 %v361_v21 }
 0x288   :  { %4362 = vmatpush3.msra.mxu1 %v361_v21 }
 0x289   :  { %4363 = vmatprep.subr.mxu1 %v359_v23 }
 0x28a   :  { %4364 = vmatpush3.msra.mxu1 %v359_v23  ;;  %v355_v34 = vpop.xlane.xlu0 %354  ;;  %v353_v36 = vpop.xlane.xlu1 %352 }
 0x28b   :  { %4365 = vmatprep.subr.mxu1 %v357_v38 }
 0x28c   :  { %4366 = vmatpush3.msra.mxu1 %v357_v38 }
 0x28d   :  { %4367 = vmatprep.subr.mxu1 %v355_v34 }
 0x28e   :  { %4368 = vmatpush3.msra.mxu1 %v355_v34  ;;  %v338_v37 = vpop.xlane.xlu1 %337  ;;  %v351_v40 = vpop.xlane.xlu0 %350 }
 0x28f   :  { %4369 = vmatprep.subr.mxu1 %v353_v36  ;;  %v347_v2 = vmul.f32 0.0078125, %v338_v37 }
 0x290   :  { %4370 = vmatpush3.msra.mxu1 %v353_v36 }
 0x291   :  { %4371 = vmatprep.subr.mxu1 %v351_v40 }
 0x292   :  { %v336_v1 = vpop.xlane.xlu1 %335  ;;  %4372 = vmatpush3.msra.mxu1 %v351_v40  ;;  %v349_v41 = vpop.xlane.xlu0 %348 }
 0x293   :  { %4373 = vmatprep.subr.mxu1 %v349_v41  ;;  %v346_v3 = vmul.f32 0.0078125, %v336_v1 }
 0x294   :  { %4374 = vmatpush3.msra.mxu1 %v349_v41  ;;  %v5069_v41 = vmov 0  }
 0x295   :  { %4375 = vmatprep.subr.mxu1 %v347_v2  ;;  %4503 = vset.pattern.permute.xlu1 %v5069_v41 }
 0x296   :  { %v332_v4 = vpop.xlane.xlu1 %331  ;;  %4376 = vmatpush3.msra.mxu1 %v347_v2  ;;  %v334_v5 = vpop.xlane.xlu0 %333  ;;  %4504 = vset.pattern.permute.xlu0 %v5069_v41 }
 0x297   :  { %v345_v16 = vmul.f32 0.0078125, %v334_v5  ;;  %4377 = vmatprep.subr.mxu1 %v346_v3  ;;  %v344_v25 = vmul.f32 0.0078125, %v332_v4  ;;  %1465 = vmatprep.mubr.bf16.mxu0 %v5069_v41 }
 0x298   :  { %4378 = vmatpush3.msra.mxu1 %v346_v3 }
 0x299   :  { %4379 = vmatprep.subr.mxu1 %v345_v16 }
 0x29a   :  { %v328_v26 = vpop.xlane.xlu1 %327  ;;  %4380 = vmatpush3.msra.mxu1 %v345_v16  ;;  %v330_v31 = vpop.xlane.xlu0 %329 }
 0x29b   :  { %v343_v35 = vmul.f32 0.0078125, %v330_v31  ;;  %4381 = vmatprep.subr.mxu1 %v344_v25  ;;  %v342_v39 = vmul.f32 0.0078125, %v328_v26 }
 0x29c   :  { %4382 = vmatpush3.msra.mxu1 %v344_v25 }
 0x29d   :  { %4383 = vmatprep.subr.mxu1 %v343_v35 }
 0x29e   :  { %v324_v42 = vpop.xlane.xlu1 %323  ;;  %4384 = vmatpush3.msra.mxu1 %v343_v35  ;;  %v326_v43 = vpop.xlane.xlu0 %325 }
 0x29f   :  { %v341_v44 = vmul.f32 0.0078125, %v326_v43  ;;  %4385 = vmatprep.subr.mxu1 %v342_v39  ;;  %v340_v45 = vmul.f32 0.0078125, %v324_v42 }
 0x2a0   :  { %4386 = vmatpush3.msra.mxu1 %v342_v39 }
 0x2a1   :  { %4387 = vmatprep.subr.mxu1 %v341_v44 }
 0x2a2   :  { %4388 = vmatpush3.msra.mxu1 %v341_v44  ;;  %v803_v47 = vpop.xlane.xlu0 %802  ;;  %v801_v48 = vpop.xlane.xlu1 %800 }
 0x2a3   :  { %4389 = vmatprep.subr.mxu1 %v340_v45 }
 0x2a4   :  { %4390 = vmatpush3.msra.mxu1 %v340_v45 }
 0x2a5   :  { %4392 = vmatmul.mubr.f32.vlgmr.msra.gmra.mxu1 %v5507_v49  ;;  %4445 = vmatprep.subr.mxu1 %v803_v47 }
 0x2a6   :  { %4446 = vmatpush3.msra.mxu1 %v803_v47  ;;  %v799_v51 = vpop.xlane.xlu0 %798  ;;  %v797_v52 = vpop.xlane.xlu1 %796  ;;  %4394 = vmatprep.mubr.f32.mxu1 %v5509_v50 }
 0x2a7   :  { %4447 = vmatprep.subr.mxu1 %v801_v48 }
 0x2a8   :  { %4448 = vmatpush3.msra.mxu1 %v801_v48 }
 0x2a9   :  { %4395 = vmatmul.mubr.f32.gmra.mxu1 %v113_v53  ;;  %4449 = vmatprep.subr.mxu1 %v799_v51 }
 0x2aa   :  { %4450 = vmatpush3.msra.mxu1 %v799_v51  ;;  %v795_v57 = vpop.xlane.xlu0 %794  ;;  %v793_v58 = vpop.xlane.xlu1 %792  ;;  %4397 = vmatprep.mubr.f32.mxu1 %v114_v56 }
 0x2ab   :  { %4451 = vmatprep.subr.mxu1 %v797_v52 }
 0x2ac   :  { %4452 = vmatpush3.msra.mxu1 %v797_v52 }
 0x2ad   :  { %4453 = vmatprep.subr.mxu1 %v795_v57  ;;  %4398 = vmatmul.mubr.f32.gmra.mxu1 %v115_v59 }
 0x2ae   :  { %4454 = vmatpush3.msra.mxu1 %v795_v57  ;;  %v779_v17 = vpop.xlane.xlu1 %778  ;;  %v791_v18 = vpop.xlane.xlu0 %790  ;;  %4400 = vmatprep.mubr.f32.mxu1 %v116_v60 }
 0x2af   :  { %4455 = vmatprep.subr.mxu1 %v793_v58  ;;  %v787_v8 = vmul.f32 0.0078125, %v779_v17 }
 0x2b0   :  { %4456 = vmatpush3.msra.mxu1 %v793_v58 }
 0x2b1   :  { %4457 = vmatprep.subr.mxu1 %v791_v18  ;;  %4401 = vmatmul.mubr.f32.gmra.mxu1 %v117_v14 }
 0x2b2   :  { %v777_v19 = vpop.xlane.xlu1 %776  ;;  %4458 = vmatpush3.msra.mxu1 %v791_v18  ;;  %v789_v24 = vpop.xlane.xlu0 %788  ;;  %4477 = vmatprep.mubr.f32.mxu1 %v5491_v33 }
 0x2b3   :  { %4459 = vmatprep.subr.mxu1 %v789_v24  ;;  %v786_v9 = vmul.f32 0.0078125, %v777_v19 }
 0x2b4   :  { %4460 = vmatpush3.msra.mxu1 %v789_v24 }
 0x2b5   :  { %4461 = vmatprep.subr.mxu1 %v787_v8 }
 0x2b6   :  { %v773_v7 = vpop.xlane.xlu1 %772  ;;  %4462 = vmatpush3.msra.mxu1 %v787_v8  ;;  %v775_v27 = vpop.xlane.xlu0 %774 }
 0x2b7   :  { %v785_v22 = vmul.f32 0.0078125, %v775_v27  ;;  %4463 = vmatprep.subr.mxu1 %v786_v9  ;;  %v784_v23 = vmul.f32 0.0078125, %v773_v7 }
 0x2b8   :  { %4464 = vmatpush3.msra.mxu1 %v786_v9 }
 0x2b9   :  { %4465 = vmatprep.subr.mxu1 %v785_v22 }
 0x2ba   :  { %v769_v21 = vpop.xlane.xlu1 %768  ;;  %4466 = vmatpush3.msra.mxu1 %v785_v22  ;;  %v771_v38 = vpop.xlane.xlu0 %770 }
 0x2bb   :  { %v783_v34 = vmul.f32 0.0078125, %v771_v38  ;;  %4467 = vmatprep.subr.mxu1 %v784_v23  ;;  %v782_v33 = vmul.f32 0.0078125, %v769_v21 }
 0x2bc   :  { %4468 = vmatpush3.msra.mxu1 %v784_v23 }
 0x2bd   :  { %4469 = vmatprep.subr.mxu1 %v783_v34 }
 0x2be   :  { %v765_v36 = vpop.xlane.xlu1 %764  ;;  %4470 = vmatpush3.msra.mxu1 %v783_v34  ;;  %v767_v37 = vpop.xlane.xlu0 %766 }
 0x2bf   :  { %v781_v40 = vmul.f32 0.0078125, %v767_v37  ;;  %4471 = vmatprep.subr.mxu1 %v782_v33  ;;  %v780_v1 = vmul.f32 0.0078125, %v765_v36 }
 0x2c0   :  { %4472 = vmatpush3.msra.mxu1 %v782_v33 }
 0x2c1   :  { %4473 = vmatprep.subr.mxu1 %v781_v40 }
 0x2c2   :  { %4474 = vmatpush3.msra.mxu1 %v781_v40 }
 0x2c3   :  { %4475 = vmatprep.subr.mxu1 %v780_v1 }
 0x2c4   :  { %4476 = vmatpush3.msra.mxu1 %v780_v1 }
 0x2c5   :  { %4478 = vmatmul.mubr.f32.vlgmr.msra.gmra.mxu1 %v5507_v49 }
 0x2c6   :  { %4480 = vmatprep.mubr.f32.mxu1 %v5509_v50 }
 0x2c9   :  { %4481 = vmatmul.mubr.f32.gmra.mxu1 %v113_v53 }
 0x2ca   :  { %4483 = vmatprep.mubr.f32.mxu1 %v114_v56 }
 0x2cd   :  { %4484 = vmatmul.mubr.f32.gmra.mxu1 %v115_v59 }
 0x2ce   :  { %4486 = vmatprep.mubr.f32.mxu1 %v116_v60 }
 0x2d1   :  { %4487 = vmatmul.mubr.f32.gmra.mxu1 %v117_v14 }
 0x2d2   :  { %1506 = vmatprep.mubr.bf16.mxu1 %v5069_v41 }
 0x365   :  { %v4393_v2 = vpop.f32.mrf.mxu1 }
 0x366   :  { %v470_v3 = vmul.f32 0.5, %v4393_v2 }
 0x367   :  { %v430_v4 = vpop.f32.mrf.mxu1 }
 0x368   :  { %4893 = vtanh.f32 %v470_v3  ;;  %v469_v5 = vmul.f32 0.5, %v430_v4 }
 0x369   :  { %v4396_v16 = vpop.f32.mrf.mxu1 }
 0x36a   :  { %4895 = vtanh.f32 %v469_v5  ;;  %v472_v25 = vmul.f32 0.5, %v4396_v16 }
 0x36b   :  { %v440_v26 = vpop.f32.mrf.mxu1 }
 0x36c   :  { %4897 = vtanh.f32 %v472_v25  ;;  %v471_v31 = vmul.f32 0.5, %v440_v26 }
 0x36d   :  { %v4399_v35 = vpop.f32.mrf.mxu1 }
 0x36e   :  { %4899 = vtanh.f32 %v471_v31  ;;  %v474_v34 = vmul.f32 0.5, %v4399_v35 }
 0x36f   :  { %v450_v39 = vpop.f32.mrf.mxu1 }
 0x370   :  { %v473_v42 = vmul.f32 0.5, %v450_v39 }
 0x371   :  { %v4402_v59 = vpop.f32.mrf.mxu1 }
 0x372   :  { %4901 = vtanh.f32 %v473_v42  ;;  %v476_v16 = vmul.f32 0.5, %v4402_v59 }
 0x373   :  { %v460_v18 = vpop.f32.mrf.mxu1 }
 0x374   :  { %v475_v1 = vmul.f32 0.5, %v460_v18 }
 0x375   :  { %v4894_v43 = vpop.eup %4893 }
 0x376   :  { %v486_v44 = vadd.f32 1.0, %v4894_v43 }
 0x377   :  { %v4896_v45 = vpop.eup %4895 }
 0x378   :  { %v494_v47 = vmul.f32 0.5, %v486_v44  ;;  %v485_v48 = vadd.f32 1.0, %v4896_v45 }
 0x379   :  { %v4898_v49 = vpop.eup %4897 }
 0x37a   :  { %508 = vperm.xlu1 %4503, %v494_v47   ;;  %v493_v50 = vmul.f32 0.5, %v485_v48  ;;  %v488_v51 = vadd.f32 1.0, %v4898_v49 }
 0x37b   :  { %v4900_v52 = vpop.eup %4899 }
 0x37c   :  { %503 = vperm.xlu0 %4504, %v493_v50   ;;  %v496_v53 = vmul.f32 0.5, %v488_v51  ;;  %v487_v56 = vadd.f32 1.0, %v4900_v52  ;;  %v1062_v52 = vld [vmem:[#allocation5 + $0x1c0] sm:$0xff] }
 0x37e   :  { %518 = vperm.xlu1 %4503, %v496_v53   ;;  %v495_v57 = vmul.f32 0.5, %v487_v56  ;;  %v1066_v53 = vld [vmem:[#allocation5 + $0x1e0] sm:$0xff]  ;;  %v1063_v56 = vld [vmem:[#allocation5 + $0x1c8] sm:$0xff] }
 0x37f   :  { %v4902_v58 = vpop.eup %4901  ;;  %v3895_v59 = vcombine.high %v1062_v52, %v1066_v53  ;;  %v3894_v18 = vcombine.low %v1062_v52, %v1066_v53 }
 0x380   :  { %v489_v60 = vadd.f32 1.0, %v4902_v58 }
 0x381   :  { %1433 = vmatprep.subr.bf16.mxu0 %v3895_v59  ;;  %v1031_v59 = vld [vmem:[#allocation5 + $0xc8] sm:$0xff] }
 0x382   :  { %513 = vperm.xlu1 %4503, %v495_v57   ;;  %v497_v17 = vmul.f32 0.5, %v489_v60  ;;  %v1067_v60 = vld [vmem:[#allocation5 + $0x1e8] sm:$0xff]  ;;  %1434 = vmatpush1.bf16.msra.mxu0 %v3894_v18 }
 0x385   :  { %v4479_v14 = vpop.f32.mrf.mxu1 }
 0x386   :  { %v910_v19 = vmul.f32 0.5, %v4479_v14  ;;  %523 = vperm.xlu1 %4503, %v497_v17   ;;  %v3896_v14 = vcombine.low %v1063_v56, %v1067_v60 }
 0x387   :  { %v870_v24 = vpop.f32.mrf.mxu1 }
 0x388   :  { %4903 = vtanh.f32 %v910_v19  ;;  %v909_v8 = vmul.f32 0.5, %v870_v24  ;;  %v3897_v19 = vcombine.high %v1063_v56, %v1067_v60 }
 0x389   :  { %v4482_v9 = vpop.f32.mrf.mxu1 }
 0x38a   :  { %4905 = vtanh.f32 %v909_v8  ;;  %v912_v7 = vmul.f32 0.5, %v4482_v9  ;;  %1474 = vmatprep.subr.bf16.mxu1 %v3897_v19 }
 0x38b   :  { %v880_v27 = vpop.f32.mrf.mxu1  ;;  %1475 = vmatpush1.bf16.msra.mxu1 %v3896_v14 }
 0x38c   :  { %4907 = vtanh.f32 %v912_v7  ;;  %v911_v22 = vmul.f32 0.5, %v880_v27  ;;  %v1054_v27 = vld [vmem:[#allocation5 + $0x180] sm:$0xff] }
 0x38d   :  { %v4485_v23 = vpop.f32.mrf.mxu1 }
 0x38e   :  { %v914_v21 = vmul.f32 0.5, %v4485_v23  ;;  %4909 = vtanh.f32 %v911_v22  ;;  %v1058_v22 = vld [vmem:[#allocation5 + $0x1a0] sm:$0xff]  ;;  %v1055_v23 = vld [vmem:[#allocation5 + $0x188] sm:$0xff] }
 0x38f   :  { %v890_v38 = vpop.f32.mrf.mxu1 }
 0x390   :  { %4911 = vtanh.f32 %v914_v21  ;;  %v913_v33 = vmul.f32 0.5, %v890_v38 }
 0x391   :  { %v4488_v36 = vpop.f32.mrf.mxu1 }
 0x392   :  { %4913 = vtanh.f32 %v913_v33  ;;  %v916_v37 = vmul.f32 0.5, %v4488_v36  ;;  %v1059_v33 = vld [vmem:[#allocation5 + $0x1a8] sm:$0xff]  ;;  %v3886_v36 = vcombine.low %v1054_v27, %v1058_v22 }
 0x393   :  { %v900_v40 = vpop.f32.mrf.mxu1  ;;  %4915 = vtanh.f32 %v474_v34  ;;  %v3887_v34 = vcombine.high %v1054_v27, %v1058_v22  ;;  %v1027_v27 = vld [vmem:[#allocation5 + $0xa8] sm:$0xff] }
 0x394   :  { %v915_v2 = vmul.f32 0.5, %v900_v40  ;;  %4917 = vtanh.f32 %v916_v37  ;;  %v3888_v37 = vcombine.low %v1055_v23, %v1059_v33  ;;  %v3889_v40 = vcombine.high %v1055_v23, %v1059_v33  ;;  %v1015_v33 = vld [vmem:[#allocation5 + $0x48] sm:$0xff] }
 0x395   :  { %v4904_v3 = vpop.eup %4903  ;;  %1435 = vmatprep.subr.bf16.mxu0 %v3887_v34  ;;  %v1018_v34 = vld [vmem:[#allocation5 + $0x60] sm:$0xff] }
 0x396   :  { %4919 = vtanh.f32 %v915_v2  ;;  %v926_v4 = vadd.f32 1.0, %v4904_v3  ;;  %1476 = vmatprep.subr.bf16.mxu1 %v3889_v40  ;;  %1436 = vmatpush1.bf16.msra.mxu0 %v3886_v36 }
 0x397   :  { %v4906_v5 = vpop.eup %4905  ;;  %4921 = vtanh.f32 %v475_v1  ;;  %1477 = vmatpush1.bf16.msra.mxu1 %v3888_v37  ;;  %v1019_v37 = vld [vmem:[#allocation5 + $0x68] sm:$0xff] }
 0x398   :  { %v934_v25 = vmul.f32 0.5, %v926_v4  ;;  %v925_v26 = vadd.f32 1.0, %v4906_v5  ;;  %4923 = vtanh.f32 %v476_v16  ;;  %v1046_v4 = vld [vmem:[#allocation5 + $0x140] sm:$0xff]  ;;  %v1047_v16 = vld [vmem:[#allocation5 + $0x148] sm:$0xff] }
 0x399   :  { %v4908_v31 = vpop.eup %4907  ;;  %v1050_v5 = vld [vmem:[#allocation5 + $0x160] sm:$0xff] }
 0x39a   :  { %948 = vperm.xlu1 %4503, %v934_v25   ;;  %v928_v35 = vadd.f32 1.0, %v4908_v31  ;;  %v933_v42 = vmul.f32 0.5, %v925_v26  ;;  %v3879_v26 = vcombine.high %v1046_v4, %v1050_v5  ;;  %v1051_v31 = vld [vmem:[#allocation5 + $0x168] sm:$0xff] }
 0x39b   :  { %v4910_v39 = vpop.eup %4909 }
 0x39c   :  { %v936_v44 = vmul.f32 0.5, %v928_v35  ;;  %v927_v49 = vadd.f32 1.0, %v4910_v39  ;;  %v3878_v35 = vcombine.low %v1046_v4, %v1050_v5  ;;  %v3880_v39 = vcombine.low %v1047_v16, %v1051_v31  ;;  %1437 = vmatprep.subr.bf16.mxu0 %v3879_v26  ;;  %v1010_v4 = vld [vmem:[#allocation5 + $0x20] sm:$0xff]  ;;  %v1007_v5 = vld [vmem:[#allocation5 + $0x8] sm:$0xff] }
 0x39d   :  { %v4912_v43 = vpop.eup %4911  ;;  %v1011_v26 = vld [vmem:[#allocation5 + $0x28] sm:$0xff] }
 0x39e   :  { %943 = vperm.xlu1 %4503, %v933_v42   ;;  %v930_v45 = vadd.f32 1.0, %v4912_v43  ;;  %v935_v24 = vmul.f32 0.5, %v927_v49  ;;  %v3881_v42 = vcombine.high %v1047_v16, %v1051_v31  ;;  %1438 = vmatpush1.bf16.msra.mxu0 %v3878_v35  ;;  %v5520_v31 = vld [vmem:[#allocation5 + $0x1d0] sm:$0xff] }
 0x39f   :  { %v4914_v47 = vpop.eup %4913  ;;  %v5522_v35 = vld [vmem:[#allocation5 + $0x1f0] sm:$0xff] }
 0x3a0   :  { %v938_v48 = vmul.f32 0.5, %v930_v45  ;;  %v929_v50 = vadd.f32 1.0, %v4914_v47  ;;  %v4916_v51 = vpop.eup %4915  ;;  %1478 = vmatprep.subr.bf16.mxu1 %v3881_v42  ;;  %v1038_v45 = vld [vmem:[#allocation5 + $0x100] sm:$0xff]  ;;  %v3841_v42 = vcombine.high %v1007_v5, %v1011_v26 }
 0x3a1   :  { %v4918_v57 = vpop.eup %4917  ;;  %v490_v8 = vadd.f32 1.0, %v4916_v51  ;;  %v1042_v47 = vld [vmem:[#allocation5 + $0x120] sm:$0xff]  ;;  %1479 = vmatpush1.bf16.msra.mxu1 %v3880_v39  ;;  %v3840_v39 = vcombine.low %v1007_v5, %v1011_v26 }
 0x3a2   :  { %958 = vperm.xlu1 %4503, %v936_v44   ;;  %968 = vperm.xlu0 %4504, %v938_v48   ;;  %v937_v58 = vmul.f32 0.5, %v929_v50  ;;  %v932_v38 = vadd.f32 1.0, %v4918_v57  ;;  %v1039_v48 = vld [vmem:[#allocation5 + $0x108] sm:$0xff]  ;;  %v3871_v49 = vcombine.high %v1038_v45, %v1042_v47  ;;  %v3870_v51 = vcombine.low %v1038_v45, %v1042_v47  ;;  %v1030_v57 = vld [vmem:[#allocation5 + $0xc0] sm:$0xff]  ;;  %v5528_v45 = vld [vmem:[#allocation5 + $0x1d8] sm:$0xff] }
 0x3a3   :  { %v4920_v17 = vpop.eup %4919  ;;  %v498_v1 = vmul.f32 0.5, %v490_v8  ;;  %v1043_v50 = vld [vmem:[#allocation5 + $0x128] sm:$0xff]  ;;  %v1026_v8 = vld [vmem:[#allocation5 + $0xa0] sm:$0xff]  ;;  %v5530_v47 = vld [vmem:[#allocation5 + $0x1f8] sm:$0xff] }
 0x3a4   :  { %v931_v9 = vadd.f32 1.0, %v4920_v17  ;;  %v4922_v7 = vpop.eup %4921  ;;  %v940_v25 = vmul.f32 0.5, %v932_v38  ;;  %v3872_v52 = vcombine.low %v1039_v48, %v1043_v50  ;;  %v3873_v53 = vcombine.high %v1039_v48, %v1043_v50  ;;  %1439 = vmatprep.subr.bf16.mxu0 %v3871_v49  ;;  %v1035_v17 = vld [vmem:[#allocation5 + $0xe8] sm:$0xff]  ;;  %v1014_v38 = vld [vmem:[#allocation5 + $0x40] sm:$0xff] }
 0x3a5   :  { %v491_v2 = vadd.f32 1.0, %v4922_v7  ;;  %v4924_v3 = vpop.eup %4923  ;;  %1440 = vmatpush1.bf16.msra.mxu0 %v3870_v51  ;;  %v3864_v14 = vcombine.low %v1031_v59, %v1035_v17  ;;  %v3865_v19 = vcombine.high %v1031_v59, %v1035_v17  ;;  %v3847_v36 = vcombine.high %v1014_v38, %v1018_v34 }
 0x3a6   :  { %953 = vperm.xlu1 %4503, %v935_v24   ;;  %963 = vperm.xlu0 %4504, %v937_v58   ;;  %v939_v21 = vmul.f32 0.5, %v931_v9  ;;  %v492_v44 = vadd.f32 1.0, %v4924_v3  ;;  %v1034_v58 = vld [vmem:[#allocation5 + $0xe0] sm:$0xff]  ;;  %v1023_v9 = vld [vmem:[#allocation5 + $0x88] sm:$0xff]  ;;  %v3846_v40 = vcombine.low %v1014_v38, %v1018_v34  ;;  %v3900_v48 = vcombine.low %v5528_v45, %v5530_v47 }
 0x3a7   :  { %v499_v43 = vmul.f32 0.5, %v491_v2  ;;  %1480 = vmatprep.subr.bf16.mxu1 %v3873_v53  ;;  %v3863_v60 = vcombine.high %v1030_v57, %v1034_v58  ;;  %v3862_v18 = vcombine.low %v1030_v57, %v1034_v58  ;;  %v1022_v24 = vld [vmem:[#allocation5 + $0x80] sm:$0xff]  ;;  %v3856_v23 = vcombine.low %v1023_v9, %v1027_v27 }
 0x3a8   :  { %v500_v56 = vmul.f32 0.5, %v492_v44  ;;  %1481 = vmatpush1.bf16.msra.mxu1 %v3872_v52  ;;  %v3855_v7 = vcombine.high %v1022_v24, %v1026_v8  ;;  %v3854_v22 = vcombine.low %v1022_v24, %v1026_v8  ;;  %v3849_v2 = vcombine.high %v1015_v33, %v1019_v37  ;;  %v1006_v3 = vld [vmem:[#allocation5] sm:$0xff] }
 0x3a9   :  { %1441 = vmatprep.subr.bf16.mxu0 %v3863_v60  ;;  %1482 = vmatprep.subr.bf16.mxu1 %v3865_v19  ;;  %v3838_v16 = vcombine.low %v1006_v3, %v1010_v4  ;;  %v3899_v44 = vcombine.high %v5520_v31, %v5522_v35  ;;  %v3901_v49 = vcombine.high %v5528_v45, %v5530_v47  ;;  %v1032_v47 = vld [vmem:[#allocation5 + $0xd0] sm:$0xff] }
 0x3aa   :  { %528 = vperm.xlu1 %4503, %v498_v1   ;;  %973 = vperm.xlu0 %4504, %v939_v21   ;;  %v3857_v21 = vcombine.high %v1023_v9, %v1027_v27  ;;  %v3848_v1 = vcombine.low %v1015_v33, %v1019_v37 }
 0x3ab   :  { %1442 = vmatpush1.bf16.msra.mxu0 %v3862_v18 }
 0x3ac   :  { %1483 = vmatpush1.bf16.msra.mxu1 %v3864_v14  ;;  %1443 = vmatprep.subr.bf16.mxu0 %v3855_v7 }
 0x3ad   :  { %1484 = vmatprep.subr.bf16.mxu1 %v3857_v21 }
 0x3ae   :  { %533 = vperm.xlu1 %4503, %v499_v43   ;;  %978 = vperm.xlu0 %4504, %v940_v25   ;;  %v3839_v25 = vcombine.high %v1006_v3, %v1010_v4  ;;  %v3898_v43 = vcombine.low %v5520_v31, %v5522_v35 }
 0x3af   :  { %1444 = vmatpush1.bf16.msra.mxu0 %v3854_v22 }
 0x3b0   :  { %1485 = vmatpush1.bf16.msra.mxu1 %v3856_v23  ;;  %1445 = vmatprep.subr.bf16.mxu0 %v3847_v36 }
 0x3b1   :  { %1486 = vmatprep.subr.bf16.mxu1 %v3849_v2 }
 0x3b2   :  { %538 = vperm.xlu1 %4503, %v500_v56  }
 0x3b3   :  { %1446 = vmatpush1.bf16.msra.mxu0 %v3846_v40 }
 0x3b4   :  { %1487 = vmatpush1.bf16.msra.mxu1 %v3848_v1  ;;  %1447 = vmatprep.subr.bf16.mxu0 %v3839_v25 }
 0x3b5   :  { %1488 = vmatprep.subr.bf16.mxu1 %v3841_v42 }
 0x3b7   :  { %1448 = vmatpush1.bf16.msra.mxu0 %v3838_v16 }
 0x3b8   :  { %1515 = vmatprep.subr.bf16.mxu0 %v3899_v44  ;;  %1489 = vmatpush1.bf16.msra.mxu1 %v3840_v39 }
 0x3b9   :  { %1556 = vmatprep.subr.bf16.mxu1 %v3901_v49 }
 0x3f5   :  { %v509_v50 = vpop.permute.xlu1 %508 }
 0x3f6   :  { %v542_v18 = vmul.f32 %v509_v50, %v5448_v10 }
 0x3f7   :  { %v504_v57 = vpop.permute.xlu0 %503 }
 0x3f8   :  { %v541_v59 = vmul.f32 %v504_v57, %v5453_v13 }
 0x3f9   :  { %v519_v51 = vpop.permute.xlu1 %518 }
 0x3fa   :  { %v549_v24 = vadd.f32 %v542_v18, %v541_v59  ;;  %v544_v21 = vmul.f32 %v519_v51, %v5440_v12  ;;  %v1060_v59 = vld [vmem:[#allocation5 + $0x1b0] sm:$0xff] }
 0x3fd   :  { %v514_v52 = vpop.permute.xlu1 %513 }
 0x3fe   :  { %v543_v14 = vmul.f32 %v514_v52, %v5443_v20 }
 0x400   :  { %v550_v27 = vadd.f32 %v549_v24, %v543_v14 }
 0x401   :  { %v524_v53 = vpop.permute.xlu1 %523 }
 0x402   :  { %v545_v20 = vmul.f32 %v524_v53, %v5435_v15  ;;  %v551_v33 = vadd.f32 %v550_v27, %v544_v21  ;;  %v1053_v27 = vld [vmem:[#allocation5 + $0x178] sm:$0xff] }
 0x404   :  { %v552_v2 = vadd.f32 %v551_v33, %v545_v20  ;;  %v1045_v20 = vld [vmem:[#allocation5 + $0x138] sm:$0xff] }
 0x405   :  { %v1033_v33 = vld [vmem:[#allocation5 + $0xd8] sm:$0xff] }
 0x415   :  { %v949_v56 = vpop.permute.xlu1 %948 }
 0x416   :  { %v982_v8 = vmul.f32 %v949_v56, %v5489_v46 }
 0x419   :  { %v944_v58 = vpop.permute.xlu1 %943 }
 0x41a   :  { %v981_v19 = vmul.f32 %v944_v58, %v5497_v30 }
 0x41c   :  { %v989_v22 = vadd.f32 %v982_v8, %v981_v19  ;;  %v1048_v8 = vld [vmem:[#allocation5 + $0x150] sm:$0xff] }
 0x41d   :  { %v959_v60 = vpop.permute.xlu1 %958  ;;  %v969_v17 = vpop.permute.xlu0 %968 }
 0x41e   :  { %v984_v13 = vmul.f32 %v959_v60, %v5481_v55  ;;  %v986_v46 = vmul.f32 %v969_v17, %v5473_v29  ;;  %v1061_v60 = vld [vmem:[#allocation5 + $0x1b8] sm:$0xff] }
 0x421   :  { %v954_v9 = vpop.permute.xlu1 %953  ;;  %v964_v7 = vpop.permute.xlu0 %963 }
 0x422   :  { %v983_v23 = vmul.f32 %v954_v9, %v5484_v54  ;;  %v985_v36 = vmul.f32 %v964_v7, %v5476_v32  ;;  %v1052_v9 = vld [vmem:[#allocation5 + $0x170] sm:$0xff]  ;;  %v1049_v7 = vld [vmem:[#allocation5 + $0x158] sm:$0xff] }
 0x423   :  { %v3883_v21 = vcombine.high %v1048_v8, %v1052_v9  ;;  %v3882_v31 = vcombine.low %v1048_v8, %v1052_v9  ;;  %v3884_v35 = vcombine.low %v1049_v7, %v1053_v27  ;;  %v4520_v8 = vld [vmem:[#allocation7 + $0x2a0] ss:$16 sps:$4 sm:$0xff]   ;;  %v4525_v9 = vld [vmem:[#allocation7 + $0x84] ss:$16 sps:$4 sm:$0xff]  }
 0x424   :  { %v990_v38 = vadd.f32 %v989_v22, %v983_v23 }
 0x425   :  { %v529_v34 = vpop.permute.xlu1 %528  ;;  %v974_v10 = vpop.permute.xlu0 %973 }
 0x426   :  { %v991_v30 = vadd.f32 %v990_v38, %v984_v13  ;;  %v546_v40 = vmul.f32 %v529_v34, %v5427_v63  ;;  %v987_v55 = vmul.f32 %v974_v10, %v5468_v28  ;;  %v3885_v13 = vcombine.high %v1049_v7, %v1053_v27  ;;  %v1040_v38 = vld [vmem:[#allocation5 + $0x110] sm:$0xff]  ;;  %v1041_v10 = vld [vmem:[#allocation5 + $0x118] sm:$0xff] }
 0x427   :  { %v1044_v34 = vld [vmem:[#allocation5 + $0x130] sm:$0xff]  ;;  %v3877_v45 = vcombine.high %v1041_v10, %v1045_v20 }
 0x428   :  { %v992_v37 = vadd.f32 %v991_v30, %v985_v36  ;;  %v553_v4 = vadd.f32 %v552_v2, %v546_v40  ;;  %v1037_v30 = vld [vmem:[#allocation5 + $0xf8] sm:$0xff]  ;;  %v3874_v36 = vcombine.low %v1040_v38, %v1044_v34  ;;  %v1024_v40 = vld [vmem:[#allocation5 + $0x90] sm:$0xff] }
 0x429   :  { %v534_v1 = vpop.permute.xlu1 %533  ;;  %v979_v54 = vpop.permute.xlu0 %978  ;;  %v1029_v2 = vld [vmem:[#allocation5 + $0xb8] sm:$0xff]  ;;  %v4528_v7 = vld [vmem:[#allocation7 + $0x284] ss:$16 sps:$4 sm:$0xff]   ;;  %v4523_v27 = vld [vmem:[#allocation7 + $0x80] ss:$16 sps:$4 sm:$0xff]  }
 0x42a   :  { %v993_v12 = vadd.f32 %v992_v37, %v986_v46  ;;  %v547_v3 = vmul.f32 %v534_v1, %v5432_v11  ;;  %v988_v15 = vmul.f32 %v979_v54, %v5465_v6  ;;  %v1056_v6 = vld [vmem:[#allocation5 + $0x190] sm:$0xff]  ;;  %v3876_v46 = vcombine.low %v1041_v10, %v1045_v20  ;;  %v1025_v54 = vld [vmem:[#allocation5 + $0x98] sm:$0xff] }
 0x42b   :  { %v3891_v19 = vcombine.high %v1056_v6, %v1060_v59  ;;  %v3890_v22 = vcombine.low %v1056_v6, %v1060_v59  ;;  %v1028_v1 = vld [vmem:[#allocation5 + $0xb0] sm:$0xff] }
 0x42c   :  { %v994_v5 = vadd.f32 %v993_v12, %v987_v55  ;;  %v554_v25 = vadd.f32 %v553_v4, %v547_v3  ;;  %v3868_v55 = vcombine.low %v1033_v33, %v1037_v30  ;;  %v3859_v3 = vcombine.high %v1024_v40, %v1028_v1  ;;  %v4505_v6 = vld [vmem:[#allocation7 + $0xe0] ss:$16 sps:$4 sm:$0xff]   ;;  %v4513_v59 = vld [vmem:[#allocation7 + $0xc4] ss:$16 sps:$4 sm:$0xff]  }
 0x42d   :  { %v539_v16 = vpop.permute.xlu1 %538  ;;  %v3861_v4 = vcombine.high %v1025_v54, %v1029_v2  ;;  %v4535_v10 = vld [vmem:[#allocation7 + $0x40] ss:$16 sps:$4 sm:$0xff]  }
 0x42e   :  { %v995_v32 = vadd.f32 %v994_v5, %v988_v15  ;;  %v548_v29 = vmul.f32 %v539_v16, %v5424_v61  ;;  %v1057_v61 = vld [vmem:[#allocation5 + $0x198] sm:$0xff]  ;;  %v1016_v5 = vld [vmem:[#allocation5 + $0x50] sm:$0xff] }
 0x42f   :  { %v3893_v24 = vcombine.high %v1057_v61, %v1061_v60  ;;  %v3892_v23 = vcombine.low %v1057_v61, %v1061_v60  ;;  %v1020_v15 = vld [vmem:[#allocation5 + $0x70] sm:$0xff]  ;;  %v1017_v16 = vld [vmem:[#allocation5 + $0x58] sm:$0xff] }
 0x430   :  { %v996_v26 = vrot.slane %v995_v32, 4  ;;  %v555_v39 = vadd.f32 %v554_v25, %v548_v29  ;;  %v1021_v25 = vld [vmem:[#allocation5 + $0x78] sm:$0xff]  ;;  %v3860_v29 = vcombine.low %v1025_v54, %v1029_v2  ;;  %v4516_v61 = vld [vmem:[#allocation7 + $0x2c4] ss:$16 sps:$4 sm:$0xff]   ;;  %v4511_v60 = vld [vmem:[#allocation7 + $0xc0] ss:$16 sps:$4 sm:$0xff]  }
 0x431   :  { %v4538_v20 = vld [vmem:[#allocation7 + $0x240] ss:$16 sps:$4 sm:$0xff]  }
 0x432   :  { %v997_v63 = vadd.f32 %v996_v26, %v995_v32  ;;  %v556_v42 = vrot.slane %v555_v39, 4  ;;  %v3858_v32 = vcombine.low %v1024_v40, %v1028_v1  ;;  %v3851_v26 = vcombine.high %v1016_v5, %v1020_v15  ;;  %v4561_v40 = vld [vmem:[#allocation7 + $0x1c4] ss:$16 sps:$4 sm:$0xff]   ;;  %v4559_v54 = vld [vmem:[#allocation7 + $0x1c0] ss:$16 sps:$4 sm:$0xff]  }
 0x433   :  { %v4564_v1 = vld [vmem:[#allocation7 + $0x3c4] ss:$16 sps:$4 sm:$0xff]   ;;  %v4562_v2 = vld [vmem:[#allocation7 + $0x3c0] ss:$16 sps:$4 sm:$0xff]  }
 0x434   :  { %v998_v44 = vrot.slane %v997_v63, 2  ;;  %v557_v49 = vadd.f32 %v556_v42, %v555_v39  ;;  %v3853_v39 = vcombine.high %v1017_v16, %v1021_v25  ;;  %v1012_v42 = vld [vmem:[#allocation5 + $0x30] sm:$0xff] }
 0x436   :  { %v999_v50 = vadd.f32 %v998_v44, %v997_v63  ;;  %v558_v51 = vrot.slane %v557_v49, 2  ;;  %v1008_v63 = vld [vmem:[#allocation5 + $0x10] sm:$0xff]  ;;  %v1009_v44 = vld [vmem:[#allocation5 + $0x18] sm:$0xff] }
 0x438   :  { %v1000_v28 = vrot.slane %v999_v50, 1  ;;  %v559_v52 = vadd.f32 %v558_v51, %v557_v49  ;;  %v1013_v49 = vld [vmem:[#allocation5 + $0x38] sm:$0xff]  ;;  %v3852_v51 = vcombine.low %v1017_v16, %v1021_v25  ;;  %v4571_v16 = vld [vmem:[#allocation7 + $0x180] ss:$16 sps:$4 sm:$0xff]  }
 0x439   :  { %v4574_v25 = vld [vmem:[#allocation7 + $0x380] ss:$16 sps:$4 sm:$0xff]  }
 0x43a   :  { %v560_v11 = vrot.slane %v559_v52, 1  ;;  %v1001_v53 = vadd.f32 %v1000_v28, %v999_v50  ;;  %v3850_v50 = vcombine.low %v1016_v5, %v1020_v15  ;;  %v3843_v28 = vcombine.high %v1008_v63, %v1012_v42  ;;  %v4573_v5 = vld [vmem:[#allocation7 + $0x184] ss:$16 sps:$4 sm:$0xff]  }
 0x43b   :  { %v4576_v15 = vld [vmem:[#allocation7 + $0x384] ss:$16 sps:$4 sm:$0xff]  }
 0x43c   :  { %v561_v56 = vadd.f32 %v560_v11, %v559_v52  ;;  %v1002_v58 = vmul.f32 0.015625, %v1001_v53  ;;  %v3845_v52 = vcombine.high %v1009_v44, %v1013_v49  ;;  %v3842_v11 = vcombine.low %v1008_v63, %v1012_v42  ;;  %v4585_v63 = vld [vmem:[#allocation7 + $0x144] ss:$16 sps:$4 sm:$0xff]  }
 0x43d   :  { %v3844_v53 = vcombine.low %v1009_v44, %v1013_v49  ;;  %v4588_v42 = vld [vmem:[#allocation7 + $0x344] ss:$16 sps:$4 sm:$0xff]   ;;  %v4583_v44 = vld [vmem:[#allocation7 + $0x140] ss:$16 sps:$4 sm:$0xff]  }
 0x43e   :  { %v562_v57 = vmul.f32 0.015625, %v561_v56  ;;  %v4507_v56 = vld [vmem:[#allocation7 + $0xe4] ss:$16 sps:$4 sm:$0xff]   ;;  %v4586_v49 = vld [vmem:[#allocation7 + $0x340] ss:$16 sps:$4 sm:$0xff]  }
 0x440   :  { %v1003_v17 = vsel %vm156_vm1, %v562_v57, 0.0  ;;  %v4510_v57 = vld [vmem:[#allocation7 + $0x2e4] ss:$16 sps:$4 sm:$0xff]  }
 0x441   :  { %v1005_v18 = vsel %vm1004_vm3, %v1002_v58, %v1003_v17  ;;  %v4508_v58 = vld [vmem:[#allocation7 + $0x2e0] ss:$16 sps:$4 sm:$0xff]  }
 0x442   :  { %v5555_v14 = vpack.c.bf16 %v1005_v18, %v1005_v18  ;;  %v4514_v17 = vld [vmem:[#allocation7 + $0x2c0] ss:$16 sps:$4 sm:$0xff]   ;;  %v4519_v18 = vld [vmem:[#allocation7 + $0xa4] ss:$16 sps:$4 sm:$0xff]  }
 0x444   :  { %1466 = vmatmul.mubr.bf16.vlgmr.msra.gmra.mxu0 %v5555_v14  ;;  %1507 = vmatmul.mubr.bf16.vlgmr.msra.gmra.mxu1 %v5555_v14 }
 0x445   :  { %1516 = vmatpush1.bf16.msra.mxu0 %v3898_v43  ;;  %1557 = vmatpush1.bf16.msra.mxu1 %v3900_v48  ;;  %v3875_v43 = vcombine.high %v1040_v38, %v1044_v34  ;;  %v1036_v48 = vld [vmem:[#allocation5 + $0xf0] sm:$0xff] }
 0x446   :  { %1517 = vmatprep.subr.bf16.mxu0 %v3891_v19  ;;  %1558 = vmatprep.subr.bf16.mxu1 %v3893_v24  ;;  %v3867_v37 = vcombine.high %v1032_v47, %v1036_v48  ;;  %v3866_v12 = vcombine.low %v1032_v47, %v1036_v48  ;;  %v4522_v19 = vld [vmem:[#allocation7 + $0x2a4] ss:$16 sps:$4 sm:$0xff]   ;;  %v4517_v24 = vld [vmem:[#allocation7 + $0xa0] ss:$16 sps:$4 sm:$0xff]  }
 0x447   :  { %1547 = vmatprep.mubr.bf16.mxu0 %v5069_v41  ;;  %1588 = vmatprep.mubr.bf16.mxu1 %v5069_v41  ;;  %v3869_v41 = vcombine.high %v1033_v33, %v1037_v30  ;;  %v4537_v38 = vld [vmem:[#allocation7 + $0x44] ss:$16 sps:$4 sm:$0xff]   ;;  %v4547_v33 = vld [vmem:[#allocation7] ss:$16 sps:$4 sm:$0xff]  }
 0x448   :  { %v4540_v34 = vld [vmem:[#allocation7 + $0x244] ss:$16 sps:$4 sm:$0xff]   ;;  %v4550_v30 = vld [vmem:[#allocation7 + $0x200] ss:$16 sps:$4 sm:$0xff]  }
 0x449   :  { %1518 = vmatpush1.bf16.msra.mxu0 %v3890_v22  ;;  %1559 = vmatpush1.bf16.msra.mxu1 %v3892_v23  ;;  %v4531_v22 = vld [vmem:[#allocation7 + $0x64] ss:$16 sps:$4 sm:$0xff]  }
 0x44a   :  { %1519 = vmatprep.subr.bf16.mxu0 %v3883_v21  ;;  %1560 = vmatprep.subr.bf16.mxu1 %v3885_v13  ;;  %v4534_v23 = vld [vmem:[#allocation7 + $0x264] ss:$16 sps:$4 sm:$0xff]   ;;  %v4529_v21 = vld [vmem:[#allocation7 + $0x60] ss:$16 sps:$4 sm:$0xff]  }
 0x44b   :  { %v4532_v13 = vld [vmem:[#allocation7 + $0x260] ss:$16 sps:$4 sm:$0xff]   ;;  %v4549_v47 = vld [vmem:[#allocation7 + $0x4] ss:$16 sps:$4 sm:$0xff]  }
 0x44c   :  { %v4552_v48 = vld [vmem:[#allocation7 + $0x204] ss:$16 sps:$4 sm:$0xff]  }
 0x44d   :  { %1520 = vmatpush1.bf16.msra.mxu0 %v3882_v31  ;;  %1561 = vmatpush1.bf16.msra.mxu1 %v3884_v35  ;;  %v4543_v31 = vld [vmem:[#allocation7 + $0x24] ss:$16 sps:$4 sm:$0xff]  }
 0x44e   :  { %1521 = vmatprep.subr.bf16.mxu0 %v3875_v43  ;;  %1562 = vmatprep.subr.bf16.mxu1 %v3877_v45  ;;  %v4546_v35 = vld [vmem:[#allocation7 + $0x224] ss:$16 sps:$4 sm:$0xff]   ;;  %v4541_v43 = vld [vmem:[#allocation7 + $0x20] ss:$16 sps:$4 sm:$0xff]  }
 0x44f   :  { %v4544_v45 = vld [vmem:[#allocation7 + $0x220] ss:$16 sps:$4 sm:$0xff]  }
 0x451   :  { %1522 = vmatpush1.bf16.msra.mxu0 %v3874_v36  ;;  %1563 = vmatpush1.bf16.msra.mxu1 %v3876_v46  ;;  %v4555_v36 = vld [vmem:[#allocation7 + $0x1e4] ss:$16 sps:$4 sm:$0xff]  }
 0x452   :  { %1523 = vmatprep.subr.bf16.mxu0 %v3867_v37  ;;  %1564 = vmatprep.subr.bf16.mxu1 %v3869_v41  ;;  %v4558_v46 = vld [vmem:[#allocation7 + $0x3e4] ss:$16 sps:$4 sm:$0xff]   ;;  %v4553_v37 = vld [vmem:[#allocation7 + $0x1e0] ss:$16 sps:$4 sm:$0xff]  }
 0x453   :  { %v4556_v41 = vld [vmem:[#allocation7 + $0x3e0] ss:$16 sps:$4 sm:$0xff]  }
 0x455   :  { %1524 = vmatpush1.bf16.msra.mxu0 %v3866_v12  ;;  %1565 = vmatpush1.bf16.msra.mxu1 %v3868_v55  ;;  %v4567_v12 = vld [vmem:[#allocation7 + $0x1a4] ss:$16 sps:$4 sm:$0xff]  }
 0x456   :  { %1525 = vmatprep.subr.bf16.mxu0 %v3859_v3  ;;  %1566 = vmatprep.subr.bf16.mxu1 %v3861_v4  ;;  %v4570_v55 = vld [vmem:[#allocation7 + $0x3a4] ss:$16 sps:$4 sm:$0xff]   ;;  %v4565_v3 = vld [vmem:[#allocation7 + $0x1a0] ss:$16 sps:$4 sm:$0xff]  }
 0x457   :  { %v4568_v4 = vld [vmem:[#allocation7 + $0x3a0] ss:$16 sps:$4 sm:$0xff]  }
 0x459   :  { %1526 = vmatpush1.bf16.msra.mxu0 %v3858_v32  ;;  %1567 = vmatpush1.bf16.msra.mxu1 %v3860_v29  ;;  %v4579_v32 = vld [vmem:[#allocation7 + $0x164] ss:$16 sps:$4 sm:$0xff]  }
 0x45a   :  { %1527 = vmatprep.subr.bf16.mxu0 %v3851_v26  ;;  %1568 = vmatprep.subr.bf16.mxu1 %v3853_v39  ;;  %v4582_v29 = vld [vmem:[#allocation7 + $0x364] ss:$16 sps:$4 sm:$0xff]   ;;  %v4577_v26 = vld [vmem:[#allocation7 + $0x160] ss:$16 sps:$4 sm:$0xff]  }
 0x45b   :  { %v4580_v39 = vld [vmem:[#allocation7 + $0x360] ss:$16 sps:$4 sm:$0xff]  }
 0x45d   :  { %1528 = vmatpush1.bf16.msra.mxu0 %v3850_v50  ;;  %1569 = vmatpush1.bf16.msra.mxu1 %v3852_v51  ;;  %v4591_v50 = vld [vmem:[#allocation7 + $0x124] ss:$16 sps:$4 sm:$0xff]  }
 0x45e   :  { %1529 = vmatprep.subr.bf16.mxu0 %v3843_v28  ;;  %1570 = vmatprep.subr.bf16.mxu1 %v3845_v52  ;;  %v4594_v51 = vld [vmem:[#allocation7 + $0x324] ss:$16 sps:$4 sm:$0xff]   ;;  %v4589_v28 = vld [vmem:[#allocation7 + $0x120] ss:$16 sps:$4 sm:$0xff]  }
 0x45f   :  { %v4592_v52 = vld [vmem:[#allocation7 + $0x320] ss:$16 sps:$4 sm:$0xff]  }
 0x461   :  { %1530 = vmatpush1.bf16.msra.mxu0 %v3842_v11  ;;  %1571 = vmatpush1.bf16.msra.mxu1 %v3844_v53  ;;  %v4597_v11 = vld [vmem:[#allocation7 + $0x104] ss:$16 sps:$4 sm:$0xff]  }
 0x462   :  { %3235 = vmatprep.subr.bf16.mxu0 %v4507_v56  ;;  %3276 = vmatprep.subr.bf16.mxu1 %v4510_v57  ;;  %v4600_v53 = vld [vmem:[#allocation7 + $0x304] ss:$16 sps:$4 sm:$0xff]   ;;  %v4595_v56 = vld [vmem:[#allocation7 + $0x100] ss:$16 sps:$4 sm:$0xff]  }
 0x463   :  { %v4598_v57 = vld [vmem:[#allocation7 + $0x300] ss:$16 sps:$4 sm:$0xff]  }
 0x464   :  { %1548 = vmatmul.mubr.bf16.vlgmr.msra.gmra.mxu0 %v5555_v14  ;;  %1589 = vmatmul.mubr.bf16.vlgmr.msra.gmra.mxu1 %v5555_v14  ;;  %v4526_v14 = vld [vmem:[#allocation7 + $0x280] ss:$16 sps:$4 sm:$0xff]  }
 0x465   :  { %3236 = vmatpush1.bf16.msra.mxu0 %v4505_v6  ;;  %3277 = vmatpush1.bf16.msra.mxu1 %v4508_v58  ;;  %v4603_v6 = vld [vmem:[#allocation7 + $0x4e4] ss:$16 sps:$4 sm:$0xff]  }
 0x466   :  { %3237 = vmatprep.subr.bf16.mxu0 %v4513_v59  ;;  %3278 = vmatprep.subr.bf16.mxu1 %v4516_v61  ;;  %v4606_v58 = vld [vmem:[#allocation7 + $0x6e4] ss:$16 sps:$4 sm:$0xff]   ;;  %v1083_v59 = vsub.s32 2, %v5353_v62 }
 0x467   :  { %v5573_v61 = vld [vmem:[%s5715_s5] sm:$0xff] }
 0x469   :  { %3238 = vmatpush1.bf16.msra.mxu0 %v4511_v60  ;;  %3279 = vmatpush1.bf16.msra.mxu1 %v4514_v17  ;;  %v1079_v60 = vsub.s32 1, %v5353_v62  ;;  %v1087_v17 = vsub.s32 3, %v5353_v62 }
 0x46a   :  { %3239 = vmatprep.subr.bf16.mxu0 %v4519_v18  ;;  %3280 = vmatprep.subr.bf16.mxu1 %v4522_v19  ;;  %v1076_v18 = vrot.slane %v5573_v61, %v5420_v0  ;;  %v1084_v19 = vrot.slane %v5573_v61, %v1083_v59 }
 0x46d   :  { %3240 = vmatpush1.bf16.msra.mxu0 %v4517_v24  ;;  %3281 = vmatpush1.bf16.msra.mxu1 %v4520_v8  ;;  %v1080_v24 = vrot.slane %v5573_v61, %v1079_v60  ;;  %v1088_v8 = vrot.slane %v5573_v61, %v1087_v17 }
 0x46e   :  { %3241 = vmatprep.subr.bf16.mxu0 %v4525_v9  ;;  %3282 = vmatprep.subr.bf16.mxu1 %v4528_v7 }
 0x471   :  { %3242 = vmatpush1.bf16.msra.mxu0 %v4523_v27  ;;  %3283 = vmatpush1.bf16.msra.mxu1 %v4526_v14 }
 0x472   :  { %3243 = vmatprep.subr.bf16.mxu0 %v4531_v22  ;;  %3284 = vmatprep.subr.bf16.mxu1 %v4534_v23 }
 0x475   :  { %3244 = vmatpush1.bf16.msra.mxu0 %v4529_v21  ;;  %3285 = vmatpush1.bf16.msra.mxu1 %v4532_v13 }
 0x476   :  { %3245 = vmatprep.subr.bf16.mxu0 %v4537_v38  ;;  %3286 = vmatprep.subr.bf16.mxu1 %v4540_v34 }
 0x479   :  { %3246 = vmatpush1.bf16.msra.mxu0 %v4535_v10  ;;  %3287 = vmatpush1.bf16.msra.mxu1 %v4538_v20 }
 0x47a   :  { %3247 = vmatprep.subr.bf16.mxu0 %v4543_v31  ;;  %3288 = vmatprep.subr.bf16.mxu1 %v4546_v35 }
 0x47d   :  { %3248 = vmatpush1.bf16.msra.mxu0 %v4541_v43  ;;  %3289 = vmatpush1.bf16.msra.mxu1 %v4544_v45 }
 0x47e   :  { %3249 = vmatprep.subr.bf16.mxu0 %v4549_v47  ;;  %3290 = vmatprep.subr.bf16.mxu1 %v4552_v48 }
 0x481   :  { %3250 = vmatpush1.bf16.msra.mxu0 %v4547_v33  ;;  %3291 = vmatpush1.bf16.msra.mxu1 %v4550_v30 }
 0x482   :  { %3251 = vmatprep.subr.bf16.mxu0 %v4555_v36  ;;  %3292 = vmatprep.subr.bf16.mxu1 %v4558_v46 }
 0x485   :  { %3252 = vmatpush2.bf16.msra.mxu0 %v4553_v37  ;;  %3293 = vmatpush2.bf16.msra.mxu1 %v4556_v41 }
 0x486   :  { %3253 = vmatprep.subr.bf16.mxu0 %v4561_v40  ;;  %3294 = vmatprep.subr.bf16.mxu1 %v4564_v1 }
 0x489   :  { %3254 = vmatpush2.bf16.msra.mxu0 %v4559_v54  ;;  %3295 = vmatpush2.bf16.msra.mxu1 %v4562_v2 }
 0x48a   :  { %3255 = vmatprep.subr.bf16.mxu0 %v4567_v12  ;;  %3296 = vmatprep.subr.bf16.mxu1 %v4570_v55 }
 0x48d   :  { %3256 = vmatpush2.bf16.msra.mxu0 %v4565_v3  ;;  %3297 = vmatpush2.bf16.msra.mxu1 %v4568_v4 }
 0x48e   :  { %3257 = vmatprep.subr.bf16.mxu0 %v4573_v5  ;;  %3298 = vmatprep.subr.bf16.mxu1 %v4576_v15 }
 0x491   :  { %3258 = vmatpush2.bf16.msra.mxu0 %v4571_v16  ;;  %3299 = vmatpush2.bf16.msra.mxu1 %v4574_v25  ;;  %v1095_v16 = vsub.s32 5, %v5353_v62  ;;  %v1103_v25 = vsub.s32 7, %v5353_v62 }
 0x492   :  { %3259 = vmatprep.subr.bf16.mxu0 %v4579_v32  ;;  %3300 = vmatprep.subr.bf16.mxu1 %v4582_v29 }
 0x495   :  { %3260 = vmatpush2.bf16.msra.mxu0 %v4577_v26  ;;  %3301 = vmatpush2.bf16.msra.mxu1 %v4580_v39 }
 0x496   :  { %3261 = vmatprep.subr.bf16.mxu0 %v4585_v63  ;;  %3302 = vmatprep.subr.bf16.mxu1 %v4588_v42 }
 0x499   :  { %3262 = vmatpush2.bf16.msra.mxu0 %v4583_v44  ;;  %3303 = vmatpush2.bf16.msra.mxu1 %v4586_v49 }
 0x49a   :  { %3263 = vmatprep.subr.bf16.mxu0 %v4591_v50  ;;  %3304 = vmatprep.subr.bf16.mxu1 %v4594_v51 }
 0x49d   :  { %3264 = vmatpush2.bf16.msra.mxu0 %v4589_v28  ;;  %3305 = vmatpush2.bf16.msra.mxu1 %v4592_v52  ;;  %v1096_v52 = vrot.slane %v5573_v61, %v1095_v16  ;;  %v4622_v16 = vld [vmem:[#allocation7 + $0x680] ss:$16 sps:$4 sm:$0xff]  }
 0x49e   :  { %3265 = vmatprep.subr.bf16.mxu0 %v4597_v11  ;;  %3306 = vmatprep.subr.bf16.mxu1 %v4600_v53  ;;  %v1104_v11 = vrot.slane %v5573_v61, %v1103_v25  ;;  %v4627_v25 = vld [vmem:[#allocation7 + $0x464] ss:$16 sps:$4 sm:$0xff]  }
 0x4a1   :  { %3266 = vmatpush2.bf16.msra.mxu0 %v4595_v56  ;;  %3307 = vmatpush2.bf16.msra.mxu1 %v4598_v57 }
 0x4a2   :  { %3317 = vmatprep.subr.bf16.mxu0 %v4603_v6  ;;  %3358 = vmatprep.subr.bf16.mxu1 %v4606_v58 }
 0x504   :  { %v1467_v9 = vpop.f32.mrf.mxu0  ;;  %v1508_v7 = vpop.f32.mrf.mxu1 }
 0x505   :  { %v1468_v27 = vadd.f32 %v1467_v9, %v1076_v18  ;;  %v1509_v14 = vadd.f32 %v1508_v7, %v1084_v19  ;;  %v4601_v19 = vld [vmem:[#allocation7 + $0x4e0] ss:$16 sps:$4 sm:$0xff]  }
 0x506   :  { %v1469_v22 = vpop.f32.mrf.mxu0  ;;  %v1510_v23 = vpop.f32.mrf.mxu1  ;;  %v4604_v7 = vld [vmem:[#allocation7 + $0x6e0] ss:$16 sps:$4 sm:$0xff]  }
 0x507   :  { %v1605_v21 = vmul.f32 0.044715, %v1468_v27  ;;  %v1607_v13 = vmul.f32 0.044715, %v1509_v14  ;;  %v1470_v38 = vadd.f32 %v1469_v22, %v1080_v24  ;;  %v1511_v34 = vadd.f32 %v1510_v23, %v1088_v8 }
 0x508   :  { %v1471_v10 = vpop.f32.mrf.mxu0  ;;  %v1512_v20 = vpop.f32.mrf.mxu1  ;;  %v1597_v26 = vmul.f32 0.5, %v1468_v27  ;;  %v1599_v49 = vmul.f32 0.5, %v1509_v14 }
 0x509   :  { %v1613_v31 = vmul.f32 %v1605_v21, %v1468_v27  ;;  %v1615_v35 = vmul.f32 %v1607_v13, %v1509_v14  ;;  %v1606_v43 = vmul.f32 0.044715, %v1470_v38  ;;  %v1608_v45 = vmul.f32 0.044715, %v1511_v34  ;;  %v4612_v13 = vld [vmem:[#allocation7 + $0x6c4] ss:$16 sps:$4 sm:$0xff]  }
 0x50a   :  { %v1472_v47 = vpop.f32.mrf.mxu0  ;;  %v1513_v48 = vpop.f32.mrf.mxu1  ;;  %v1598_v42 = vmul.f32 0.5, %v1470_v38  ;;  %v1600_v50 = vmul.f32 0.5, %v1511_v34 }
 0x50b   :  { %v1621_v33 = vmul.f32 %v1613_v31, %v1468_v27  ;;  %v1623_v30 = vmul.f32 %v1615_v35, %v1509_v14  ;;  %v1614_v36 = vmul.f32 %v1606_v43, %v1470_v38  ;;  %v1616_v46 = vmul.f32 %v1608_v45, %v1511_v34  ;;  %v4607_v31 = vld [vmem:[#allocation7 + $0x4c0] ss:$16 sps:$4 sm:$0xff]   ;;  %v4615_v47 = vld [vmem:[#allocation7 + $0x4a4] ss:$16 sps:$4 sm:$0xff]  }
 0x50c   :  { %v4610_v45 = vld [vmem:[#allocation7 + $0x6c0] ss:$16 sps:$4 sm:$0xff]  }
 0x50d   :  { %v1629_v37 = vadd.f32 %v1621_v33, %v1468_v27  ;;  %v1631_v41 = vadd.f32 %v1623_v30, %v1509_v14  ;;  %v1622_v40 = vmul.f32 %v1614_v36, %v1470_v38  ;;  %v1624_v1 = vmul.f32 %v1616_v46, %v1511_v34  ;;  %v4609_v14 = vld [vmem:[#allocation7 + $0x4c4] ss:$16 sps:$4 sm:$0xff]   ;;  %v4613_v36 = vld [vmem:[#allocation7 + $0x4a0] ss:$16 sps:$4 sm:$0xff]  }
 0x50e   :  { %v4618_v30 = vld [vmem:[#allocation7 + $0x6a4] ss:$16 sps:$4 sm:$0xff]  }
 0x50f   :  { %v1637_v54 = vmul.f32 0.7978846, %v1629_v37  ;;  %v1639_v2 = vmul.f32 0.7978846, %v1631_v41  ;;  %v1630_v12 = vadd.f32 %v1622_v40, %v1470_v38  ;;  %v1632_v55 = vadd.f32 %v1624_v1, %v1511_v34  ;;  %v4616_v40 = vld [vmem:[#allocation7 + $0x6a0] ss:$16 sps:$4 sm:$0xff]  }
 0x510   :  { %v1091_v41 = vsub.s32 4, %v5353_v62  ;;  %v4621_v1 = vld [vmem:[#allocation7 + $0x484] ss:$16 sps:$4 sm:$0xff]  }
 0x511   :  { %v1638_v3 = vmul.f32 0.7978846, %v1630_v12  ;;  %v1640_v4 = vmul.f32 0.7978846, %v1632_v55  ;;  %4925 = vtanh.f32 %v1637_v54  ;;  %v1099_v54 = vsub.s32 6, %v5353_v62 }
 0x512   :  { %4927 = vtanh.f32 %v1639_v2  ;;  %v4624_v2 = vld [vmem:[#allocation7 + $0x684] ss:$16 sps:$4 sm:$0xff]  }
 0x513   :  { %4929 = vtanh.f32 %v1638_v3  ;;  %v4619_v3 = vld [vmem:[#allocation7 + $0x480] ss:$16 sps:$4 sm:$0xff]  }
 0x514   :  { %4931 = vtanh.f32 %v1640_v4 }
 0x51e   :  { %v4926_v5 = vpop.eup %4925 }
 0x51f   :  { %v4928_v15 = vpop.eup %4927  ;;  %v1653_v32 = vadd.f32 1.0, %v4926_v5 }
 0x520   :  { %v4930_v29 = vpop.eup %4929  ;;  %v1655_v39 = vadd.f32 1.0, %v4928_v15  ;;  %v1092_v15 = vrot.slane %v5573_v61, %v1091_v41  ;;  %v4655_v41 = vld [vmem:[#allocation7 + $0x5c0] ss:$16 sps:$4 sm:$0xff]  }
 0x521   :  { %v4932_v63 = vpop.eup %4931  ;;  %v1654_v44 = vadd.f32 1.0, %v4930_v29  ;;  %v1661_v28 = vmul.f32 %v1653_v32, %v1597_v26  ;;  %v1100_v32 = vrot.slane %v5573_v61, %v1099_v54  ;;  %v4630_v29 = vld [vmem:[#allocation7 + $0x664] ss:$16 sps:$4 sm:$0xff]   ;;  %v4625_v26 = vld [vmem:[#allocation7 + $0x460] ss:$16 sps:$4 sm:$0xff]  }
 0x522   :  { %v1656_v51 = vadd.f32 1.0, %v4932_v63  ;;  %v1663_v56 = vmul.f32 %v1655_v39, %v1599_v49  ;;  %v4628_v63 = vld [vmem:[#allocation7 + $0x660] ss:$16 sps:$4 sm:$0xff]   ;;  %v4636_v49 = vld [vmem:[#allocation7 + $0x644] ss:$16 sps:$4 sm:$0xff]  }
 0x523   :  { %v1662_v53 = vmul.f32 %v1654_v44, %v1598_v42  ;;  %v5600_v27 = vpack.c.bf16 %v1661_v28, %v1661_v28  ;;  %v4633_v42 = vld [vmem:[#allocation7 + $0x444] ss:$16 sps:$4 sm:$0xff]   ;;  %v4631_v61 = vld [vmem:[#allocation7 + $0x440] ss:$16 sps:$4 sm:$0xff]  }
 0x524   :  { %v5592_v57 = vpop.f32.mrf.mxu0  ;;  %v5594_v6 = vpop.f32.mrf.mxu1  ;;  %v1664_v58 = vmul.f32 %v1656_v51, %v1600_v50  ;;  %v5607_v21 = vpack.c.bf16 %v1663_v56, %v1663_v56  ;;  %v4634_v51 = vld [vmem:[#allocation7 + $0x640] ss:$16 sps:$4 sm:$0xff]   ;;  %v4639_v28 = vld [vmem:[#allocation7 + $0x424] ss:$16 sps:$4 sm:$0xff]  }
 0x525   :  { %v5596_v18 = vpack.c.bf16 %v1662_v53, %v1662_v53  ;;  %v5625_v39 = vadd.f32 %v5592_v57, %v1092_v15  ;;  %v5628_v44 = vadd.f32 %v5594_v6, %v1100_v32  ;;  %v4637_v53 = vld [vmem:[#allocation7 + $0x420] ss:$16 sps:$4 sm:$0xff]   ;;  %v4645_v6 = vld [vmem:[#allocation7 + $0x404] ss:$16 sps:$4 sm:$0xff]  }
 0x526   :  { %v1551_v24 = vpop.f32.mrf.mxu0  ;;  %v1592_v8 = vpop.f32.mrf.mxu1  ;;  %v5598_v9 = vpack.c.bf16 %v1664_v58, %v1664_v58  ;;  %v4640_v57 = vld [vmem:[#allocation7 + $0x620] ss:$16 sps:$4 sm:$0xff]   ;;  %v4663_v54 = vld [vmem:[#allocation7 + $0x5a4] ss:$16 sps:$4 sm:$0xff]  }
 0x527   :  { %v5602_v22 = vadd.f32 %v1551_v24, %v1096_v52  ;;  %v5604_v23 = vadd.f32 %v1592_v8, %v1104_v11  ;;  %3267 = vmatprep.mubr.bf16.mxu0 %v5596_v18  ;;  %v1609_v50 = vmul.f32 0.044715, %v5625_v39  ;;  %v1611_v52 = vmul.f32 0.044715, %v5628_v44  ;;  %v4642_v11 = vld [vmem:[#allocation7 + $0x624] ss:$16 sps:$4 sm:$0xff]  }
 0x528   :  { %v1553_v38 = vpop.f32.mrf.mxu0  ;;  %v1594_v34 = vpop.f32.mrf.mxu1  ;;  %3308 = vmatprep.mubr.bf16.mxu1 %v5598_v9  ;;  %3268 = vmatmul.mubr.bf16.vlgmr.msra.gmra.mxu0 %v5600_v27  ;;  %v4667_v15 = vld [vmem:[#allocation7 + $0x580] ss:$16 sps:$4 sm:$0xff]   ;;  %v4678_v32 = vld [vmem:[#allocation7 + $0x764] ss:$16 sps:$4 sm:$0xff]  }
 0x529   :  { %v1610_v10 = vmul.f32 0.044715, %v5602_v22  ;;  %v1612_v20 = vmul.f32 0.044715, %v5604_v23  ;;  %3309 = vmatmul.mubr.bf16.vlgmr.msra.gmra.mxu1 %v5607_v21  ;;  %3318 = vmatpush1.bf16.msra.mxu0 %v4601_v19  ;;  %v1617_v56 = vmul.f32 %v1609_v50, %v5625_v39  ;;  %v1619_v58 = vmul.f32 %v1611_v52, %v5628_v44  ;;  %v4648_v19 = vld [vmem:[#allocation7 + $0x604] ss:$16 sps:$4 sm:$0xff]  }
 0x52a   :  { %3359 = vmatpush1.bf16.msra.mxu1 %v4604_v7  ;;  %v1554_v35 = vpop.f32.mrf.mxu0  ;;  %v1595_v43 = vpop.f32.mrf.mxu1  ;;  %3319 = vmatprep.subr.bf16.mxu0 %v4609_v14  ;;  %v4643_v7 = vld [vmem:[#allocation7 + $0x400] ss:$16 sps:$4 sm:$0xff]   ;;  %v1602_v14 = vmul.f32 0.5, %v5602_v22  ;;  %v4687_v50 = vld [vmem:[#allocation7 + $0x524] ss:$16 sps:$4 sm:$0xff]  }
 0x52b   :  { %v1618_v48 = vmul.f32 %v1610_v10, %v5602_v22  ;;  %v1620_v33 = vmul.f32 %v1612_v20, %v5604_v23  ;;  %3360 = vmatprep.subr.bf16.mxu1 %v4612_v13  ;;  %v1625_v38 = vmul.f32 %v1617_v56, %v5625_v39  ;;  %v4646_v34 = vld [vmem:[#allocation7 + $0x600] ss:$16 sps:$4 sm:$0xff]   ;;  %v1604_v10 = vmul.f32 0.5, %v5604_v23  ;;  %v4693_v56 = vld [vmem:[#allocation7 + $0x504] ss:$16 sps:$4 sm:$0xff]  }
 0x52c   :  { %v1627_v35 = vmul.f32 %v1619_v58, %v5628_v44 }
 0x52d   :  { %3320 = vmatpush1.bf16.msra.mxu0 %v4607_v31  ;;  %v1626_v46 = vmul.f32 %v1618_v48, %v5602_v22  ;;  %v1628_v37 = vmul.f32 %v1620_v33, %v5604_v23  ;;  %v4651_v31 = vld [vmem:[#allocation7 + $0x5e4] ss:$16 sps:$4 sm:$0xff]   ;;  %v1633_v33 = vadd.f32 %v1625_v38, %v5625_v39 }
 0x52e   :  { %3361 = vmatpush1.bf16.msra.mxu1 %v4610_v45  ;;  %3321 = vmatprep.subr.bf16.mxu0 %v4615_v47  ;;  %v4654_v45 = vld [vmem:[#allocation7 + $0x7e4] ss:$16 sps:$4 sm:$0xff]  }
 0x52f   :  { %3362 = vmatprep.subr.bf16.mxu1 %v4618_v30  ;;  %v1634_v12 = vadd.f32 %v1626_v46, %v5602_v22  ;;  %v1636_v55 = vadd.f32 %v1628_v37, %v5604_v23  ;;  %v4649_v22 = vld [vmem:[#allocation7 + $0x5e0] ss:$16 sps:$4 sm:$0xff]   ;;  %v4657_v23 = vld [vmem:[#allocation7 + $0x5c4] ss:$16 sps:$4 sm:$0xff]   ;;  %v1635_v46 = vadd.f32 %v1627_v35, %v5628_v44  ;;  %v4705_v35 = vld [vmem:[#allocation7 + $0xcc] ss:$16 sps:$4 sm:$0xff]  }
 0x530   :  { %v4660_v37 = vld [vmem:[#allocation7 + $0x7c4] ss:$16 sps:$4 sm:$0xff]  }
 0x531   :  { %3322 = vmatpush1.bf16.msra.mxu0 %v4613_v36  ;;  %v1642_v4 = vmul.f32 0.7978846, %v1634_v12  ;;  %v1644_v5 = vmul.f32 0.7978846, %v1636_v55  ;;  %v4652_v36 = vld [vmem:[#allocation7 + $0x7e0] ss:$16 sps:$4 sm:$0xff]  }
 0x532   :  { %3363 = vmatpush1.bf16.msra.mxu1 %v4616_v40  ;;  %3323 = vmatprep.subr.bf16.mxu0 %v4621_v1  ;;  %v1641_v40 = vmul.f32 0.7978846, %v1633_v33  ;;  %v4658_v1 = vld [vmem:[#allocation7 + $0x7c0] ss:$16 sps:$4 sm:$0xff]   ;;  %v4666_v12 = vld [vmem:[#allocation7 + $0x7a4] ss:$16 sps:$4 sm:$0xff]  }
 0x533   :  { %3364 = vmatprep.subr.bf16.mxu1 %v4624_v2  ;;  %4933 = vtanh.f32 %v1642_v4  ;;  %v1643_v2 = vmul.f32 0.7978846, %v1635_v46  ;;  %v4661_v55 = vld [vmem:[#allocation7 + $0x5a0] ss:$16 sps:$4 sm:$0xff]   ;;  %v4669_v4 = vld [vmem:[#allocation7 + $0x584] ss:$16 sps:$4 sm:$0xff]  }
 0x534   :  { %4935 = vtanh.f32 %v1644_v5  ;;  %v4672_v5 = vld [vmem:[#allocation7 + $0x784] ss:$16 sps:$4 sm:$0xff]   ;;  %v4709_v33 = vld [vmem:[#allocation7 + $0xa8] ss:$16 sps:$4 sm:$0xff]   ;;  %v4720_v46 = vld [vmem:[#allocation7 + $0x28c] ss:$16 sps:$4 sm:$0xff]  }
 0x535   :  { %3324 = vmatpush1.bf16.msra.mxu0 %v4619_v3  ;;  %v4664_v3 = vld [vmem:[#allocation7 + $0x7a0] ss:$16 sps:$4 sm:$0xff]   ;;  %4937 = vtanh.f32 %v1641_v40  ;;  %v4726_v40 = vld [vmem:[#allocation7 + $0x26c] ss:$16 sps:$4 sm:$0xff]  }
 0x536   :  { %3365 = vmatpush1.bf16.msra.mxu1 %v4622_v16  ;;  %3325 = vmatprep.subr.bf16.mxu0 %v4627_v25  ;;  %4939 = vtanh.f32 %v1643_v2  ;;  %v4670_v16 = vld [vmem:[#allocation7 + $0x780] ss:$16 sps:$4 sm:$0xff]   ;;  %v4675_v25 = vld [vmem:[#allocation7 + $0x564] ss:$16 sps:$4 sm:$0xff]   ;;  %v4732_v2 = vld [vmem:[#allocation7 + $0x24c] ss:$16 sps:$4 sm:$0xff]  }
 0x537   :  { %3366 = vmatprep.subr.bf16.mxu1 %v4630_v29  ;;  %v4673_v29 = vld [vmem:[#allocation7 + $0x560] ss:$16 sps:$4 sm:$0xff]  }
 0x539   :  { %3326 = vmatpush1.bf16.msra.mxu0 %v4625_v26  ;;  %v4676_v26 = vld [vmem:[#allocation7 + $0x760] ss:$16 sps:$4 sm:$0xff]  }
 0x53a   :  { %3367 = vmatpush1.bf16.msra.mxu1 %v4628_v63  ;;  %3327 = vmatprep.subr.bf16.mxu0 %v4633_v42  ;;  %v4681_v63 = vld [vmem:[#allocation7 + $0x544] ss:$16 sps:$4 sm:$0xff]  }
 0x53b   :  { %3368 = vmatprep.subr.bf16.mxu1 %v4636_v49  ;;  %v4684_v42 = vld [vmem:[#allocation7 + $0x744] ss:$16 sps:$4 sm:$0xff]   ;;  %v4679_v49 = vld [vmem:[#allocation7 + $0x540] ss:$16 sps:$4 sm:$0xff]  }
 0x53d   :  { %3328 = vmatpush1.bf16.msra.mxu0 %v4631_v61  ;;  %v4682_v61 = vld [vmem:[#allocation7 + $0x740] ss:$16 sps:$4 sm:$0xff]  }
 0x53e   :  { %3369 = vmatpush1.bf16.msra.mxu1 %v4634_v51  ;;  %3329 = vmatprep.subr.bf16.mxu0 %v4639_v28  ;;  %v4690_v28 = vld [vmem:[#allocation7 + $0x724] ss:$16 sps:$4 sm:$0xff]  }
 0x53f   :  { %3370 = vmatprep.subr.bf16.mxu1 %v4642_v11  ;;  %v4685_v11 = vld [vmem:[#allocation7 + $0x520] ss:$16 sps:$4 sm:$0xff]  }
 0x540   :  { %v4934_v24 = vpop.eup %4933 }
 0x541   :  { %v4936_v8 = vpop.eup %4935  ;;  %3330 = vmatpush1.bf16.msra.mxu0 %v4637_v53  ;;  %v1658_v13 = vadd.f32 1.0, %v4934_v24  ;;  %v4688_v53 = vld [vmem:[#allocation7 + $0x720] ss:$16 sps:$4 sm:$0xff]  }
 0x542   :  { %3371 = vmatpush1.bf16.msra.mxu1 %v4640_v57  ;;  %3331 = vmatprep.subr.bf16.mxu0 %v4645_v6  ;;  %v1660_v20 = vadd.f32 1.0, %v4936_v8  ;;  %v4938_v51 = vpop.eup %4937  ;;  %v4696_v6 = vld [vmem:[#allocation7 + $0x704] ss:$16 sps:$4 sm:$0xff]   ;;  %v4691_v24 = vld [vmem:[#allocation7 + $0x500] ss:$16 sps:$4 sm:$0xff]   ;;  %v1603_v8 = vmul.f32 0.5, %v5628_v44 }
 0x543   :  { %3372 = vmatprep.subr.bf16.mxu1 %v4648_v19  ;;  %v1666_v43 = vmul.f32 %v1658_v13, %v1602_v14  ;;  %v4940_v52 = vpop.eup %4939  ;;  %v1657_v57 = vadd.f32 1.0, %v4938_v51  ;;  %v1601_v19 = vmul.f32 0.5, %v5625_v39  ;;  %v4699_v13 = vld [vmem:[#allocation7 + $0xec] ss:$16 sps:$4 sm:$0xff]   ;;  %v4751_v51 = vld [vmem:[#allocation7 + $0x1c8] ss:$16 sps:$4 sm:$0xff]  }
 0x544   :  { %v1668_v47 = vmul.f32 %v1660_v20, %v1604_v10  ;;  %v1659_v58 = vadd.f32 1.0, %v4940_v52  ;;  %v4697_v10 = vld [vmem:[#allocation7 + $0xe8] ss:$16 sps:$4 sm:$0xff]   ;;  %v4708_v44 = vld [vmem:[#allocation7 + $0x2cc] ss:$16 sps:$4 sm:$0xff]  }
 0x545   :  { %3332 = vmatpush1.bf16.msra.mxu0 %v4643_v7  ;;  %v5638_v48 = vpack.c.bf16 %v1666_v43, %v1666_v43  ;;  %v4694_v7 = vld [vmem:[#allocation7 + $0x700] ss:$16 sps:$4 sm:$0xff]   ;;  %v1665_v14 = vmul.f32 %v1657_v57, %v1601_v19  ;;  %v4703_v43 = vld [vmem:[#allocation7 + $0xc8] ss:$16 sps:$4 sm:$0xff]   ;;  %v4759_v52 = vld [vmem:[#allocation7 + $0x1ac] ss:$16 sps:$4 sm:$0xff]  }
 0x546   :  { %3373 = vmatpush1.bf16.msra.mxu1 %v4646_v34  ;;  %v5641_v30 = vpack.c.bf16 %v1668_v47, %v1668_v47  ;;  %3333 = vmatprep.subr.bf16.mxu0 %v4651_v31  ;;  %v1667_v38 = vmul.f32 %v1659_v58, %v1603_v8  ;;  %v4702_v34 = vld [vmem:[#allocation7 + $0x2ec] ss:$16 sps:$4 sm:$0xff]   ;;  %v4700_v31 = vld [vmem:[#allocation7 + $0x2e8] ss:$16 sps:$4 sm:$0xff]  }
 0x547   :  { %3349 = vmatprep.mubr.bf16.mxu0 %v5638_v48  ;;  %3374 = vmatprep.subr.bf16.mxu1 %v4654_v45  ;;  %v5648_v20 = vpack.c.bf16 %v1665_v14, %v1665_v14  ;;  %v4706_v45 = vld [vmem:[#allocation7 + $0x2c8] ss:$16 sps:$4 sm:$0xff]   ;;  %v4711_v47 = vld [vmem:[#allocation7 + $0xac] ss:$16 sps:$4 sm:$0xff]  }
 0x548   :  { %3390 = vmatprep.mubr.bf16.mxu1 %v5641_v30  ;;  %v5650_v39 = vpack.c.bf16 %v1667_v38, %v1667_v38  ;;  %v4765_v57 = vld [vmem:[#allocation7 + $0x18c] ss:$16 sps:$4 sm:$0xff]   ;;  %v4763_v58 = vld [vmem:[#allocation7 + $0x188] ss:$16 sps:$4 sm:$0xff]  }
 0x549   :  { %3334 = vmatpush2.bf16.msra.mxu0 %v4649_v22  ;;  %v4714_v22 = vld [vmem:[#allocation7 + $0x2ac] ss:$16 sps:$4 sm:$0xff]   ;;  %v4766_v19 = vld [vmem:[#allocation7 + $0x388] ss:$16 sps:$4 sm:$0xff]  }
 0x54a   :  { %3375 = vmatpush2.bf16.msra.mxu1 %v4652_v36  ;;  %3335 = vmatprep.subr.bf16.mxu0 %v4657_v23  ;;  %v4712_v36 = vld [vmem:[#allocation7 + $0x2a8] ss:$16 sps:$4 sm:$0xff]   ;;  %v4717_v23 = vld [vmem:[#allocation7 + $0x8c] ss:$16 sps:$4 sm:$0xff]  }
 0x54b   :  { %3376 = vmatprep.subr.bf16.mxu1 %v4660_v37  ;;  %v4715_v37 = vld [vmem:[#allocation7 + $0x88] ss:$16 sps:$4 sm:$0xff]   ;;  %v4774_v8 = vld [vmem:[#allocation7 + $0x36c] ss:$16 sps:$4 sm:$0xff]  }
 0x54c   :  { %v4772_v14 = vld [vmem:[#allocation7 + $0x368] ss:$16 sps:$4 sm:$0xff]   ;;  %v4780_v38 = vld [vmem:[#allocation7 + $0x34c] ss:$16 sps:$4 sm:$0xff]  }
 0x54d   :  { %3336 = vmatpush2.bf16.msra.mxu0 %v4655_v41  ;;  %v4723_v41 = vld [vmem:[#allocation7 + $0x6c] ss:$16 sps:$4 sm:$0xff]  }
 0x54e   :  { %3377 = vmatpush2.bf16.msra.mxu1 %v4658_v1  ;;  %3337 = vmatprep.subr.bf16.mxu0 %v4663_v54  ;;  %v4724_v1 = vld [vmem:[#allocation7 + $0x268] ss:$16 sps:$4 sm:$0xff]   ;;  %v4729_v54 = vld [vmem:[#allocation7 + $0x4c] ss:$16 sps:$4 sm:$0xff]  }
 0x54f   :  { %3378 = vmatprep.subr.bf16.mxu1 %v4666_v12  ;;  %v4727_v12 = vld [vmem:[#allocation7 + $0x48] ss:$16 sps:$4 sm:$0xff]  }
 0x551   :  { %3338 = vmatpush2.bf16.msra.mxu0 %v4661_v55  ;;  %v4730_v55 = vld [vmem:[#allocation7 + $0x248] ss:$16 sps:$4 sm:$0xff]  }
 0x552   :  { %3379 = vmatpush2.bf16.msra.mxu1 %v4664_v3  ;;  %3339 = vmatprep.subr.bf16.mxu0 %v4669_v4  ;;  %v4735_v3 = vld [vmem:[#allocation7 + $0x2c] ss:$16 sps:$4 sm:$0xff]  }
 0x553   :  { %3380 = vmatprep.subr.bf16.mxu1 %v4672_v5  ;;  %v4738_v4 = vld [vmem:[#allocation7 + $0x22c] ss:$16 sps:$4 sm:$0xff]   ;;  %v4733_v5 = vld [vmem:[#allocation7 + $0x28] ss:$16 sps:$4 sm:$0xff]  }
 0x555   :  { %3340 = vmatpush2.bf16.msra.mxu0 %v4667_v15  ;;  %v4736_v15 = vld [vmem:[#allocation7 + $0x228] ss:$16 sps:$4 sm:$0xff]  }
 0x556   :  { %3381 = vmatpush2.bf16.msra.mxu1 %v4670_v16  ;;  %3341 = vmatprep.subr.bf16.mxu0 %v4675_v25  ;;  %v4741_v16 = vld [vmem:[#allocation7 + $0xc] ss:$16 sps:$4 sm:$0xff]  }
 0x557   :  { %3382 = vmatprep.subr.bf16.mxu1 %v4678_v32  ;;  %v4744_v25 = vld [vmem:[#allocation7 + $0x20c] ss:$16 sps:$4 sm:$0xff]   ;;  %v4739_v32 = vld [vmem:[#allocation7 + $0x8] ss:$16 sps:$4 sm:$0xff]  }
 0x559   :  { %3342 = vmatpush2.bf16.msra.mxu0 %v4673_v29  ;;  %v4742_v29 = vld [vmem:[#allocation7 + $0x208] ss:$16 sps:$4 sm:$0xff]  }
 0x55a   :  { %3383 = vmatpush2.bf16.msra.mxu1 %v4676_v26  ;;  %3343 = vmatprep.subr.bf16.mxu0 %v4681_v63  ;;  %v4747_v26 = vld [vmem:[#allocation7 + $0x1ec] ss:$16 sps:$4 sm:$0xff]  }
 0x55b   :  { %3384 = vmatprep.subr.bf16.mxu1 %v4684_v42  ;;  %v4750_v63 = vld [vmem:[#allocation7 + $0x3ec] ss:$16 sps:$4 sm:$0xff]   ;;  %v4745_v42 = vld [vmem:[#allocation7 + $0x1e8] ss:$16 sps:$4 sm:$0xff]  }
 0x55d   :  { %3344 = vmatpush2.bf16.msra.mxu0 %v4679_v49  ;;  %v4748_v49 = vld [vmem:[#allocation7 + $0x3e8] ss:$16 sps:$4 sm:$0xff]  }
 0x55e   :  { %3385 = vmatpush2.bf16.msra.mxu1 %v4682_v61  ;;  %3345 = vmatprep.subr.bf16.mxu0 %v4687_v50  ;;  %v4753_v61 = vld [vmem:[#allocation7 + $0x1cc] ss:$16 sps:$4 sm:$0xff]  }
 0x55f   :  { %3386 = vmatprep.subr.bf16.mxu1 %v4690_v28  ;;  %v4756_v50 = vld [vmem:[#allocation7 + $0x3cc] ss:$16 sps:$4 sm:$0xff]   ;;  %v4754_v28 = vld [vmem:[#allocation7 + $0x3c8] ss:$16 sps:$4 sm:$0xff]  }
 0x561   :  { %3346 = vmatpush2.bf16.msra.mxu0 %v4685_v11  ;;  %v4762_v11 = vld [vmem:[#allocation7 + $0x3ac] ss:$16 sps:$4 sm:$0xff]  }
 0x562   :  { %3387 = vmatpush2.bf16.msra.mxu1 %v4688_v53  ;;  %3347 = vmatprep.subr.bf16.mxu0 %v4693_v56  ;;  %v4757_v53 = vld [vmem:[#allocation7 + $0x1a8] ss:$16 sps:$4 sm:$0xff]  }
 0x563   :  { %3388 = vmatprep.subr.bf16.mxu1 %v4696_v6  ;;  %v4760_v56 = vld [vmem:[#allocation7 + $0x3a8] ss:$16 sps:$4 sm:$0xff]   ;;  %v4768_v6 = vld [vmem:[#allocation7 + $0x38c] ss:$16 sps:$4 sm:$0xff]  }
 0x565   :  { %3348 = vmatpush2.bf16.msra.mxu0 %v4691_v24  ;;  %v4771_v24 = vld [vmem:[#allocation7 + $0x16c] ss:$16 sps:$4 sm:$0xff]  }
 0x566   :  { %3389 = vmatpush2.bf16.msra.mxu1 %v4694_v7  ;;  %3399 = vmatprep.subr.bf16.mxu0 %v4699_v13  ;;  %v4769_v7 = vld [vmem:[#allocation7 + $0x168] ss:$16 sps:$4 sm:$0xff]   ;;  %v4777_v13 = vld [vmem:[#allocation7 + $0x14c] ss:$16 sps:$4 sm:$0xff]  }
 0x567   :  { %3440 = vmatprep.subr.bf16.mxu1 %v4702_v34  ;;  %v4775_v34 = vld [vmem:[#allocation7 + $0x148] ss:$16 sps:$4 sm:$0xff]  }
 0x568   :  { %3350 = vmatmul.mubr.bf16.vlgmr.msra.gmra.mxu0 %v5648_v20 }
 0x569   :  { %3391 = vmatmul.mubr.bf16.vlgmr.msra.gmra.mxu1 %v5650_v39  ;;  %3400 = vmatpush1.bf16.msra.mxu0 %v4697_v10  ;;  %v4778_v10 = vld [vmem:[#allocation7 + $0x348] ss:$16 sps:$4 sm:$0xff]  }
 0x56a   :  { %3431 = vmatprep.mubr.bf16.mxu0 %v5596_v18  ;;  %3441 = vmatpush1.bf16.msra.mxu1 %v4700_v31  ;;  %v4718_v18 = vld [vmem:[#allocation7 + $0x288] ss:$16 sps:$4 sm:$0xff]   ;;  %v4783_v31 = vld [vmem:[#allocation7 + $0x12c] ss:$16 sps:$4 sm:$0xff]  }
 0x56b   :  { %3472 = vmatprep.mubr.bf16.mxu1 %v5598_v9  ;;  %3401 = vmatprep.subr.bf16.mxu0 %v4705_v35  ;;  %v4721_v9 = vld [vmem:[#allocation7 + $0x68] ss:$16 sps:$4 sm:$0xff]   ;;  %v4786_v35 = vld [vmem:[#allocation7 + $0x32c] ss:$16 sps:$4 sm:$0xff]  }
 0x56c   :  { %3442 = vmatprep.subr.bf16.mxu1 %v4708_v44  ;;  %v4781_v44 = vld [vmem:[#allocation7 + $0x128] ss:$16 sps:$4 sm:$0xff]  }
 0x56d   :  { %3402 = vmatpush1.bf16.msra.mxu0 %v4703_v43  ;;  %v4784_v43 = vld [vmem:[#allocation7 + $0x328] ss:$16 sps:$4 sm:$0xff]  }
 0x56e   :  { %3443 = vmatpush1.bf16.msra.mxu1 %v4706_v45  ;;  %3403 = vmatprep.subr.bf16.mxu0 %v4711_v47  ;;  %v4789_v45 = vld [vmem:[#allocation7 + $0x10c] ss:$16 sps:$4 sm:$0xff]  }
 0x56f   :  { %3444 = vmatprep.subr.bf16.mxu1 %v4714_v22  ;;  %v4792_v47 = vld [vmem:[#allocation7 + $0x30c] ss:$16 sps:$4 sm:$0xff]   ;;  %v4787_v22 = vld [vmem:[#allocation7 + $0x108] ss:$16 sps:$4 sm:$0xff]  }
 0x571   :  { %3404 = vmatpush1.bf16.msra.mxu0 %v4709_v33  ;;  %v4790_v33 = vld [vmem:[#allocation7 + $0x308] ss:$16 sps:$4 sm:$0xff]  }
 0x572   :  { %3445 = vmatpush1.bf16.msra.mxu1 %v4712_v36  ;;  %3405 = vmatprep.subr.bf16.mxu0 %v4717_v23  ;;  %v4795_v36 = vld [vmem:[#allocation7 + $0x4ec] ss:$16 sps:$4 sm:$0xff]  }
 0x573   :  { %3446 = vmatprep.subr.bf16.mxu1 %v4720_v46  ;;  %v4798_v23 = vld [vmem:[#allocation7 + $0x6ec] ss:$16 sps:$4 sm:$0xff]   ;;  %v4793_v46 = vld [vmem:[#allocation7 + $0x4e8] ss:$16 sps:$4 sm:$0xff]  }
 0x575   :  { %3406 = vmatpush1.bf16.msra.mxu0 %v4715_v37  ;;  %v4796_v37 = vld [vmem:[#allocation7 + $0x6e8] ss:$16 sps:$4 sm:$0xff]  }
 0x576   :  { %3447 = vmatpush1.bf16.msra.mxu1 %v4718_v18  ;;  %3407 = vmatprep.subr.bf16.mxu0 %v4723_v41  ;;  %v4801_v18 = vld [vmem:[#allocation7 + $0x4cc] ss:$16 sps:$4 sm:$0xff]  }
 0x577   :  { %3448 = vmatprep.subr.bf16.mxu1 %v4726_v40  ;;  %v4804_v41 = vld [vmem:[#allocation7 + $0x6cc] ss:$16 sps:$4 sm:$0xff]   ;;  %v4799_v40 = vld [vmem:[#allocation7 + $0x4c8] ss:$16 sps:$4 sm:$0xff]  }
 0x579   :  { %3408 = vmatpush1.bf16.msra.mxu0 %v4721_v9  ;;  %v4802_v9 = vld [vmem:[#allocation7 + $0x6c8] ss:$16 sps:$4 sm:$0xff]  }
 0x57a   :  { %3449 = vmatpush1.bf16.msra.mxu1 %v4724_v1  ;;  %3409 = vmatprep.subr.bf16.mxu0 %v4729_v54  ;;  %v4807_v1 = vld [vmem:[#allocation7 + $0x4ac] ss:$16 sps:$4 sm:$0xff]  }
 0x57b   :  { %3450 = vmatprep.subr.bf16.mxu1 %v4732_v2  ;;  %v4810_v54 = vld [vmem:[#allocation7 + $0x6ac] ss:$16 sps:$4 sm:$0xff]   ;;  %v4805_v2 = vld [vmem:[#allocation7 + $0x4a8] ss:$16 sps:$4 sm:$0xff]  }
 0x57d   :  { %3410 = vmatpush1.bf16.msra.mxu0 %v4727_v12  ;;  %v4813_v12 = vld [vmem:[#allocation7 + $0x48c] ss:$16 sps:$4 sm:$0xff]  }
 0x57e   :  { %3451 = vmatpush1.bf16.msra.mxu1 %v4730_v55  ;;  %3411 = vmatprep.subr.bf16.mxu0 %v4735_v3  ;;  %v4811_v55 = vld [vmem:[#allocation7 + $0x488] ss:$16 sps:$4 sm:$0xff]   ;;  %v4819_v3 = vld [vmem:[#allocation7 + $0x46c] ss:$16 sps:$4 sm:$0xff]  }
 0x57f   :  { %3452 = vmatprep.subr.bf16.mxu1 %v4738_v4  ;;  %v4822_v4 = vld [vmem:[#allocation7 + $0x66c] ss:$16 sps:$4 sm:$0xff]  }
 0x581   :  { %3412 = vmatpush1.bf16.msra.mxu0 %v4733_v5  ;;  %v4820_v5 = vld [vmem:[#allocation7 + $0x668] ss:$16 sps:$4 sm:$0xff]  }
 0x582   :  { %3453 = vmatpush1.bf16.msra.mxu1 %v4736_v15  ;;  %3413 = vmatprep.subr.bf16.mxu0 %v4741_v16  ;;  %v4825_v15 = vld [vmem:[#allocation7 + $0x44c] ss:$16 sps:$4 sm:$0xff]  }
 0x583   :  { %3454 = vmatprep.subr.bf16.mxu1 %v4744_v25  ;;  %v4828_v16 = vld [vmem:[#allocation7 + $0x64c] ss:$16 sps:$4 sm:$0xff]   ;;  %v4823_v25 = vld [vmem:[#allocation7 + $0x448] ss:$16 sps:$4 sm:$0xff]  }
 0x585   :  { %3414 = vmatpush1.bf16.msra.mxu0 %v4739_v32  ;;  %v4826_v32 = vld [vmem:[#allocation7 + $0x648] ss:$16 sps:$4 sm:$0xff]  }
 0x586   :  { %3455 = vmatpush1.bf16.msra.mxu1 %v4742_v29  ;;  %3415 = vmatprep.subr.bf16.mxu0 %v4747_v26  ;;  %v4831_v29 = vld [vmem:[#allocation7 + $0x42c] ss:$16 sps:$4 sm:$0xff]  }
 0x587   :  { %3456 = vmatprep.subr.bf16.mxu1 %v4750_v63  ;;  %v4834_v26 = vld [vmem:[#allocation7 + $0x62c] ss:$16 sps:$4 sm:$0xff]   ;;  %v4829_v63 = vld [vmem:[#allocation7 + $0x428] ss:$16 sps:$4 sm:$0xff]  }
 0x589   :  { %3416 = vmatpush2.bf16.msra.mxu0 %v4745_v42  ;;  %v4832_v42 = vld [vmem:[#allocation7 + $0x628] ss:$16 sps:$4 sm:$0xff]  }
 0x58a   :  { %3457 = vmatpush2.bf16.msra.mxu1 %v4748_v49  ;;  %3417 = vmatprep.subr.bf16.mxu0 %v4753_v61  ;;  %v4837_v49 = vld [vmem:[#allocation7 + $0x40c] ss:$16 sps:$4 sm:$0xff]  }
 0x58b   :  { %3458 = vmatprep.subr.bf16.mxu1 %v4756_v50  ;;  %v4840_v61 = vld [vmem:[#allocation7 + $0x60c] ss:$16 sps:$4 sm:$0xff]   ;;  %v4835_v50 = vld [vmem:[#allocation7 + $0x408] ss:$16 sps:$4 sm:$0xff]  }
 0x58d   :  { %3418 = vmatpush2.bf16.msra.mxu0 %v4751_v51  ;;  %v4838_v51 = vld [vmem:[#allocation7 + $0x608] ss:$16 sps:$4 sm:$0xff]  }
 0x58e   :  { %3459 = vmatpush2.bf16.msra.mxu1 %v4754_v28  ;;  %3419 = vmatprep.subr.bf16.mxu0 %v4759_v52  ;;  %v4843_v28 = vld [vmem:[#allocation7 + $0x5ec] ss:$16 sps:$4 sm:$0xff]  }
 0x58f   :  { %3460 = vmatprep.subr.bf16.mxu1 %v4762_v11  ;;  %v4846_v52 = vld [vmem:[#allocation7 + $0x7ec] ss:$16 sps:$4 sm:$0xff]   ;;  %v4841_v11 = vld [vmem:[#allocation7 + $0x5e8] ss:$16 sps:$4 sm:$0xff]  }
 0x591   :  { %3420 = vmatpush2.bf16.msra.mxu0 %v4757_v53  ;;  %v4844_v53 = vld [vmem:[#allocation7 + $0x7e8] ss:$16 sps:$4 sm:$0xff]  }
 0x592   :  { %3461 = vmatpush2.bf16.msra.mxu1 %v4760_v56  ;;  %3421 = vmatprep.subr.bf16.mxu0 %v4765_v57  ;;  %v4849_v56 = vld [vmem:[#allocation7 + $0x5cc] ss:$16 sps:$4 sm:$0xff]  }
 0x593   :  { %3462 = vmatprep.subr.bf16.mxu1 %v4768_v6  ;;  %v4852_v57 = vld [vmem:[#allocation7 + $0x7cc] ss:$16 sps:$4 sm:$0xff]   ;;  %v4847_v6 = vld [vmem:[#allocation7 + $0x5c8] ss:$16 sps:$4 sm:$0xff]  }
 0x595   :  { %3422 = vmatpush2.bf16.msra.mxu0 %v4763_v58  ;;  %v4850_v58 = vld [vmem:[#allocation7 + $0x7c8] ss:$16 sps:$4 sm:$0xff]  }
 0x596   :  { %3463 = vmatpush2.bf16.msra.mxu1 %v4766_v19  ;;  %3423 = vmatprep.subr.bf16.mxu0 %v4771_v24  ;;  %v4855_v19 = vld [vmem:[#allocation7 + $0x5ac] ss:$16 sps:$4 sm:$0xff]  }
 0x597   :  { %3464 = vmatprep.subr.bf16.mxu1 %v4774_v8  ;;  %v4858_v24 = vld [vmem:[#allocation7 + $0x7ac] ss:$16 sps:$4 sm:$0xff]   ;;  %v4853_v8 = vld [vmem:[#allocation7 + $0x5a8] ss:$16 sps:$4 sm:$0xff]  }
 0x599   :  { %3424 = vmatpush2.bf16.msra.mxu0 %v4769_v7  ;;  %v4856_v7 = vld [vmem:[#allocation7 + $0x7a8] ss:$16 sps:$4 sm:$0xff]  }
 0x59a   :  { %3465 = vmatpush2.bf16.msra.mxu1 %v4772_v14  ;;  %3425 = vmatprep.subr.bf16.mxu0 %v4777_v13  ;;  %v4861_v14 = vld [vmem:[#allocation7 + $0x58c] ss:$16 sps:$4 sm:$0xff]  }
 0x59b   :  { %3466 = vmatprep.subr.bf16.mxu1 %v4780_v38  ;;  %v4864_v13 = vld [vmem:[#allocation7 + $0x78c] ss:$16 sps:$4 sm:$0xff]   ;;  %v4859_v38 = vld [vmem:[#allocation7 + $0x588] ss:$16 sps:$4 sm:$0xff]  }
 0x59d   :  { %3426 = vmatpush2.bf16.msra.mxu0 %v4775_v34  ;;  %v4862_v34 = vld [vmem:[#allocation7 + $0x788] ss:$16 sps:$4 sm:$0xff]  }
 0x59e   :  { %3467 = vmatpush2.bf16.msra.mxu1 %v4778_v10  ;;  %3427 = vmatprep.subr.bf16.mxu0 %v4783_v31  ;;  %v4867_v10 = vld [vmem:[#allocation7 + $0x56c] ss:$16 sps:$4 sm:$0xff]  }
 0x59f   :  { %3468 = vmatprep.subr.bf16.mxu1 %v4786_v35  ;;  %v4870_v31 = vld [vmem:[#allocation7 + $0x76c] ss:$16 sps:$4 sm:$0xff]   ;;  %v4865_v35 = vld [vmem:[#allocation7 + $0x568] ss:$16 sps:$4 sm:$0xff]  }
 0x5a1   :  { %3428 = vmatpush2.bf16.msra.mxu0 %v4781_v44  ;;  %v4868_v44 = vld [vmem:[#allocation7 + $0x768] ss:$16 sps:$4 sm:$0xff]  }
 0x5a2   :  { %3469 = vmatpush2.bf16.msra.mxu1 %v4784_v43  ;;  %3429 = vmatprep.subr.bf16.mxu0 %v4789_v45  ;;  %v4873_v43 = vld [vmem:[#allocation7 + $0x54c] ss:$16 sps:$4 sm:$0xff]  }
 0x5a3   :  { %3470 = vmatprep.subr.bf16.mxu1 %v4792_v47  ;;  %v4876_v45 = vld [vmem:[#allocation7 + $0x74c] ss:$16 sps:$4 sm:$0xff]   ;;  %v4871_v47 = vld [vmem:[#allocation7 + $0x548] ss:$16 sps:$4 sm:$0xff]  }
 0x5a5   :  { %3430 = vmatpush2.bf16.msra.mxu0 %v4787_v22  ;;  %v4874_v22 = vld [vmem:[#allocation7 + $0x748] ss:$16 sps:$4 sm:$0xff]  }
 0x5a6   :  { %3471 = vmatpush2.bf16.msra.mxu1 %v4790_v33  ;;  %3481 = vmatprep.subr.bf16.mxu0 %v4795_v36  ;;  %v4879_v33 = vld [vmem:[#allocation7 + $0x52c] ss:$16 sps:$4 sm:$0xff]  }
 0x5a7   :  { %3522 = vmatprep.subr.bf16.mxu1 %v4798_v23  ;;  %v4882_v36 = vld [vmem:[#allocation7 + $0x72c] ss:$16 sps:$4 sm:$0xff]   ;;  %v4877_v23 = vld [vmem:[#allocation7 + $0x528] ss:$16 sps:$4 sm:$0xff]  }
 0x5a8   :  { %3432 = vmatmul.mubr.bf16.vlgmr.msra.gmra.mxu0 %v5600_v27  ;;  %v4808_v27 = vld [vmem:[#allocation7 + $0x6a8] ss:$16 sps:$4 sm:$0xff]  }
 0x5a9   :  { %3473 = vmatmul.mubr.bf16.vlgmr.msra.gmra.mxu1 %v5607_v21  ;;  %3482 = vmatpush1.bf16.msra.mxu0 %v4793_v46  ;;  %v4816_v21 = vld [vmem:[#allocation7 + $0x68c] ss:$16 sps:$4 sm:$0xff]   ;;  %v4880_v46 = vld [vmem:[#allocation7 + $0x728] ss:$16 sps:$4 sm:$0xff]  }
 0x5aa   :  { %3513 = vmatprep.mubr.bf16.mxu0 %v5638_v48  ;;  %3523 = vmatpush1.bf16.msra.mxu1 %v4796_v37  ;;  %v4814_v48 = vld [vmem:[#allocation7 + $0x688] ss:$16 sps:$4 sm:$0xff]   ;;  %v4885_v37 = vld [vmem:[#allocation7 + $0x50c] ss:$16 sps:$4 sm:$0xff]  }
 0x5ab   :  { %3554 = vmatprep.mubr.bf16.mxu1 %v5641_v30  ;;  %3483 = vmatprep.subr.bf16.mxu0 %v4801_v18  ;;  %v4817_v30 = vld [vmem:[#allocation7 + $0x468] ss:$16 sps:$4 sm:$0xff]   ;;  %v4888_v18 = vld [vmem:[#allocation7 + $0x70c] ss:$16 sps:$4 sm:$0xff]  }
 0x5ac   :  { %3524 = vmatprep.subr.bf16.mxu1 %v4804_v41  ;;  %v4883_v41 = vld [vmem:[#allocation7 + $0x508] ss:$16 sps:$4 sm:$0xff]  }
 0x5ad   :  { %3484 = vmatpush1.bf16.msra.mxu0 %v4799_v40  ;;  %v4886_v40 = vld [vmem:[#allocation7 + $0x708] ss:$16 sps:$4 sm:$0xff]  }
 0x5ae   :  { %3525 = vmatpush1.bf16.msra.mxu1 %v4802_v9  ;;  %3485 = vmatprep.subr.bf16.mxu0 %v4807_v1  ;;  %v3630_v9 = vld [vmem:[#allocation8 + $0xf8] sm:$0xff] }
 0x5af   :  { %3526 = vmatprep.subr.bf16.mxu1 %v4810_v54  ;;  %v3614_v1 = vld [vmem:[#allocation8 + $0x78] sm:$0xff]  ;;  %v3629_v54 = vld [vmem:[#allocation8 + $0xf0] sm:$0xff] }
 0x5b1   :  { %3486 = vmatpush1.bf16.msra.mxu0 %v4805_v2 }
 0x5b2   :  { %3527 = vmatpush1.bf16.msra.mxu1 %v4808_v27  ;;  %3487 = vmatprep.subr.bf16.mxu0 %v4813_v12  ;;  %v3613_v27 = vld [vmem:[#allocation8 + $0x70] sm:$0xff] }
 0x5b3   :  { %3528 = vmatprep.subr.bf16.mxu1 %v4816_v21  ;;  %v3628_v21 = vld [vmem:[#allocation8 + $0xe8] sm:$0xff] }
 0x5b5   :  { %3488 = vmatpush1.bf16.msra.mxu0 %v4811_v55 }
 0x5b6   :  { %3529 = vmatpush1.bf16.msra.mxu1 %v4814_v48  ;;  %3489 = vmatprep.subr.bf16.mxu0 %v4819_v3  ;;  %v3612_v48 = vld [vmem:[#allocation8 + $0x68] sm:$0xff] }
 0x5b7   :  { %3530 = vmatprep.subr.bf16.mxu1 %v4822_v4  ;;  %v3627_v4 = vld [vmem:[#allocation8 + $0xe0] sm:$0xff] }
 0x5b9   :  { %3490 = vmatpush1.bf16.msra.mxu0 %v4817_v30 }
 0x5ba   :  { %3531 = vmatpush1.bf16.msra.mxu1 %v4820_v5  ;;  %3491 = vmatprep.subr.bf16.mxu0 %v4825_v15  ;;  %v3626_v15 = vld [vmem:[#allocation8 + $0xd8] sm:$0xff] }
 0x5bb   :  { %3532 = vmatprep.subr.bf16.mxu1 %v4828_v16 }
 0x5bd   :  { %3492 = vmatpush1.bf16.msra.mxu0 %v4823_v25 }
 0x5be   :  { %3533 = vmatpush1.bf16.msra.mxu1 %v4826_v32  ;;  %3493 = vmatprep.subr.bf16.mxu0 %v4831_v29  ;;  %v3625_v32 = vld [vmem:[#allocation8 + $0xd0] sm:$0xff] }
 0x5bf   :  { %3534 = vmatprep.subr.bf16.mxu1 %v4834_v26  ;;  %v3609_v29 = vld [vmem:[#allocation8 + $0x50] sm:$0xff]  ;;  %v3624_v26 = vld [vmem:[#allocation8 + $0xc8] sm:$0xff] }
 0x5c1   :  { %3494 = vmatpush1.bf16.msra.mxu0 %v4829_v63  ;;  %v3608_v63 = vld [vmem:[#allocation8 + $0x48] sm:$0xff] }
 0x5c2   :  { %3535 = vmatpush1.bf16.msra.mxu1 %v4832_v42  ;;  %3495 = vmatprep.subr.bf16.mxu0 %v4837_v49  ;;  %v3623_v42 = vld [vmem:[#allocation8 + $0xc0] sm:$0xff] }
 0x5c3   :  { %3536 = vmatprep.subr.bf16.mxu1 %v4840_v61  ;;  %v3607_v49 = vld [vmem:[#allocation8 + $0x40] sm:$0xff]  ;;  %v3622_v61 = vld [vmem:[#allocation8 + $0xb8] sm:$0xff] }
 0x5c5   :  { %3496 = vmatpush1.bf16.msra.mxu0 %v4835_v50  ;;  %v3606_v50 = vld [vmem:[#allocation8 + $0x38] sm:$0xff] }
 0x5c6   :  { %3537 = vmatpush1.bf16.msra.mxu1 %v4838_v51  ;;  %3497 = vmatprep.subr.bf16.mxu0 %v4843_v28  ;;  %v3621_v51 = vld [vmem:[#allocation8 + $0xb0] sm:$0xff] }
 0x5c7   :  { %3538 = vmatprep.subr.bf16.mxu1 %v4846_v52  ;;  %v3605_v28 = vld [vmem:[#allocation8 + $0x30] sm:$0xff]  ;;  %v3620_v52 = vld [vmem:[#allocation8 + $0xa8] sm:$0xff] }
 0x5c9   :  { %3498 = vmatpush2.bf16.msra.mxu0 %v4841_v11  ;;  %v3604_v11 = vld [vmem:[#allocation8 + $0x28] sm:$0xff] }
 0x5ca   :  { %3539 = vmatpush2.bf16.msra.mxu1 %v4844_v53  ;;  %3499 = vmatprep.subr.bf16.mxu0 %v4849_v56  ;;  %v3619_v53 = vld [vmem:[#allocation8 + $0xa0] sm:$0xff] }
 0x5cb   :  { %3540 = vmatprep.subr.bf16.mxu1 %v4852_v57  ;;  %v3603_v56 = vld [vmem:[#allocation8 + $0x20] sm:$0xff]  ;;  %v3618_v57 = vld [vmem:[#allocation8 + $0x98] sm:$0xff] }
 0x5cd   :  { %3500 = vmatpush2.bf16.msra.mxu0 %v4847_v6  ;;  %v3602_v6 = vld [vmem:[#allocation8 + $0x18] sm:$0xff] }
 0x5ce   :  { %3541 = vmatpush2.bf16.msra.mxu1 %v4850_v58  ;;  %3501 = vmatprep.subr.bf16.mxu0 %v4855_v19  ;;  %v3617_v58 = vld [vmem:[#allocation8 + $0x90] sm:$0xff] }
 0x5cf   :  { %3542 = vmatprep.subr.bf16.mxu1 %v4858_v24  ;;  %v3601_v19 = vld [vmem:[#allocation8 + $0x10] sm:$0xff]  ;;  %v3616_v24 = vld [vmem:[#allocation8 + $0x88] sm:$0xff] }
 0x5d1   :  { %3502 = vmatpush2.bf16.msra.mxu0 %v4853_v8  ;;  %v3600_v8 = vld [vmem:[#allocation8 + $0x8] sm:$0xff] }
 0x5d2   :  { %3543 = vmatpush2.bf16.msra.mxu1 %v4856_v7  ;;  %3503 = vmatprep.subr.bf16.mxu0 %v4861_v14  ;;  %v3615_v7 = vld [vmem:[#allocation8 + $0x80] sm:$0xff] }
 0x5d3   :  { %3544 = vmatprep.subr.bf16.mxu1 %v4864_v13  ;;  %v3599_v14 = vld [vmem:[#allocation8] sm:$0xff] }
 0x5d4   :  { %v5673_v13 = vld [vmem:[%s5717_s7] sm:$0xf] }
 0x5d5   :  { %3504 = vmatpush2.bf16.msra.mxu0 %v4859_v38  ;;  %v1938_v38 = vrot.slane %v5673_v13, %v5420_v0 }
 0x5d6   :  { %3545 = vmatpush2.bf16.msra.mxu1 %v4862_v34  ;;  %3505 = vmatprep.subr.bf16.mxu0 %v4867_v10  ;;  %v1942_v34 = vrot.slane %v5673_v13, %v1079_v60 }
 0x5d7   :  { %3546 = vmatprep.subr.bf16.mxu1 %v4870_v31 }
 0x5d9   :  { %3506 = vmatpush2.bf16.msra.mxu0 %v4865_v35 }
 0x5da   :  { %3547 = vmatpush2.bf16.msra.mxu1 %v4868_v44  ;;  %3507 = vmatprep.subr.bf16.mxu0 %v4873_v43 }
 0x5db   :  { %3548 = vmatprep.subr.bf16.mxu1 %v4876_v45 }
 0x5dd   :  { %3508 = vmatpush2.bf16.msra.mxu0 %v4871_v47 }
 0x5de   :  { %3549 = vmatpush2.bf16.msra.mxu1 %v4874_v22  ;;  %3509 = vmatprep.subr.bf16.mxu0 %v4879_v33 }
 0x5df   :  { %3550 = vmatprep.subr.bf16.mxu1 %v4882_v36 }
 0x5e1   :  { %3510 = vmatpush2.bf16.msra.mxu0 %v4877_v23 }
 0x5e2   :  { %3551 = vmatpush2.bf16.msra.mxu1 %v4880_v46  ;;  %3511 = vmatprep.subr.bf16.mxu0 %v4885_v37 }
 0x5e3   :  { %3552 = vmatprep.subr.bf16.mxu1 %v4888_v18  ;;  %v3662_v18 = vld [vmem:[#allocation8 + $0x1f8] sm:$0xff] }
 0x5e5   :  { %3512 = vmatpush2.bf16.msra.mxu0 %v4883_v41 }
 0x5e6   :  { %3553 = vmatpush2.bf16.msra.mxu1 %v4886_v40  ;;  %4247 = vmatprep.subr.mxu0 %v3630_v9  ;;  %v3646_v40 = vld [vmem:[#allocation8 + $0x178] sm:$0xff] }
 0x5e7   :  { %4282 = vmatprep.subr.mxu1 %v3662_v18  ;;  %v1950_v18 = vrot.slane %v5673_v13, %v1087_v17 }
 0x5e8   :  { %3514 = vmatmul.mubr.bf16.vlgmr.msra.gmra.mxu0 %v5648_v20  ;;  %v5661_v2 = vpop.f32.mrf.mxu0  ;;  %v3611_v20 = vld [vmem:[#allocation8 + $0x60] sm:$0xff] }
 0x5e9   :  { %3555 = vmatmul.mubr.bf16.vlgmr.msra.gmra.mxu1 %v5650_v39  ;;  %v5664_v12 = vpop.f32.mrf.mxu1  ;;  %4248 = vmatpush3.msra.mxu0 %v3614_v1  ;;  %v3610_v39 = vld [vmem:[#allocation8 + $0x58] sm:$0xff]  ;;  %v3270_v10 = vadd.f32 %v5661_v2, %v1938_v38  ;;  %v3661_v2 = vld [vmem:[#allocation8 + $0x1f0] sm:$0xff] }
 0x5ea   :  { %v5666_v55 = vpop.f32.mrf.mxu0  ;;  %4249 = vmatprep.subr.mxu0 %v3629_v54  ;;  %4283 = vmatpush3.msra.mxu1 %v3646_v40 }
 0x5eb   :  { %v5668_v3 = vpop.f32.mrf.mxu1  ;;  %4250 = vmatpush3.msra.mxu0 %v3613_v27  ;;  %v3272_v31 = vadd.f32 %v5666_v55, %v1942_v34  ;;  %v3311_v35 = vadd.f32 %v5664_v12, %v3270_v10  ;;  %4284 = vmatprep.subr.mxu1 %v3661_v2  ;;  %v3645_v27 = vld [vmem:[#allocation8 + $0x170] sm:$0xff]  ;;  %v3660_v55 = vld [vmem:[#allocation8 + $0x1e8] sm:$0xff] }
 0x5ec   :  { %v3273_v30 = vpop.f32.mrf.mxu0  ;;  %4251 = vmatprep.subr.mxu0 %v3628_v21  ;;  %4285 = vmatpush3.msra.mxu1 %v3645_v27  ;;  %v3648_v34 = vld [vmem:[#allocation8 + $0x188] sm:$0xff] }
 0x5ed   :  { %v3314_v5 = vpop.f32.mrf.mxu1  ;;  %4252 = vmatpush3.msra.mxu0 %v3612_v48  ;;  %v3313_v43 = vadd.f32 %v5668_v3, %v3272_v31  ;;  %4286 = vmatprep.subr.mxu1 %v3660_v55  ;;  %v3644_v48 = vld [vmem:[#allocation8 + $0x168] sm:$0xff]  ;;  %v3659_v30 = vld [vmem:[#allocation8 + $0x1e0] sm:$0xff] }
 0x5ee   :  { %v3274_v16 = vpop.f32.mrf.mxu0  ;;  %4253 = vmatprep.subr.mxu0 %v3627_v4  ;;  %4287 = vmatpush3.msra.mxu1 %v3644_v48  ;;  %v3658_v5 = vld [vmem:[#allocation8 + $0x1d8] sm:$0xff]  ;;  %v3632_v31 = vld [vmem:[#allocation8 + $0x108] sm:$0xff] }
 0x5ef   :  { %v3315_v25 = vpop.f32.mrf.mxu1  ;;  %4254 = vmatpush3.msra.mxu0 %v3611_v20  ;;  %v3643_v20 = vld [vmem:[#allocation8 + $0x160] sm:$0xff]  ;;  %4288 = vmatprep.subr.mxu1 %v3659_v30 }
 0x5f0   :  { %4255 = vmatprep.subr.mxu0 %v3626_v15  ;;  %v3642_v15 = vld [vmem:[#allocation8 + $0x158] sm:$0xff]  ;;  %4289 = vmatpush3.msra.mxu1 %v3643_v20  ;;  %v3657_v25 = vld [vmem:[#allocation8 + $0x1d0] sm:$0xff] }
 0x5f1   :  { %4256 = vmatpush3.msra.mxu0 %v3610_v39  ;;  %4290 = vmatprep.subr.mxu1 %v3658_v5 }
 0x5f2   :  { %4257 = vmatprep.subr.mxu0 %v3625_v32  ;;  %v3641_v32 = vld [vmem:[#allocation8 + $0x150] sm:$0xff]  ;;  %4291 = vmatpush3.msra.mxu1 %v3642_v15 }
 0x5f3   :  { %4258 = vmatpush3.msra.mxu0 %v3609_v29  ;;  %4292 = vmatprep.subr.mxu1 %v3657_v25 }
 0x5f4   :  { %4259 = vmatprep.subr.mxu0 %v3624_v26  ;;  %v3656_v26 = vld [vmem:[#allocation8 + $0x1c8] sm:$0xff]  ;;  %4293 = vmatpush3.msra.mxu1 %v3641_v32 }
 0x5f5   :  { %4260 = vmatpush3.msra.mxu0 %v3608_v63  ;;  %v3640_v63 = vld [vmem:[#allocation8 + $0x148] sm:$0xff]  ;;  %4294 = vmatprep.subr.mxu1 %v3656_v26 }
 0x5f6   :  { %4261 = vmatprep.subr.mxu0 %v3623_v42  ;;  %v3655_v42 = vld [vmem:[#allocation8 + $0x1c0] sm:$0xff]  ;;  %4295 = vmatpush3.msra.mxu1 %v3640_v63 }
 0x5f7   :  { %4262 = vmatpush3.msra.mxu0 %v3607_v49  ;;  %v3639_v49 = vld [vmem:[#allocation8 + $0x140] sm:$0xff]  ;;  %4296 = vmatprep.subr.mxu1 %v3655_v42 }
 0x5f8   :  { %4263 = vmatprep.subr.mxu0 %v3622_v61  ;;  %v3654_v61 = vld [vmem:[#allocation8 + $0x1b8] sm:$0xff]  ;;  %4297 = vmatpush3.msra.mxu1 %v3639_v49 }
 0x5f9   :  { %4264 = vmatpush3.msra.mxu0 %v3606_v50  ;;  %v3638_v50 = vld [vmem:[#allocation8 + $0x138] sm:$0xff]  ;;  %4298 = vmatprep.subr.mxu1 %v3654_v61 }
 0x5fa   :  { %4265 = vmatprep.subr.mxu0 %v3621_v51  ;;  %v3653_v51 = vld [vmem:[#allocation8 + $0x1b0] sm:$0xff]  ;;  %4299 = vmatpush3.msra.mxu1 %v3638_v50 }
 0x5fb   :  { %4266 = vmatpush3.msra.mxu0 %v3605_v28  ;;  %v3637_v28 = vld [vmem:[#allocation8 + $0x130] sm:$0xff]  ;;  %4300 = vmatprep.subr.mxu1 %v3653_v51 }
 0x5fc   :  { %4267 = vmatprep.subr.mxu0 %v3620_v52  ;;  %v3652_v52 = vld [vmem:[#allocation8 + $0x1a8] sm:$0xff]  ;;  %4301 = vmatpush3.msra.mxu1 %v3637_v28 }
 0x5fd   :  { %4268 = vmatpush3.msra.mxu0 %v3604_v11  ;;  %v3636_v11 = vld [vmem:[#allocation8 + $0x128] sm:$0xff]  ;;  %4302 = vmatprep.subr.mxu1 %v3652_v52 }
 0x5fe   :  { %4269 = vmatprep.subr.mxu0 %v3619_v53  ;;  %v3651_v53 = vld [vmem:[#allocation8 + $0x1a0] sm:$0xff]  ;;  %4303 = vmatpush3.msra.mxu1 %v3636_v11 }
 0x5ff   :  { %4270 = vmatpush3.msra.mxu0 %v3603_v56  ;;  %v3635_v56 = vld [vmem:[#allocation8 + $0x120] sm:$0xff]  ;;  %4304 = vmatprep.subr.mxu1 %v3651_v53 }
 0x600   :  { %4271 = vmatprep.subr.mxu0 %v3618_v57  ;;  %v3650_v57 = vld [vmem:[#allocation8 + $0x198] sm:$0xff]  ;;  %4305 = vmatpush3.msra.mxu1 %v3635_v56  ;;  %v4158_v56 = vld [vmem:[%s5719_s9] ss:$0 sm:$0xff] }
 0x601   :  { %4272 = vmatpush3.msra.mxu0 %v3602_v6  ;;  %4306 = vmatprep.subr.mxu1 %v3650_v57 }
 0x602   :  { %4273 = vmatprep.subr.mxu0 %v3617_v58  ;;  %v3634_v58 = vld [vmem:[#allocation8 + $0x118] sm:$0xff] }
 0x603   :  { %4274 = vmatpush3.msra.mxu0 %v3601_v19  ;;  %v3649_v19 = vld [vmem:[#allocation8 + $0x190] sm:$0xff]  ;;  %4307 = vmatpush3.msra.mxu1 %v3634_v58 }
 0x604   :  { %4275 = vmatprep.subr.mxu0 %v3616_v24  ;;  %4308 = vmatprep.subr.mxu1 %v3649_v19 }
 0x605   :  { %4276 = vmatpush3.msra.mxu0 %v3600_v8 }
 0x606   :  { %4277 = vmatprep.subr.mxu0 %v3615_v7  ;;  %v3633_v7 = vld [vmem:[#allocation8 + $0x110] sm:$0xff] }
 0x607   :  { %4278 = vmatpush3.msra.mxu0 %v3599_v14  ;;  %4309 = vmatpush3.msra.mxu1 %v3633_v7 }
 0x608   :  { %4310 = vmatprep.subr.mxu1 %v3648_v34 }
 0x609   :  { %4311 = vmatpush3.msra.mxu1 %v3632_v31 }
 0x628   :  { %v3351_v44 = vpop.f32.mrf.mxu0 }
 0x629   :  { %v3352_v45 = vadd.f32 %v3351_v44, %v3311_v35  ;;  %v3392_v47 = vpop.f32.mrf.mxu1  ;;  %v3647_v44 = vld [vmem:[#allocation8 + $0x180] sm:$0xff] }
 0x62a   :  { %v3353_v22 = vpop.f32.mrf.mxu0  ;;  %4312 = vmatprep.subr.mxu1 %v3647_v44 }
 0x62b   :  { %v5684_v33 = vadd.f32 %v3392_v47, %v3352_v45  ;;  %v3354_v36 = vadd.f32 %v3353_v22, %v3313_v43  ;;  %v3394_v0 = vpop.f32.mrf.mxu1  ;;  %v3631_v45 = vld [vmem:[#allocation8 + $0x100] sm:$0xff] }
 0x62c   :  { %v3355_v23 = vpop.f32.mrf.mxu0  ;;  %4313 = vmatpush3.msra.mxu1 %v3631_v45 }
 0x62d   :  { %v3567_v46 = vmul.f32 0.044715, %v5684_v33  ;;  %v5687_v60 = vadd.f32 %v3394_v0, %v3354_v36  ;;  %v3396_v37 = vpop.f32.mrf.mxu1  ;;  %v3563_v10 = vmul.f32 0.5, %v5684_v33 }
 0x62e   :  { %v3356_v41 = vpop.f32.mrf.mxu0  ;;  %v1946_v37 = vrot.slane %v5673_v13, %v1083_v59 }
 0x62f   :  { %v3571_v9 = vmul.f32 %v3567_v46, %v5684_v33  ;;  %v3568_v1 = vmul.f32 0.044715, %v5687_v60  ;;  %v3397_v54 = vpop.f32.mrf.mxu1  ;;  %v3564_v14 = vmul.f32 0.5, %v5687_v60 }
 0x631   :  { %v3575_v12 = vmul.f32 %v3571_v9, %v5684_v33  ;;  %v3572_v21 = vmul.f32 %v3568_v1, %v5687_v60 }
 0x633   :  { %v3579_v3 = vadd.f32 %v3575_v12, %v5684_v33  ;;  %v3576_v4 = vmul.f32 %v3572_v21, %v5687_v60 }
 0x635   :  { %v3580_v16 = vadd.f32 %v3576_v4, %v5687_v60  ;;  %v3583_v39 = vmul.f32 0.7978846, %v3579_v3 }
 0x637   :  { %v3584_v29 = vmul.f32 0.7978846, %v3580_v16  ;;  %4941 = vtanh.f32 %v3583_v39 }
 0x639   :  { %4943 = vtanh.f32 %v3584_v29 }
 0x644   :  { %v4942_v6 = vpop.eup %4941 }
 0x645   :  { %v3591_v8 = vadd.f32 1.0, %v4942_v6 }
 0x646   :  { %v4944_v24 = vpop.eup %4943 }
 0x647   :  { %v3592_v38 = vadd.f32 1.0, %v4944_v24  ;;  %v3595_v43 = vmul.f32 %v3591_v8, %v3563_v10 }
 0x649   :  { %v3596_v35 = vmul.f32 %v3592_v38, %v3564_v14 }
 0x64b   :  { %3734 = vmatprep.mubr.f32.mxu0 %v3596_v35 }
 0x64c   :  { %3735 = vmatmul.mubr.f32.vlgmr.msra.gmra.mxu0 %v3595_v43 }
 0x668   :  { %v3433_v47 = vpop.f32.mrf.mxu0 }
 0x669   :  { %v3474_v22 = vpop.f32.mrf.mxu1  ;;  %v3434_v41 = vadd.f32 %v3433_v47, %v1946_v37 }
 0x66a   :  { %v3435_v36 = vpop.f32.mrf.mxu0 }
 0x66b   :  { %v3476_v0 = vpop.f32.mrf.mxu1  ;;  %v3436_v40 = vadd.f32 %v3435_v36, %v1950_v18  ;;  %v3475_v9 = vadd.f32 %v3474_v22, %v3434_v41 }
 0x66c   :  { %v3437_v23 = vpop.f32.mrf.mxu0 }
 0x66d   :  { %v3478_v46 = vpop.f32.mrf.mxu1  ;;  %v3477_v54 = vadd.f32 %v3476_v0, %v3436_v40 }
 0x66e   :  { %v3438_v33 = vpop.f32.mrf.mxu0 }
 0x66f   :  { %v3479_v60 = vpop.f32.mrf.mxu1 }
 0x6a8   :  { %v3515_v1 = vpop.f32.mrf.mxu0 }
 0x6a9   :  { %v3516_v2 = vadd.f32 %v3515_v1, %v3475_v9  ;;  %v3556_v27 = vpop.f32.mrf.mxu1 }
 0x6aa   :  { %v3517_v12 = vpop.f32.mrf.mxu0 }
 0x6ab   :  { %v3557_v21 = vadd.f32 %v3556_v27, %v3516_v2  ;;  %v3518_v55 = vadd.f32 %v3517_v12, %v3477_v54  ;;  %v3558_v48 = vpop.f32.mrf.mxu1 }
 0x6ac   :  { %v3519_v3 = vpop.f32.mrf.mxu0 }
 0x6ad   :  { %v3569_v4 = vmul.f32 0.044715, %v3557_v21  ;;  %v3559_v30 = vadd.f32 %v3558_v48, %v3518_v55  ;;  %v3560_v20 = vpop.f32.mrf.mxu1  ;;  %v3565_v50 = vmul.f32 0.5, %v3557_v21 }
 0x6ae   :  { %v3520_v59 = vpop.f32.mrf.mxu0 }
 0x6af   :  { %v3573_v5 = vmul.f32 %v3569_v4, %v3557_v21  ;;  %v3570_v62 = vmul.f32 0.044715, %v3559_v30  ;;  %v3561_v15 = vpop.f32.mrf.mxu1  ;;  %v3566_v49 = vmul.f32 0.5, %v3559_v30 }
 0x6b1   :  { %v3577_v17 = vmul.f32 %v3573_v5, %v3557_v21  ;;  %v3574_v13 = vmul.f32 %v3570_v62, %v3559_v30 }
 0x6b3   :  { %v3581_v16 = vadd.f32 %v3577_v17, %v3557_v21  ;;  %v3578_v39 = vmul.f32 %v3574_v13, %v3559_v30 }
 0x6b5   :  { %v3582_v25 = vadd.f32 %v3578_v39, %v3559_v30  ;;  %v3585_v32 = vmul.f32 0.7978846, %v3581_v16 }
 0x6b7   :  { %v3586_v29 = vmul.f32 0.7978846, %v3582_v25  ;;  %4945 = vtanh.f32 %v3585_v32 }
 0x6b9   :  { %4947 = vtanh.f32 %v3586_v29 }
 0x6c4   :  { %v4946_v26 = vpop.eup %4945 }
 0x6c5   :  { %v3593_v42 = vadd.f32 1.0, %v4946_v26 }
 0x6c6   :  { %v4948_v63 = vpop.eup %4947 }
 0x6c7   :  { %v3594_v61 = vadd.f32 1.0, %v4948_v63  ;;  %v3597_v28 = vmul.f32 %v3593_v42, %v3565_v50 }
 0x6c9   :  { %v3598_v51 = vmul.f32 %v3594_v61, %v3566_v49 }
 0x6cb   :  { %3804 = vmatprep.mubr.f32.mxu1 %v3598_v51 }
 0x6cc   :  { %3805 = vmatmul.mubr.f32.vlgmr.msra.gmra.mxu1 %v3597_v28 }
 0x70c   :  { %v4279_v52 = vpop.f32.mrf.mxu0 }
 0x70e   :  { %v4280_v11 = vpop.f32.mrf.mxu0 }
 0x70f   :  { %v4281_v53 = vadd.f32 %v4280_v11, %v4279_v52 }
 0x711   :  { %v3737_v58 = vadd.f32 %v4281_v53, %v4158_v56 }
 0x78c   :  { %v4314_v57 = vpop.f32.mrf.mxu1 }
 0x78e   :  { %v4315_v6 = vpop.f32.mrf.mxu1 }
 0x78f   :  { %v4316_v19 = vadd.f32 %v4315_v6, %v4314_v57 }
 0x791   :  { %v3807_v24 = vadd.f32 %v4316_v19, %v3737_v58 }
 0x793   :  { %3810 = vst [vmem:[#allocation10] sm:$0x3] %v3807_v24 }
 0x794   :  { %5040 = shalt.err (!%p5037_p10)
}
 0x795   :  { %3820 = dma.vmem_to_hbm [thread:$0]  %s3818_s15, 32, %s5720_s10, [#allocation4]  }
 0x796   :  { %5055 = dma.done.wait [#allocation4], 32  }
 0x797   :  { %5056 = vsyncadd [#allocation4], 4294967264 }
 0x798   :  { %3824 = vsyncpa [#allocation3], 1 }
 0x799   :  { %3825 = vsyncpa [#allocation6], 1 }
 0x79a   :  { %3826 = vsyncpa [#allocation9], 1 }
 0x79b   :  { %3827 = vsyncpa [#allocation4], 1 }

</bundles_post_ra>
